<compile_context>
chip_gen: v7x
topology: tpu7x:2x2x1
jax: 0.10.0
libtpu: 0.0.40
codegen_flags: <defaults>
</compile_context>

<pallas_src>
import jax
import jax.numpy as jnp
from jax.experimental import pallas as pl
from jax.experimental.pallas import tpu as pltpu


def double_conv3x3_bn_relu(x, w1, b1, g1, be1, m1, v1,
                           w2, b2, g2, be2, m2, v2,
                           *, eps=1e-5, block_b=1):
    """x: (B, C_in, H, W) f32. Conv weights in PyTorch OIHW layout, biases (C,)."""
    B, C_in, H, W = x.shape
    C_out = w1.shape[0]
    HW = H * W
    assert B % block_b == 0
    PAD = 128                      # left/right zero pad of the flat spatial buffer
    assert W + 1 <= PAD, "kernel assumes W <= 127"
    SW = HW + 2 * PAD

    # ---- offline weight prep: fold inference-mode BN (scale/shift) + bias ----
    s1 = g1 * jax.lax.rsqrt(v1 + eps)                         # (C_out,)
    w1f = w1 * s1[:, None, None, None]                        # (C_out, C_in, 3, 3)
    b1f = s1 * b1 + (be1 - s1 * m1)                           # (C_out,)
    s2 = g2 * jax.lax.rsqrt(v2 + eps)
    w2f = w2 * s2[:, None, None, None]
    b2f = s2 * b2 + (be2 - s2 * m2)

    # per-tap channel-mix matrices, indexable by t = ky*3 + kx
    w1k = jnp.transpose(w1f, (2, 3, 0, 1)).reshape(9, C_out, C_in)
    w2k = jnp.transpose(w2f, (2, 3, 0, 1)).reshape(9, C_out, C_out)
    b1k = b1f[:, None]                                        # (C_out, 1)
    b2k = b2f[:, None]

    # lane masks killing horizontal row-wrap contributions (kx=0 reads x-1, kx=2 reads x+1)
    col = jnp.arange(HW, dtype=jnp.int32) % W
    masks = jnp.stack([(col != 0), (col != W - 1)]).astype(jnp.float32)   # (2, HW)

    # free, contiguous reshape: NCHW -> (B, C, H*W) (lane-dense last dim)
    xr = x.reshape(B, C_in, HW)

    def kernel(x_ref, w1_ref, b1_ref, w2_ref, b2_ref, m_ref, o_ref, xf_ref, hf_ref):
        m_left = m_ref[0:1, :]                                 # (1, HW)
        m_right = m_ref[1:2, :]                                # (1, HW)

        def conv3x3(src_ref, w_ref, b_ref, cin, cout):
            # src_ref: zero-padded flat buffer (cin, SW); weights (9, cout, cin)
            total = jnp.zeros((cout, HW), jnp.float32)
            for dx in range(3):
                part = jnp.zeros((cout, HW), jnp.float32)
                for dy in range(3):
                    t = dy * 3 + dx
                    shift = (dy - 1) * W + (dx - 1)
                    slab = src_ref[:, PAD + shift: PAD + shift + HW]     # (cin, HW)
                    w_tap = w_ref[t]                                     # (cout, cin)
                    if cin >= 32:
                        # big channel count: use the MXU
                        part = part + jnp.dot(w_tap, slab,
                                              preferred_element_type=jnp.float32)
                    else:
                        # degenerate contraction: VPU broadcast-FMA (exact f32)
                        for ci in range(cin):
                            part = part + w_tap[:, ci:ci + 1] * slab[ci:ci + 1, :]
                if dx == 0:
                    part = part * m_left
                elif dx == 2:
                    part = part * m_right
                total = total + part
            return total + b_ref[...]                           # bias broadcast (cout,1)

        for b in range(block_b):
            # ---- conv1 + folded BN1 + ReLU ----
            xf_ref[...] = jnp.zeros_like(xf_ref)
            xf_ref[:, PAD:PAD + HW] = x_ref[b].astype(jnp.float32)
            h = jnp.maximum(conv3x3(xf_ref, w1_ref, b1_ref, C_in, C_out), 0.0)

            # ---- conv2 + folded BN2 + ReLU (intermediate stays in VMEM) ----
            hf_ref[...] = jnp.zeros_like(hf_ref)
            hf_ref[:, PAD:PAD + HW] = h
            y = jnp.maximum(conv3x3(hf_ref, w2_ref, b2_ref, C_out, C_out), 0.0)
            o_ref[b] = y.astype(o_ref.dtype)

    out = pl.pallas_call(
        kernel,
        out_shape=jax.ShapeDtypeStruct((B, C_out, HW), x.dtype),
        grid_spec=pltpu.PrefetchScalarGridSpec(
            num_scalar_prefetch=0,
            grid=(B // block_b,),
            in_specs=[
                pl.BlockSpec((block_b, C_in, HW), lambda i: (i, 0, 0)),
                pl.BlockSpec((9, C_out, C_in), lambda i: (0, 0, 0)),
                pl.BlockSpec((C_out, 1), lambda i: (0, 0)),
                pl.BlockSpec((9, C_out, C_out), lambda i: (0, 0, 0)),
                pl.BlockSpec((C_out, 1), lambda i: (0, 0)),
                pl.BlockSpec((2, HW), lambda i: (0, 0)),
            ],
            out_specs=pl.BlockSpec((block_b, C_out, HW), lambda i: (i, 0, 0)),
            scratch_shapes=[
                pltpu.VMEM((C_in, SW), jnp.float32),
                pltpu.VMEM((C_out, SW), jnp.float32),
            ],
        ),
        compiler_params=pltpu.CompilerParams(dimension_semantics=("parallel",)),
    )(xr, w1k, b1k, w2k, b2k, masks)

    return out.reshape(B, C_out, H, W)


def reference(x, w1, b1, g1, be1, m1, v1, w2, b2, g2, be2, m2, v2, eps=1e-5):
    """Pure-JAX reference of the PyTorch forward (BN in inference mode)."""
    def conv(xx, w, b):
        y = jax.lax.conv_general_dilated(
            xx, w, window_strides=(1, 1), padding=((1, 1), (1, 1)),
            dimension_numbers=("NCHW", "OIHW", "NCHW"),
            precision=jax.lax.Precision.HIGHEST)
        return y + b[None, :, None, None]

    def bn(xx, g, be, m, v):
        scale = (g * jax.lax.rsqrt(v + eps))[None, :, None, None]
        return (xx - m[None, :, None, None]) * scale + be[None, :, None, None]

    h = jnp.maximum(bn(conv(x, w1, b1), g1, be1, m1, v1), 0.0)
    return jnp.maximum(bn(conv(h, w2, b2), g2, be2, m2, v2), 0.0)


if __name__ == "__main__":
    B, C_in, C_out, H, W = 2, 4, 8, 16, 16
    eps = 1e-5

    key = jax.random.PRNGKey(0)
    ks = jax.random.split(key, 13)
    x = jax.random.normal(ks[0], (B, C_in, H, W), dtype=jnp.float32)
    w1 = 0.1 * jax.random.normal(ks[1], (C_out, C_in, 3, 3), dtype=jnp.float32)
    b1 = 0.1 * jax.random.normal(ks[2], (C_out,), dtype=jnp.float32)
    g1 = 1.0 + 0.1 * jax.random.normal(ks[3], (C_out,), dtype=jnp.float32)
    be1 = 0.1 * jax.random.normal(ks[4], (C_out,), dtype=jnp.float32)
    m1 = 0.1 * jax.random.normal(ks[5], (C_out,), dtype=jnp.float32)
    v1 = 1.0 + 0.2 * jax.random.uniform(ks[6], (C_out,), dtype=jnp.float32)
    w2 = 0.1 * jax.random.normal(ks[7], (C_out, C_out, 3, 3), dtype=jnp.float32)
    b2 = 0.1 * jax.random.normal(ks[8], (C_out,), dtype=jnp.float32)
    g2 = 1.0 + 0.1 * jax.random.normal(ks[9], (C_out,), dtype=jnp.float32)
    be2 = 0.1 * jax.random.normal(ks[10], (C_out,), dtype=jnp.float32)
    m2 = 0.1 * jax.random.normal(ks[11], (C_out,), dtype=jnp.float32)
    v2 = 1.0 + 0.2 * jax.random.uniform(ks[12], (C_out,), dtype=jnp.float32)

    y = double_conv3x3_bn_relu(x, w1, b1, g1, be1, m1, v1,
                               w2, b2, g2, be2, m2, v2, eps=eps, block_b=1)
    y = jax.block_until_ready(y)

    y_ref = jax.block_until_ready(
        reference(x, w1, b1, g1, be1, m1, v1, w2, b2, g2, be2, m2, v2, eps))

    assert y.shape == (B, C_out, H, W)
    max_err = float(jnp.max(jnp.abs(y - y_ref)))
    assert jnp.allclose(y, y_ref, rtol=1e-4, atol=1e-4), f"mismatch vs reference (max abs err {max_err})"

    print("KERNEL_OK")
</pallas_src>

<mosaic_0001>
module attributes {stable_mosaic.version = 11 : i64} {
  func.func @kernel(%arg0: i32, %arg1: memref<1x4x256xf32, #tpu.memory_space<vmem>>, %arg2: memref<9x8x4xf32, #tpu.memory_space<vmem>>, %arg3: memref<8x1xf32, #tpu.memory_space<vmem>>, %arg4: memref<9x8x8xf32, #tpu.memory_space<vmem>>, %arg5: memref<8x1xf32, #tpu.memory_space<vmem>>, %arg6: memref<2x256xf32, #tpu.memory_space<vmem>>, %arg7: memref<1x8x256xf32, #tpu.memory_space<vmem>>, %arg8: memref<4x512xf32, #tpu.memory_space<vmem>>, %arg9: memref<8x512xf32, #tpu.memory_space<vmem>>) attributes {dimension_semantics = [#tpu.dimension_semantics<parallel>], iteration_bounds = array<i64: 2>, scalar_prefetch = 0 : i64, scratch_operands = 2 : i64, tpu.core_type = #tpu.core_type<tc>, window_params = [{transform_indices = @transform_0, window_bounds = array<i64: 1, 4, 256>}, {pipeline_mode = #tpu.pipeline_mode<synchronous>, transform_indices = @transform_1, window_bounds = array<i64: 9, 8, 4>}, {pipeline_mode = #tpu.pipeline_mode<synchronous>, transform_indices = @transform_2, window_bounds = array<i64: 8, 1>}, {pipeline_mode = #tpu.pipeline_mode<synchronous>, transform_indices = @transform_3, window_bounds = array<i64: 9, 8, 8>}, {pipeline_mode = #tpu.pipeline_mode<synchronous>, transform_indices = @transform_4, window_bounds = array<i64: 8, 1>}, {pipeline_mode = #tpu.pipeline_mode<synchronous>, transform_indices = @transform_5, window_bounds = array<i64: 2, 256>}, {transform_indices = @transform_6, window_bounds = array<i64: 1, 8, 256>}]} {
    %c0 = arith.constant 0 : index
    %c0_0 = arith.constant 0 : index
    %0 = vector.load %arg6[%c0, %c0_0] : memref<2x256xf32, #tpu.memory_space<vmem>>, vector<1x256xf32>
    %c1 = arith.constant 1 : index
    %c0_1 = arith.constant 0 : index
    %1 = vector.load %arg6[%c1, %c0_1] : memref<2x256xf32, #tpu.memory_space<vmem>>, vector<1x256xf32>
    %cst = arith.constant 0.000000e+00 : f32
    %2 = vector.broadcast %cst : f32 to vector<4x512xf32>
    %c0_2 = arith.constant 0 : index
    %c0_3 = arith.constant 0 : index
    %3 = vector.load %arg8[%c0_2, %c0_3] : memref<4x512xf32, #tpu.memory_space<vmem>>, vector<4x512xf32>
    tpu.vector_store %arg8[%c0_2, %c0_3], %2 {strides = array<i32>} : memref<4x512xf32, #tpu.memory_space<vmem>>, vector<4x512xf32>,
    %c0_4 = arith.constant 0 : index
    %c0_5 = arith.constant 0 : index
    %c0_6 = arith.constant 0 : index
    %4 = vector.load %arg1[%c0_4, %c0_5, %c0_6] : memref<1x4x256xf32, #tpu.memory_space<vmem>>, vector<1x4x256xf32>
    %5 = vector.shape_cast %4 : vector<1x4x256xf32> to vector<4x256xf32>
    %c0_7 = arith.constant 0 : index
    %c128 = arith.constant 128 : index
    %6 = vector.load %arg8[%c0_7, %c128] : memref<4x512xf32, #tpu.memory_space<vmem>>, vector<4x256xf32>
    tpu.vector_store %arg8[%c0_7, %c128], %5 {strides = array<i32>} : memref<4x512xf32, #tpu.memory_space<vmem>>, vector<4x256xf32>,
    %cst_8 = arith.constant 0.000000e+00 : f32
    %7 = vector.broadcast %cst_8 : f32 to vector<8x256xf32>
    %cst_9 = arith.constant 0.000000e+00 : f32
    %8 = vector.broadcast %cst_9 : f32 to vector<8x256xf32>
    %c0_10 = arith.constant 0 : index
    %c111 = arith.constant 111 : index
    %9 = vector.load %arg8[%c0_10, %c111] : memref<4x512xf32, #tpu.memory_space<vmem>>, vector<4x256xf32>
    %c0_11 = arith.constant 0 : index
    %c0_12 = arith.constant 0 : index
    %c0_13 = arith.constant 0 : index
    %10 = vector.load %arg2[%c0_11, %c0_12, %c0_13] : memref<9x8x4xf32, #tpu.memory_space<vmem>>, vector<1x8x4xf32>
    %11 = vector.shape_cast %10 : vector<1x8x4xf32> to vector<8x4xf32>
    %12 = vector.extract_strided_slice %11 {offsets = [0, 0], sizes = [8, 1], strides = [1, 1]} : vector<8x4xf32> to vector<8x1xf32>
    %13 = vector.extract_strided_slice %9 {offsets = [0, 0], sizes = [1, 256], strides = [1, 1]} : vector<4x256xf32> to vector<1x256xf32>
    %14 = vector.broadcast %12 : vector<8x1xf32> to vector<8x256xf32>
    %15 = vector.broadcast %13 : vector<1x256xf32> to vector<8x256xf32>
    %16 = arith.mulf %14, %15 : vector<8x256xf32>
    %17 = arith.addf %8, %16 : vector<8x256xf32>
    %18 = vector.extract_strided_slice %11 {offsets = [0, 1], sizes = [8, 1], strides = [1, 1]} : vector<8x4xf32> to vector<8x1xf32>
    %19 = vector.extract_strided_slice %9 {offsets = [1, 0], sizes = [1, 256], strides = [1, 1]} : vector<4x256xf32> to vector<1x256xf32>
    %20 = vector.broadcast %18 : vector<8x1xf32> to vector<8x256xf32>
    %21 = vector.broadcast %19 : vector<1x256xf32> to vector<8x256xf32>
    %22 = arith.mulf %20, %21 : vector<8x256xf32>
    %23 = arith.addf %17, %22 : vector<8x256xf32>
    %24 = vector.extract_strided_slice %11 {offsets = [0, 2], sizes = [8, 1], strides = [1, 1]} : vector<8x4xf32> to vector<8x1xf32>
    %25 = vector.extract_strided_slice %9 {offsets = [2, 0], sizes = [1, 256], strides = [1, 1]} : vector<4x256xf32> to vector<1x256xf32>
    %26 = vector.broadcast %24 : vector<8x1xf32> to vector<8x256xf32>
    %27 = vector.broadcast %25 : vector<1x256xf32> to vector<8x256xf32>
    %28 = arith.mulf %26, %27 : vector<8x256xf32>
    %29 = arith.addf %23, %28 : vector<8x256xf32>
    %30 = vector.extract_strided_slice %11 {offsets = [0, 3], sizes = [8, 1], strides = [1, 1]} : vector<8x4xf32> to vector<8x1xf32>
    %31 = vector.extract_strided_slice %9 {offsets = [3, 0], sizes = [1, 256], strides = [1, 1]} : vector<4x256xf32> to vector<1x256xf32>
    %32 = vector.broadcast %30 : vector<8x1xf32> to vector<8x256xf32>
    %33 = vector.broadcast %31 : vector<1x256xf32> to vector<8x256xf32>
    %34 = arith.mulf %32, %33 : vector<8x256xf32>
    %35 = arith.addf %29, %34 : vector<8x256xf32>
    %c0_14 = arith.constant 0 : index
    %c127 = arith.constant 127 : index
    %36 = vector.load %arg8[%c0_14, %c127] : memref<4x512xf32, #tpu.memory_space<vmem>>, vector<4x256xf32>
    %c3 = arith.constant 3 : index
    %c0_15 = arith.constant 0 : index
    %c0_16 = arith.constant 0 : index
    %37 = vector.load %arg2[%c3, %c0_15, %c0_16] : memref<9x8x4xf32, #tpu.memory_space<vmem>>, vector<1x8x4xf32>
    %38 = vector.shape_cast %37 : vector<1x8x4xf32> to vector<8x4xf32>
    %39 = vector.extract_strided_slice %38 {offsets = [0, 0], sizes = [8, 1], strides = [1, 1]} : vector<8x4xf32> to vector<8x1xf32>
    %40 = vector.extract_strided_slice %36 {offsets = [0, 0], sizes = [1, 256], strides = [1, 1]} : vector<4x256xf32> to vector<1x256xf32>
    %41 = vector.broadcast %39 : vector<8x1xf32> to vector<8x256xf32>
    %42 = vector.broadcast %40 : vector<1x256xf32> to vector<8x256xf32>
    %43 = arith.mulf %41, %42 : vector<8x256xf32>
    %44 = arith.addf %35, %43 : vector<8x256xf32>
    %45 = vector.extract_strided_slice %38 {offsets = [0, 1], sizes = [8, 1], strides = [1, 1]} : vector<8x4xf32> to vector<8x1xf32>
    %46 = vector.extract_strided_slice %36 {offsets = [1, 0], sizes = [1, 256], strides = [1, 1]} : vector<4x256xf32> to vector<1x256xf32>
    %47 = vector.broadcast %45 : vector<8x1xf32> to vector<8x256xf32>
    %48 = vector.broadcast %46 : vector<1x256xf32> to vector<8x256xf32>
    %49 = arith.mulf %47, %48 : vector<8x256xf32>
    %50 = arith.addf %44, %49 : vector<8x256xf32>
    %51 = vector.extract_strided_slice %38 {offsets = [0, 2], sizes = [8, 1], strides = [1, 1]} : vector<8x4xf32> to vector<8x1xf32>
    %52 = vector.extract_strided_slice %36 {offsets = [2, 0], sizes = [1, 256], strides = [1, 1]} : vector<4x256xf32> to vector<1x256xf32>
    %53 = vector.broadcast %51 : vector<8x1xf32> to vector<8x256xf32>
    %54 = vector.broadcast %52 : vector<1x256xf32> to vector<8x256xf32>
    %55 = arith.mulf %53, %54 : vector<8x256xf32>
    %56 = arith.addf %50, %55 : vector<8x256xf32>
    %57 = vector.extract_strided_slice %38 {offsets = [0, 3], sizes = [8, 1], strides = [1, 1]} : vector<8x4xf32> to vector<8x1xf32>
    %58 = vector.extract_strided_slice %36 {offsets = [3, 0], sizes = [1, 256], strides = [1, 1]} : vector<4x256xf32> to vector<1x256xf32>
    %59 = vector.broadcast %57 : vector<8x1xf32> to vector<8x256xf32>
    %60 = vector.broadcast %58 : vector<1x256xf32> to vector<8x256xf32>
    %61 = arith.mulf %59, %60 : vector<8x256xf32>
    %62 = arith.addf %56, %61 : vector<8x256xf32>
    %c0_17 = arith.constant 0 : index
    %c143 = arith.constant 143 : index
    %63 = vector.load %arg8[%c0_17, %c143] : memref<4x512xf32, #tpu.memory_space<vmem>>, vector<4x256xf32>
    %c6 = arith.constant 6 : index
    %c0_18 = arith.constant 0 : index
    %c0_19 = arith.constant 0 : index
    %64 = vector.load %arg2[%c6, %c0_18, %c0_19] : memref<9x8x4xf32, #tpu.memory_space<vmem>>, vector<1x8x4xf32>
    %65 = vector.shape_cast %64 : vector<1x8x4xf32> to vector<8x4xf32>
    %66 = vector.extract_strided_slice %65 {offsets = [0, 0], sizes = [8, 1], strides = [1, 1]} : vector<8x4xf32> to vector<8x1xf32>
    %67 = vector.extract_strided_slice %63 {offsets = [0, 0], sizes = [1, 256], strides = [1, 1]} : vector<4x256xf32> to vector<1x256xf32>
    %68 = vector.broadcast %66 : vector<8x1xf32> to vector<8x256xf32>
    %69 = vector.broadcast %67 : vector<1x256xf32> to vector<8x256xf32>
    %70 = arith.mulf %68, %69 : vector<8x256xf32>
    %71 = arith.addf %62, %70 : vector<8x256xf32>
    %72 = vector.extract_strided_slice %65 {offsets = [0, 1], sizes = [8, 1], strides = [1, 1]} : vector<8x4xf32> to vector<8x1xf32>
    %73 = vector.extract_strided_slice %63 {offsets = [1, 0], sizes = [1, 256], strides = [1, 1]} : vector<4x256xf32> to vector<1x256xf32>
    %74 = vector.broadcast %72 : vector<8x1xf32> to vector<8x256xf32>
    %75 = vector.broadcast %73 : vector<1x256xf32> to vector<8x256xf32>
    %76 = arith.mulf %74, %75 : vector<8x256xf32>
    %77 = arith.addf %71, %76 : vector<8x256xf32>
    %78 = vector.extract_strided_slice %65 {offsets = [0, 2], sizes = [8, 1], strides = [1, 1]} : vector<8x4xf32> to vector<8x1xf32>
    %79 = vector.extract_strided_slice %63 {offsets = [2, 0], sizes = [1, 256], strides = [1, 1]} : vector<4x256xf32> to vector<1x256xf32>
    %80 = vector.broadcast %78 : vector<8x1xf32> to vector<8x256xf32>
    %81 = vector.broadcast %79 : vector<1x256xf32> to vector<8x256xf32>
    %82 = arith.mulf %80, %81 : vector<8x256xf32>
    %83 = arith.addf %77, %82 : vector<8x256xf32>
    %84 = vector.extract_strided_slice %65 {offsets = [0, 3], sizes = [8, 1], strides = [1, 1]} : vector<8x4xf32> to vector<8x1xf32>
    %85 = vector.extract_strided_slice %63 {offsets = [3, 0], sizes = [1, 256], strides = [1, 1]} : vector<4x256xf32> to vector<1x256xf32>
    %86 = vector.broadcast %84 : vector<8x1xf32> to vector<8x256xf32>
    %87 = vector.broadcast %85 : vector<1x256xf32> to vector<8x256xf32>
    %88 = arith.mulf %86, %87 : vector<8x256xf32>
    %89 = arith.addf %83, %88 : vector<8x256xf32>
    %90 = vector.broadcast %0 : vector<1x256xf32> to vector<8x256xf32>
    %91 = arith.mulf %89, %90 : vector<8x256xf32>
    %92 = arith.addf %7, %91 : vector<8x256xf32>
    %cst_20 = arith.constant 0.000000e+00 : f32
    %93 = vector.broadcast %cst_20 : f32 to vector<8x256xf32>
    %c0_21 = arith.constant 0 : index
    %c112 = arith.constant 112 : index
    %94 = vector.load %arg8[%c0_21, %c112] : memref<4x512xf32, #tpu.memory_space<vmem>>, vector<4x256xf32>
    %c1_22 = arith.constant 1 : index
    %c0_23 = arith.constant 0 : index
    %c0_24 = arith.constant 0 : index
    %95 = vector.load %arg2[%c1_22, %c0_23, %c0_24] : memref<9x8x4xf32, #tpu.memory_space<vmem>>, vector<1x8x4xf32>
    %96 = vector.shape_cast %95 : vector<1x8x4xf32> to vector<8x4xf32>
    %97 = vector.extract_strided_slice %96 {offsets = [0, 0], sizes = [8, 1], strides = [1, 1]} : vector<8x4xf32> to vector<8x1xf32>
    %98 = vector.extract_strided_slice %94 {offsets = [0, 0], sizes = [1, 256], strides = [1, 1]} : vector<4x256xf32> to vector<1x256xf32>
    %99 = vector.broadcast %97 : vector<8x1xf32> to vector<8x256xf32>
    %100 = vector.broadcast %98 : vector<1x256xf32> to vector<8x256xf32>
    %101 = arith.mulf %99, %100 : vector<8x256xf32>
    %102 = arith.addf %93, %101 : vector<8x256xf32>
    %103 = vector.extract_strided_slice %96 {offsets = [0, 1], sizes = [8, 1], strides = [1, 1]} : vector<8x4xf32> to vector<8x1xf32>
    %104 = vector.extract_strided_slice %94 {offsets = [1, 0], sizes = [1, 256], strides = [1, 1]} : vector<4x256xf32> to vector<1x256xf32>
    %105 = vector.broadcast %103 : vector<8x1xf32> to vector<8x256xf32>
    %106 = vector.broadcast %104 : vector<1x256xf32> to vector<8x256xf32>
    %107 = arith.mulf %105, %106 : vector<8x256xf32>
    %108 = arith.addf %102, %107 : vector<8x256xf32>
    %109 = vector.extract_strided_slice %96 {offsets = [0, 2], sizes = [8, 1], strides = [1, 1]} : vector<8x4xf32> to vector<8x1xf32>
    %110 = vector.extract_strided_slice %94 {offsets = [2, 0], sizes = [1, 256], strides = [1, 1]} : vector<4x256xf32> to vector<1x256xf32>
    %111 = vector.broadcast %109 : vector<8x1xf32> to vector<8x256xf32>
    %112 = vector.broadcast %110 : vector<1x256xf32> to vector<8x256xf32>
    %113 = arith.mulf %111, %112 : vector<8x256xf32>
    %114 = arith.addf %108, %113 : vector<8x256xf32>
    %115 = vector.extract_strided_slice %96 {offsets = [0, 3], sizes = [8, 1], strides = [1, 1]} : vector<8x4xf32> to vector<8x1xf32>
    %116 = vector.extract_strided_slice %94 {offsets = [3, 0], sizes = [1, 256], strides = [1, 1]} : vector<4x256xf32> to vector<1x256xf32>
    %117 = vector.broadcast %115 : vector<8x1xf32> to vector<8x256xf32>
    %118 = vector.broadcast %116 : vector<1x256xf32> to vector<8x256xf32>
    %119 = arith.mulf %117, %118 : vector<8x256xf32>
    %120 = arith.addf %114, %119 : vector<8x256xf32>
    %c0_25 = arith.constant 0 : index
    %c128_26 = arith.constant 128 : index
    %121 = vector.load %arg8[%c0_25, %c128_26] : memref<4x512xf32, #tpu.memory_space<vmem>>, vector<4x256xf32>
    %c4 = arith.constant 4 : index
    %c0_27 = arith.constant 0 : index
    %c0_28 = arith.constant 0 : index
    %122 = vector.load %arg2[%c4, %c0_27, %c0_28] : memref<9x8x4xf32, #tpu.memory_space<vmem>>, vector<1x8x4xf32>
    %123 = vector.shape_cast %122 : vector<1x8x4xf32> to vector<8x4xf32>
    %124 = vector.extract_strided_slice %123 {offsets = [0, 0], sizes = [8, 1], strides = [1, 1]} : vector<8x4xf32> to vector<8x1xf32>
    %125 = vector.extract_strided_slice %121 {offsets = [0, 0], sizes = [1, 256], strides = [1, 1]} : vector<4x256xf32> to vector<1x256xf32>
    %126 = vector.broadcast %124 : vector<8x1xf32> to vector<8x256xf32>
    %127 = vector.broadcast %125 : vector<1x256xf32> to vector<8x256xf32>
    %128 = arith.mulf %126, %127 : vector<8x256xf32>
    %129 = arith.addf %120, %128 : vector<8x256xf32>
    %130 = vector.extract_strided_slice %123 {offsets = [0, 1], sizes = [8, 1], strides = [1, 1]} : vector<8x4xf32> to vector<8x1xf32>
    %131 = vector.extract_strided_slice %121 {offsets = [1, 0], sizes = [1, 256], strides = [1, 1]} : vector<4x256xf32> to vector<1x256xf32>
    %132 = vector.broadcast %130 : vector<8x1xf32> to vector<8x256xf32>
    %133 = vector.broadcast %131 : vector<1x256xf32> to vector<8x256xf32>
    %134 = arith.mulf %132, %133 : vector<8x256xf32>
    %135 = arith.addf %129, %134 : vector<8x256xf32>
    %136 = vector.extract_strided_slice %123 {offsets = [0, 2], sizes = [8, 1], strides = [1, 1]} : vector<8x4xf32> to vector<8x1xf32>
    %137 = vector.extract_strided_slice %121 {offsets = [2, 0], sizes = [1, 256], strides = [1, 1]} : vector<4x256xf32> to vector<1x256xf32>
    %138 = vector.broadcast %136 : vector<8x1xf32> to vector<8x256xf32>
    %139 = vector.broadcast %137 : vector<1x256xf32> to vector<8x256xf32>
    %140 = arith.mulf %138, %139 : vector<8x256xf32>
    %141 = arith.addf %135, %140 : vector<8x256xf32>
    %142 = vector.extract_strided_slice %123 {offsets = [0, 3], sizes = [8, 1], strides = [1, 1]} : vector<8x4xf32> to vector<8x1xf32>
    %143 = vector.extract_strided_slice %121 {offsets = [3, 0], sizes = [1, 256], strides = [1, 1]} : vector<4x256xf32> to vector<1x256xf32>
    %144 = vector.broadcast %142 : vector<8x1xf32> to vector<8x256xf32>
    %145 = vector.broadcast %143 : vector<1x256xf32> to vector<8x256xf32>
    %146 = arith.mulf %144, %145 : vector<8x256xf32>
    %147 = arith.addf %141, %146 : vector<8x256xf32>
    %c0_29 = arith.constant 0 : index
    %c144 = arith.constant 144 : index
    %148 = vector.load %arg8[%c0_29, %c144] : memref<4x512xf32, #tpu.memory_space<vmem>>, vector<4x256xf32>
    %c7 = arith.constant 7 : index
    %c0_30 = arith.constant 0 : index
    %c0_31 = arith.constant 0 : index
    %149 = vector.load %arg2[%c7, %c0_30, %c0_31] : memref<9x8x4xf32, #tpu.memory_space<vmem>>, vector<1x8x4xf32>
    %150 = vector.shape_cast %149 : vector<1x8x4xf32> to vector<8x4xf32>
    %151 = vector.extract_strided_slice %150 {offsets = [0, 0], sizes = [8, 1], strides = [1, 1]} : vector<8x4xf32> to vector<8x1xf32>
    %152 = vector.extract_strided_slice %148 {offsets = [0, 0], sizes = [1, 256], strides = [1, 1]} : vector<4x256xf32> to vector<1x256xf32>
    %153 = vector.broadcast %151 : vector<8x1xf32> to vector<8x256xf32>
    %154 = vector.broadcast %152 : vector<1x256xf32> to vector<8x256xf32>
    %155 = arith.mulf %153, %154 : vector<8x256xf32>
    %156 = arith.addf %147, %155 : vector<8x256xf32>
    %157 = vector.extract_strided_slice %150 {offsets = [0, 1], sizes = [8, 1], strides = [1, 1]} : vector<8x4xf32> to vector<8x1xf32>
    %158 = vector.extract_strided_slice %148 {offsets = [1, 0], sizes = [1, 256], strides = [1, 1]} : vector<4x256xf32> to vector<1x256xf32>
    %159 = vector.broadcast %157 : vector<8x1xf32> to vector<8x256xf32>
    %160 = vector.broadcast %158 : vector<1x256xf32> to vector<8x256xf32>
    %161 = arith.mulf %159, %160 : vector<8x256xf32>
    %162 = arith.addf %156, %161 : vector<8x256xf32>
    %163 = vector.extract_strided_slice %150 {offsets = [0, 2], sizes = [8, 1], strides = [1, 1]} : vector<8x4xf32> to vector<8x1xf32>
    %164 = vector.extract_strided_slice %148 {offsets = [2, 0], sizes = [1, 256], strides = [1, 1]} : vector<4x256xf32> to vector<1x256xf32>
    %165 = vector.broadcast %163 : vector<8x1xf32> to vector<8x256xf32>
    %166 = vector.broadcast %164 : vector<1x256xf32> to vector<8x256xf32>
    %167 = arith.mulf %165, %166 : vector<8x256xf32>
    %168 = arith.addf %162, %167 : vector<8x256xf32>
    %169 = vector.extract_strided_slice %150 {offsets = [0, 3], sizes = [8, 1], strides = [1, 1]} : vector<8x4xf32> to vector<8x1xf32>
    %170 = vector.extract_strided_slice %148 {offsets = [3, 0], sizes = [1, 256], strides = [1, 1]} : vector<4x256xf32> to vector<1x256xf32>
    %171 = vector.broadcast %169 : vector<8x1xf32> to vector<8x256xf32>
    %172 = vector.broadcast %170 : vector<1x256xf32> to vector<8x256xf32>
    %173 = arith.mulf %171, %172 : vector<8x256xf32>
    %174 = arith.addf %168, %173 : vector<8x256xf32>
    %175 = arith.addf %92, %174 : vector<8x256xf32>
    %cst_32 = arith.constant 0.000000e+00 : f32
    %176 = vector.broadcast %cst_32 : f32 to vector<8x256xf32>
    %c0_33 = arith.constant 0 : index
    %c113 = arith.constant 113 : index
    %177 = vector.load %arg8[%c0_33, %c113] : memref<4x512xf32, #tpu.memory_space<vmem>>, vector<4x256xf32>
    %c2 = arith.constant 2 : index
    %c0_34 = arith.constant 0 : index
    %c0_35 = arith.constant 0 : index
    %178 = vector.load %arg2[%c2, %c0_34, %c0_35] : memref<9x8x4xf32, #tpu.memory_space<vmem>>, vector<1x8x4xf32>
    %179 = vector.shape_cast %178 : vector<1x8x4xf32> to vector<8x4xf32>
    %180 = vector.extract_strided_slice %179 {offsets = [0, 0], sizes = [8, 1], strides = [1, 1]} : vector<8x4xf32> to vector<8x1xf32>
    %181 = vector.extract_strided_slice %177 {offsets = [0, 0], sizes = [1, 256], strides = [1, 1]} : vector<4x256xf32> to vector<1x256xf32>
    %182 = vector.broadcast %180 : vector<8x1xf32> to vector<8x256xf32>
    %183 = vector.broadcast %181 : vector<1x256xf32> to vector<8x256xf32>
    %184 = arith.mulf %182, %183 : vector<8x256xf32>
    %185 = arith.addf %176, %184 : vector<8x256xf32>
    %186 = vector.extract_strided_slice %179 {offsets = [0, 1], sizes = [8, 1], strides = [1, 1]} : vector<8x4xf32> to vector<8x1xf32>
    %187 = vector.extract_strided_slice %177 {offsets = [1, 0], sizes = [1, 256], strides = [1, 1]} : vector<4x256xf32> to vector<1x256xf32>
    %188 = vector.broadcast %186 : vector<8x1xf32> to vector<8x256xf32>
    %189 = vector.broadcast %187 : vector<1x256xf32> to vector<8x256xf32>
    %190 = arith.mulf %188, %189 : vector<8x256xf32>
    %191 = arith.addf %185, %190 : vector<8x256xf32>
    %192 = vector.extract_strided_slice %179 {offsets = [0, 2], sizes = [8, 1], strides = [1, 1]} : vector<8x4xf32> to vector<8x1xf32>
    %193 = vector.extract_strided_slice %177 {offsets = [2, 0], sizes = [1, 256], strides = [1, 1]} : vector<4x256xf32> to vector<1x256xf32>
    %194 = vector.broadcast %192 : vector<8x1xf32> to vector<8x256xf32>
    %195 = vector.broadcast %193 : vector<1x256xf32> to vector<8x256xf32>
    %196 = arith.mulf %194, %195 : vector<8x256xf32>
    %197 = arith.addf %191, %196 : vector<8x256xf32>
    %198 = vector.extract_strided_slice %179 {offsets = [0, 3], sizes = [8, 1], strides = [1, 1]} : vector<8x4xf32> to vector<8x1xf32>
    %199 = vector.extract_strided_slice %177 {offsets = [3, 0], sizes = [1, 256], strides = [1, 1]} : vector<4x256xf32> to vector<1x256xf32>
    %200 = vector.broadcast %198 : vector<8x1xf32> to vector<8x256xf32>
    %201 = vector.broadcast %199 : vector<1x256xf32> to vector<8x256xf32>
    %202 = arith.mulf %200, %201 : vector<8x256xf32>
    %203 = arith.addf %197, %202 : vector<8x256xf32>
    %c0_36 = arith.constant 0 : index
    %c129 = arith.constant 129 : index
    %204 = vector.load %arg8[%c0_36, %c129] : memref<4x512xf32, #tpu.memory_space<vmem>>, vector<4x256xf32>
    %c5 = arith.constant 5 : index
    %c0_37 = arith.constant 0 : index
    %c0_38 = arith.constant 0 : index
    %205 = vector.load %arg2[%c5, %c0_37, %c0_38] : memref<9x8x4xf32, #tpu.memory_space<vmem>>, vector<1x8x4xf32>
    %206 = vector.shape_cast %205 : vector<1x8x4xf32> to vector<8x4xf32>
    %207 = vector.extract_strided_slice %206 {offsets = [0, 0], sizes = [8, 1], strides = [1, 1]} : vector<8x4xf32> to vector<8x1xf32>
    %208 = vector.extract_strided_slice %204 {offsets = [0, 0], sizes = [1, 256], strides = [1, 1]} : vector<4x256xf32> to vector<1x256xf32>
    %209 = vector.broadcast %207 : vector<8x1xf32> to vector<8x256xf32>
    %210 = vector.broadcast %208 : vector<1x256xf32> to vector<8x256xf32>
    %211 = arith.mulf %209, %210 : vector<8x256xf32>
    %212 = arith.addf %203, %211 : vector<8x256xf32>
    %213 = vector.extract_strided_slice %206 {offsets = [0, 1], sizes = [8, 1], strides = [1, 1]} : vector<8x4xf32> to vector<8x1xf32>
    %214 = vector.extract_strided_slice %204 {offsets = [1, 0], sizes = [1, 256], strides = [1, 1]} : vector<4x256xf32> to vector<1x256xf32>
    %215 = vector.broadcast %213 : vector<8x1xf32> to vector<8x256xf32>
    %216 = vector.broadcast %214 : vector<1x256xf32> to vector<8x256xf32>
    %217 = arith.mulf %215, %216 : vector<8x256xf32>
    %218 = arith.addf %212, %217 : vector<8x256xf32>
    %219 = vector.extract_strided_slice %206 {offsets = [0, 2], sizes = [8, 1], strides = [1, 1]} : vector<8x4xf32> to vector<8x1xf32>
    %220 = vector.extract_strided_slice %204 {offsets = [2, 0], sizes = [1, 256], strides = [1, 1]} : vector<4x256xf32> to vector<1x256xf32>
    %221 = vector.broadcast %219 : vector<8x1xf32> to vector<8x256xf32>
    %222 = vector.broadcast %220 : vector<1x256xf32> to vector<8x256xf32>
    %223 = arith.mulf %221, %222 : vector<8x256xf32>
    %224 = arith.addf %218, %223 : vector<8x256xf32>
    %225 = vector.extract_strided_slice %206 {offsets = [0, 3], sizes = [8, 1], strides = [1, 1]} : vector<8x4xf32> to vector<8x1xf32>
    %226 = vector.extract_strided_slice %204 {offsets = [3, 0], sizes = [1, 256], strides = [1, 1]} : vector<4x256xf32> to vector<1x256xf32>
    %227 = vector.broadcast %225 : vector<8x1xf32> to vector<8x256xf32>
    %228 = vector.broadcast %226 : vector<1x256xf32> to vector<8x256xf32>
    %229 = arith.mulf %227, %228 : vector<8x256xf32>
    %230 = arith.addf %224, %229 : vector<8x256xf32>
    %c0_39 = arith.constant 0 : index
    %c145 = arith.constant 145 : index
    %231 = vector.load %arg8[%c0_39, %c145] : memref<4x512xf32, #tpu.memory_space<vmem>>, vector<4x256xf32>
    %c8 = arith.constant 8 : index
    %c0_40 = arith.constant 0 : index
    %c0_41 = arith.constant 0 : index
    %232 = vector.load %arg2[%c8, %c0_40, %c0_41] : memref<9x8x4xf32, #tpu.memory_space<vmem>>, vector<1x8x4xf32>
    %233 = vector.shape_cast %232 : vector<1x8x4xf32> to vector<8x4xf32>
    %234 = vector.extract_strided_slice %233 {offsets = [0, 0], sizes = [8, 1], strides = [1, 1]} : vector<8x4xf32> to vector<8x1xf32>
    %235 = vector.extract_strided_slice %231 {offsets = [0, 0], sizes = [1, 256], strides = [1, 1]} : vector<4x256xf32> to vector<1x256xf32>
    %236 = vector.broadcast %234 : vector<8x1xf32> to vector<8x256xf32>
    %237 = vector.broadcast %235 : vector<1x256xf32> to vector<8x256xf32>
    %238 = arith.mulf %236, %237 : vector<8x256xf32>
    %239 = arith.addf %230, %238 : vector<8x256xf32>
    %240 = vector.extract_strided_slice %233 {offsets = [0, 1], sizes = [8, 1], strides = [1, 1]} : vector<8x4xf32> to vector<8x1xf32>
    %241 = vector.extract_strided_slice %231 {offsets = [1, 0], sizes = [1, 256], strides = [1, 1]} : vector<4x256xf32> to vector<1x256xf32>
    %242 = vector.broadcast %240 : vector<8x1xf32> to vector<8x256xf32>
    %243 = vector.broadcast %241 : vector<1x256xf32> to vector<8x256xf32>
    %244 = arith.mulf %242, %243 : vector<8x256xf32>
    %245 = arith.addf %239, %244 : vector<8x256xf32>
    %246 = vector.extract_strided_slice %233 {offsets = [0, 2], sizes = [8, 1], strides = [1, 1]} : vector<8x4xf32> to vector<8x1xf32>
    %247 = vector.extract_strided_slice %231 {offsets = [2, 0], sizes = [1, 256], strides = [1, 1]} : vector<4x256xf32> to vector<1x256xf32>
    %248 = vector.broadcast %246 : vector<8x1xf32> to vector<8x256xf32>
    %249 = vector.broadcast %247 : vector<1x256xf32> to vector<8x256xf32>
    %250 = arith.mulf %248, %249 : vector<8x256xf32>
    %251 = arith.addf %245, %250 : vector<8x256xf32>
    %252 = vector.extract_strided_slice %233 {offsets = [0, 3], sizes = [8, 1], strides = [1, 1]} : vector<8x4xf32> to vector<8x1xf32>
    %253 = vector.extract_strided_slice %231 {offsets = [3, 0], sizes = [1, 256], strides = [1, 1]} : vector<4x256xf32> to vector<1x256xf32>
    %254 = vector.broadcast %252 : vector<8x1xf32> to vector<8x256xf32>
    %255 = vector.broadcast %253 : vector<1x256xf32> to vector<8x256xf32>
    %256 = arith.mulf %254, %255 : vector<8x256xf32>
    %257 = arith.addf %251, %256 : vector<8x256xf32>
    %258 = vector.broadcast %1 : vector<1x256xf32> to vector<8x256xf32>
    %259 = arith.mulf %257, %258 : vector<8x256xf32>
    %260 = arith.addf %175, %259 : vector<8x256xf32>
    %c0_42 = arith.constant 0 : index
    %c0_43 = arith.constant 0 : index
    %261 = vector.load %arg3[%c0_42, %c0_43] : memref<8x1xf32, #tpu.memory_space<vmem>>, vector<8x1xf32>
    %262 = vector.broadcast %261 : vector<8x1xf32> to vector<8x256xf32>
    %263 = arith.addf %260, %262 : vector<8x256xf32>
    %cst_44 = arith.constant 0.000000e+00 : f32
    %264 = vector.broadcast %cst_44 : f32 to vector<8x256xf32>
    %265 = arith.maximumf %263, %264 : vector<8x256xf32>
    %cst_45 = arith.constant 0.000000e+00 : f32
    %266 = vector.broadcast %cst_45 : f32 to vector<8x512xf32>
    %c0_46 = arith.constant 0 : index
    %c0_47 = arith.constant 0 : index
    %267 = vector.load %arg9[%c0_46, %c0_47] : memref<8x512xf32, #tpu.memory_space<vmem>>, vector<8x512xf32>
    tpu.vector_store %arg9[%c0_46, %c0_47], %266 {strides = array<i32>} : memref<8x512xf32, #tpu.memory_space<vmem>>, vector<8x512xf32>,
    %c0_48 = arith.constant 0 : index
    %c128_49 = arith.constant 128 : index
    %268 = vector.load %arg9[%c0_48, %c128_49] : memref<8x512xf32, #tpu.memory_space<vmem>>, vector<8x256xf32>
    tpu.vector_store %arg9[%c0_48, %c128_49], %265 {strides = array<i32>} : memref<8x512xf32, #tpu.memory_space<vmem>>, vector<8x256xf32>,
    %cst_50 = arith.constant 0.000000e+00 : f32
    %269 = vector.broadcast %cst_50 : f32 to vector<8x256xf32>
    %cst_51 = arith.constant 0.000000e+00 : f32
    %270 = vector.broadcast %cst_51 : f32 to vector<8x256xf32>
    %c0_52 = arith.constant 0 : index
    %c111_53 = arith.constant 111 : index
    %271 = vector.load %arg9[%c0_52, %c111_53] : memref<8x512xf32, #tpu.memory_space<vmem>>, vector<8x256xf32>
    %c0_54 = arith.constant 0 : index
    %c0_55 = arith.constant 0 : index
    %c0_56 = arith.constant 0 : index
    %272 = vector.load %arg4[%c0_54, %c0_55, %c0_56] : memref<9x8x8xf32, #tpu.memory_space<vmem>>, vector<1x8x8xf32>
    %273 = vector.shape_cast %272 : vector<1x8x8xf32> to vector<8x8xf32>
    %274 = vector.extract_strided_slice %273 {offsets = [0, 0], sizes = [8, 1], strides = [1, 1]} : vector<8x8xf32> to vector<8x1xf32>
    %275 = vector.extract_strided_slice %271 {offsets = [0, 0], sizes = [1, 256], strides = [1, 1]} : vector<8x256xf32> to vector<1x256xf32>
    %276 = vector.broadcast %274 : vector<8x1xf32> to vector<8x256xf32>
    %277 = vector.broadcast %275 : vector<1x256xf32> to vector<8x256xf32>
    %278 = arith.mulf %276, %277 : vector<8x256xf32>
    %279 = arith.addf %270, %278 : vector<8x256xf32>
    %280 = vector.extract_strided_slice %273 {offsets = [0, 1], sizes = [8, 1], strides = [1, 1]} : vector<8x8xf32> to vector<8x1xf32>
    %281 = vector.extract_strided_slice %271 {offsets = [1, 0], sizes = [1, 256], strides = [1, 1]} : vector<8x256xf32> to vector<1x256xf32>
    %282 = vector.broadcast %280 : vector<8x1xf32> to vector<8x256xf32>
    %283 = vector.broadcast %281 : vector<1x256xf32> to vector<8x256xf32>
    %284 = arith.mulf %282, %283 : vector<8x256xf32>
    %285 = arith.addf %279, %284 : vector<8x256xf32>
    %286 = vector.extract_strided_slice %273 {offsets = [0, 2], sizes = [8, 1], strides = [1, 1]} : vector<8x8xf32> to vector<8x1xf32>
    %287 = vector.extract_strided_slice %271 {offsets = [2, 0], sizes = [1, 256], strides = [1, 1]} : vector<8x256xf32> to vector<1x256xf32>
    %288 = vector.broadcast %286 : vector<8x1xf32> to vector<8x256xf32>
    %289 = vector.broadcast %287 : vector<1x256xf32> to vector<8x256xf32>
    %290 = arith.mulf %288, %289 : vector<8x256xf32>
    %291 = arith.addf %285, %290 : vector<8x256xf32>
    %292 = vector.extract_strided_slice %273 {offsets = [0, 3], sizes = [8, 1], strides = [1, 1]} : vector<8x8xf32> to vector<8x1xf32>
    %293 = vector.extract_strided_slice %271 {offsets = [3, 0], sizes = [1, 256], strides = [1, 1]} : vector<8x256xf32> to vector<1x256xf32>
    %294 = vector.broadcast %292 : vector<8x1xf32> to vector<8x256xf32>
    %295 = vector.broadcast %293 : vector<1x256xf32> to vector<8x256xf32>
    %296 = arith.mulf %294, %295 : vector<8x256xf32>
    %297 = arith.addf %291, %296 : vector<8x256xf32>
    %298 = vector.extract_strided_slice %273 {offsets = [0, 4], sizes = [8, 1], strides = [1, 1]} : vector<8x8xf32> to vector<8x1xf32>
    %299 = vector.extract_strided_slice %271 {offsets = [4, 0], sizes = [1, 256], strides = [1, 1]} : vector<8x256xf32> to vector<1x256xf32>
    %300 = vector.broadcast %298 : vector<8x1xf32> to vector<8x256xf32>
    %301 = vector.broadcast %299 : vector<1x256xf32> to vector<8x256xf32>
    %302 = arith.mulf %300, %301 : vector<8x256xf32>
    %303 = arith.addf %297, %302 : vector<8x256xf32>
    %304 = vector.extract_strided_slice %273 {offsets = [0, 5], sizes = [8, 1], strides = [1, 1]} : vector<8x8xf32> to vector<8x1xf32>
    %305 = vector.extract_strided_slice %271 {offsets = [5, 0], sizes = [1, 256], strides = [1, 1]} : vector<8x256xf32> to vector<1x256xf32>
    %306 = vector.broadcast %304 : vector<8x1xf32> to vector<8x256xf32>
    %307 = vector.broadcast %305 : vector<1x256xf32> to vector<8x256xf32>
    %308 = arith.mulf %306, %307 : vector<8x256xf32>
    %309 = arith.addf %303, %308 : vector<8x256xf32>
    %310 = vector.extract_strided_slice %273 {offsets = [0, 6], sizes = [8, 1], strides = [1, 1]} : vector<8x8xf32> to vector<8x1xf32>
    %311 = vector.extract_strided_slice %271 {offsets = [6, 0], sizes = [1, 256], strides = [1, 1]} : vector<8x256xf32> to vector<1x256xf32>
    %312 = vector.broadcast %310 : vector<8x1xf32> to vector<8x256xf32>
    %313 = vector.broadcast %311 : vector<1x256xf32> to vector<8x256xf32>
    %314 = arith.mulf %312, %313 : vector<8x256xf32>
    %315 = arith.addf %309, %314 : vector<8x256xf32>
    %316 = vector.extract_strided_slice %273 {offsets = [0, 7], sizes = [8, 1], strides = [1, 1]} : vector<8x8xf32> to vector<8x1xf32>
    %317 = vector.extract_strided_slice %271 {offsets = [7, 0], sizes = [1, 256], strides = [1, 1]} : vector<8x256xf32> to vector<1x256xf32>
    %318 = vector.broadcast %316 : vector<8x1xf32> to vector<8x256xf32>
    %319 = vector.broadcast %317 : vector<1x256xf32> to vector<8x256xf32>
    %320 = arith.mulf %318, %319 : vector<8x256xf32>
    %321 = arith.addf %315, %320 : vector<8x256xf32>
    %c0_57 = arith.constant 0 : index
    %c127_58 = arith.constant 127 : index
    %322 = vector.load %arg9[%c0_57, %c127_58] : memref<8x512xf32, #tpu.memory_space<vmem>>, vector<8x256xf32>
    %c3_59 = arith.constant 3 : index
    %c0_60 = arith.constant 0 : index
    %c0_61 = arith.constant 0 : index
    %323 = vector.load %arg4[%c3_59, %c0_60, %c0_61] : memref<9x8x8xf32, #tpu.memory_space<vmem>>, vector<1x8x8xf32>
    %324 = vector.shape_cast %323 : vector<1x8x8xf32> to vector<8x8xf32>
    %325 = vector.extract_strided_slice %324 {offsets = [0, 0], sizes = [8, 1], strides = [1, 1]} : vector<8x8xf32> to vector<8x1xf32>
    %326 = vector.extract_strided_slice %322 {offsets = [0, 0], sizes = [1, 256], strides = [1, 1]} : vector<8x256xf32> to vector<1x256xf32>
    %327 = vector.broadcast %325 : vector<8x1xf32> to vector<8x256xf32>
    %328 = vector.broadcast %326 : vector<1x256xf32> to vector<8x256xf32>
    %329 = arith.mulf %327, %328 : vector<8x256xf32>
    %330 = arith.addf %321, %329 : vector<8x256xf32>
    %331 = vector.extract_strided_slice %324 {offsets = [0, 1], sizes = [8, 1], strides = [1, 1]} : vector<8x8xf32> to vector<8x1xf32>
    %332 = vector.extract_strided_slice %322 {offsets = [1, 0], sizes = [1, 256], strides = [1, 1]} : vector<8x256xf32> to vector<1x256xf32>
    %333 = vector.broadcast %331 : vector<8x1xf32> to vector<8x256xf32>
    %334 = vector.broadcast %332 : vector<1x256xf32> to vector<8x256xf32>
    %335 = arith.mulf %333, %334 : vector<8x256xf32>
    %336 = arith.addf %330, %335 : vector<8x256xf32>
    %337 = vector.extract_strided_slice %324 {offsets = [0, 2], sizes = [8, 1], strides = [1, 1]} : vector<8x8xf32> to vector<8x1xf32>
    %338 = vector.extract_strided_slice %322 {offsets = [2, 0], sizes = [1, 256], strides = [1, 1]} : vector<8x256xf32> to vector<1x256xf32>
    %339 = vector.broadcast %337 : vector<8x1xf32> to vector<8x256xf32>
    %340 = vector.broadcast %338 : vector<1x256xf32> to vector<8x256xf32>
    %341 = arith.mulf %339, %340 : vector<8x256xf32>
    %342 = arith.addf %336, %341 : vector<8x256xf32>
    %343 = vector.extract_strided_slice %324 {offsets = [0, 3], sizes = [8, 1], strides = [1, 1]} : vector<8x8xf32> to vector<8x1xf32>
    %344 = vector.extract_strided_slice %322 {offsets = [3, 0], sizes = [1, 256], strides = [1, 1]} : vector<8x256xf32> to vector<1x256xf32>
    %345 = vector.broadcast %343 : vector<8x1xf32> to vector<8x256xf32>
    %346 = vector.broadcast %344 : vector<1x256xf32> to vector<8x256xf32>
    %347 = arith.mulf %345, %346 : vector<8x256xf32>
    %348 = arith.addf %342, %347 : vector<8x256xf32>
    %349 = vector.extract_strided_slice %324 {offsets = [0, 4], sizes = [8, 1], strides = [1, 1]} : vector<8x8xf32> to vector<8x1xf32>
    %350 = vector.extract_strided_slice %322 {offsets = [4, 0], sizes = [1, 256], strides = [1, 1]} : vector<8x256xf32> to vector<1x256xf32>
    %351 = vector.broadcast %349 : vector<8x1xf32> to vector<8x256xf32>
    %352 = vector.broadcast %350 : vector<1x256xf32> to vector<8x256xf32>
    %353 = arith.mulf %351, %352 : vector<8x256xf32>
    %354 = arith.addf %348, %353 : vector<8x256xf32>
    %355 = vector.extract_strided_slice %324 {offsets = [0, 5], sizes = [8, 1], strides = [1, 1]} : vector<8x8xf32> to vector<8x1xf32>
    %356 = vector.extract_strided_slice %322 {offsets = [5, 0], sizes = [1, 256], strides = [1, 1]} : vector<8x256xf32> to vector<1x256xf32>
    %357 = vector.broadcast %355 : vector<8x1xf32> to vector<8x256xf32>
    %358 = vector.broadcast %356 : vector<1x256xf32> to vector<8x256xf32>
    %359 = arith.mulf %357, %358 : vector<8x256xf32>
    %360 = arith.addf %354, %359 : vector<8x256xf32>
    %361 = vector.extract_strided_slice %324 {offsets = [0, 6], sizes = [8, 1], strides = [1, 1]} : vector<8x8xf32> to vector<8x1xf32>
    %362 = vector.extract_strided_slice %322 {offsets = [6, 0], sizes = [1, 256], strides = [1, 1]} : vector<8x256xf32> to vector<1x256xf32>
    %363 = vector.broadcast %361 : vector<8x1xf32> to vector<8x256xf32>
    %364 = vector.broadcast %362 : vector<1x256xf32> to vector<8x256xf32>
    %365 = arith.mulf %363, %364 : vector<8x256xf32>
    %366 = arith.addf %360, %365 : vector<8x256xf32>
    %367 = vector.extract_strided_slice %324 {offsets = [0, 7], sizes = [8, 1], strides = [1, 1]} : vector<8x8xf32> to vector<8x1xf32>
    %368 = vector.extract_strided_slice %322 {offsets = [7, 0], sizes = [1, 256], strides = [1, 1]} : vector<8x256xf32> to vector<1x256xf32>
    %369 = vector.broadcast %367 : vector<8x1xf32> to vector<8x256xf32>
    %370 = vector.broadcast %368 : vector<1x256xf32> to vector<8x256xf32>
    %371 = arith.mulf %369, %370 : vector<8x256xf32>
    %372 = arith.addf %366, %371 : vector<8x256xf32>
    %c0_62 = arith.constant 0 : index
    %c143_63 = arith.constant 143 : index
    %373 = vector.load %arg9[%c0_62, %c143_63] : memref<8x512xf32, #tpu.memory_space<vmem>>, vector<8x256xf32>
    %c6_64 = arith.constant 6 : index
    %c0_65 = arith.constant 0 : index
    %c0_66 = arith.constant 0 : index
    %374 = vector.load %arg4[%c6_64, %c0_65, %c0_66] : memref<9x8x8xf32, #tpu.memory_space<vmem>>, vector<1x8x8xf32>
    %375 = vector.shape_cast %374 : vector<1x8x8xf32> to vector<8x8xf32>
    %376 = vector.extract_strided_slice %375 {offsets = [0, 0], sizes = [8, 1], strides = [1, 1]} : vector<8x8xf32> to vector<8x1xf32>
    %377 = vector.extract_strided_slice %373 {offsets = [0, 0], sizes = [1, 256], strides = [1, 1]} : vector<8x256xf32> to vector<1x256xf32>
    %378 = vector.broadcast %376 : vector<8x1xf32> to vector<8x256xf32>
    %379 = vector.broadcast %377 : vector<1x256xf32> to vector<8x256xf32>
    %380 = arith.mulf %378, %379 : vector<8x256xf32>
    %381 = arith.addf %372, %380 : vector<8x256xf32>
    %382 = vector.extract_strided_slice %375 {offsets = [0, 1], sizes = [8, 1], strides = [1, 1]} : vector<8x8xf32> to vector<8x1xf32>
    %383 = vector.extract_strided_slice %373 {offsets = [1, 0], sizes = [1, 256], strides = [1, 1]} : vector<8x256xf32> to vector<1x256xf32>
    %384 = vector.broadcast %382 : vector<8x1xf32> to vector<8x256xf32>
    %385 = vector.broadcast %383 : vector<1x256xf32> to vector<8x256xf32>
    %386 = arith.mulf %384, %385 : vector<8x256xf32>
    %387 = arith.addf %381, %386 : vector<8x256xf32>
    %388 = vector.extract_strided_slice %375 {offsets = [0, 2], sizes = [8, 1], strides = [1, 1]} : vector<8x8xf32> to vector<8x1xf32>
    %389 = vector.extract_strided_slice %373 {offsets = [2, 0], sizes = [1, 256], strides = [1, 1]} : vector<8x256xf32> to vector<1x256xf32>
    %390 = vector.broadcast %388 : vector<8x1xf32> to vector<8x256xf32>
    %391 = vector.broadcast %389 : vector<1x256xf32> to vector<8x256xf32>
    %392 = arith.mulf %390, %391 : vector<8x256xf32>
    %393 = arith.addf %387, %392 : vector<8x256xf32>
    %394 = vector.extract_strided_slice %375 {offsets = [0, 3], sizes = [8, 1], strides = [1, 1]} : vector<8x8xf32> to vector<8x1xf32>
    %395 = vector.extract_strided_slice %373 {offsets = [3, 0], sizes = [1, 256], strides = [1, 1]} : vector<8x256xf32> to vector<1x256xf32>
    %396 = vector.broadcast %394 : vector<8x1xf32> to vector<8x256xf32>
    %397 = vector.broadcast %395 : vector<1x256xf32> to vector<8x256xf32>
    %398 = arith.mulf %396, %397 : vector<8x256xf32>
    %399 = arith.addf %393, %398 : vector<8x256xf32>
    %400 = vector.extract_strided_slice %375 {offsets = [0, 4], sizes = [8, 1], strides = [1, 1]} : vector<8x8xf32> to vector<8x1xf32>
    %401 = vector.extract_strided_slice %373 {offsets = [4, 0], sizes = [1, 256], strides = [1, 1]} : vector<8x256xf32> to vector<1x256xf32>
    %402 = vector.broadcast %400 : vector<8x1xf32> to vector<8x256xf32>
    %403 = vector.broadcast %401 : vector<1x256xf32> to vector<8x256xf32>
    %404 = arith.mulf %402, %403 : vector<8x256xf32>
    %405 = arith.addf %399, %404 : vector<8x256xf32>
    %406 = vector.extract_strided_slice %375 {offsets = [0, 5], sizes = [8, 1], strides = [1, 1]} : vector<8x8xf32> to vector<8x1xf32>
    %407 = vector.extract_strided_slice %373 {offsets = [5, 0], sizes = [1, 256], strides = [1, 1]} : vector<8x256xf32> to vector<1x256xf32>
    %408 = vector.broadcast %406 : vector<8x1xf32> to vector<8x256xf32>
    %409 = vector.broadcast %407 : vector<1x256xf32> to vector<8x256xf32>
    %410 = arith.mulf %408, %409 : vector<8x256xf32>
    %411 = arith.addf %405, %410 : vector<8x256xf32>
    %412 = vector.extract_strided_slice %375 {offsets = [0, 6], sizes = [8, 1], strides = [1, 1]} : vector<8x8xf32> to vector<8x1xf32>
    %413 = vector.extract_strided_slice %373 {offsets = [6, 0], sizes = [1, 256], strides = [1, 1]} : vector<8x256xf32> to vector<1x256xf32>
    %414 = vector.broadcast %412 : vector<8x1xf32> to vector<8x256xf32>
    %415 = vector.broadcast %413 : vector<1x256xf32> to vector<8x256xf32>
    %416 = arith.mulf %414, %415 : vector<8x256xf32>
    %417 = arith.addf %411, %416 : vector<8x256xf32>
    %418 = vector.extract_strided_slice %375 {offsets = [0, 7], sizes = [8, 1], strides = [1, 1]} : vector<8x8xf32> to vector<8x1xf32>
    %419 = vector.extract_strided_slice %373 {offsets = [7, 0], sizes = [1, 256], strides = [1, 1]} : vector<8x256xf32> to vector<1x256xf32>
    %420 = vector.broadcast %418 : vector<8x1xf32> to vector<8x256xf32>
    %421 = vector.broadcast %419 : vector<1x256xf32> to vector<8x256xf32>
    %422 = arith.mulf %420, %421 : vector<8x256xf32>
    %423 = arith.addf %417, %422 : vector<8x256xf32>
    %424 = vector.broadcast %0 : vector<1x256xf32> to vector<8x256xf32>
    %425 = arith.mulf %423, %424 : vector<8x256xf32>
    %426 = arith.addf %269, %425 : vector<8x256xf32>
    %cst_67 = arith.constant 0.000000e+00 : f32
    %427 = vector.broadcast %cst_67 : f32 to vector<8x256xf32>
    %c0_68 = arith.constant 0 : index
    %c112_69 = arith.constant 112 : index
    %428 = vector.load %arg9[%c0_68, %c112_69] : memref<8x512xf32, #tpu.memory_space<vmem>>, vector<8x256xf32>
    %c1_70 = arith.constant 1 : index
    %c0_71 = arith.constant 0 : index
    %c0_72 = arith.constant 0 : index
    %429 = vector.load %arg4[%c1_70, %c0_71, %c0_72] : memref<9x8x8xf32, #tpu.memory_space<vmem>>, vector<1x8x8xf32>
    %430 = vector.shape_cast %429 : vector<1x8x8xf32> to vector<8x8xf32>
    %431 = vector.extract_strided_slice %430 {offsets = [0, 0], sizes = [8, 1], strides = [1, 1]} : vector<8x8xf32> to vector<8x1xf32>
    %432 = vector.extract_strided_slice %428 {offsets = [0, 0], sizes = [1, 256], strides = [1, 1]} : vector<8x256xf32> to vector<1x256xf32>
    %433 = vector.broadcast %431 : vector<8x1xf32> to vector<8x256xf32>
    %434 = vector.broadcast %432 : vector<1x256xf32> to vector<8x256xf32>
    %435 = arith.mulf %433, %434 : vector<8x256xf32>
    %436 = arith.addf %427, %435 : vector<8x256xf32>
    %437 = vector.extract_strided_slice %430 {offsets = [0, 1], sizes = [8, 1], strides = [1, 1]} : vector<8x8xf32> to vector<8x1xf32>
    %438 = vector.extract_strided_slice %428 {offsets = [1, 0], sizes = [1, 256], strides = [1, 1]} : vector<8x256xf32> to vector<1x256xf32>
    %439 = vector.broadcast %437 : vector<8x1xf32> to vector<8x256xf32>
    %440 = vector.broadcast %438 : vector<1x256xf32> to vector<8x256xf32>
    %441 = arith.mulf %439, %440 : vector<8x256xf32>
    %442 = arith.addf %436, %441 : vector<8x256xf32>
    %443 = vector.extract_strided_slice %430 {offsets = [0, 2], sizes = [8, 1], strides = [1, 1]} : vector<8x8xf32> to vector<8x1xf32>
    %444 = vector.extract_strided_slice %428 {offsets = [2, 0], sizes = [1, 256], strides = [1, 1]} : vector<8x256xf32> to vector<1x256xf32>
    %445 = vector.broadcast %443 : vector<8x1xf32> to vector<8x256xf32>
    %446 = vector.broadcast %444 : vector<1x256xf32> to vector<8x256xf32>
    %447 = arith.mulf %445, %446 : vector<8x256xf32>
    %448 = arith.addf %442, %447 : vector<8x256xf32>
    %449 = vector.extract_strided_slice %430 {offsets = [0, 3], sizes = [8, 1], strides = [1, 1]} : vector<8x8xf32> to vector<8x1xf32>
    %450 = vector.extract_strided_slice %428 {offsets = [3, 0], sizes = [1, 256], strides = [1, 1]} : vector<8x256xf32> to vector<1x256xf32>
    %451 = vector.broadcast %449 : vector<8x1xf32> to vector<8x256xf32>
    %452 = vector.broadcast %450 : vector<1x256xf32> to vector<8x256xf32>
    %453 = arith.mulf %451, %452 : vector<8x256xf32>
    %454 = arith.addf %448, %453 : vector<8x256xf32>
    %455 = vector.extract_strided_slice %430 {offsets = [0, 4], sizes = [8, 1], strides = [1, 1]} : vector<8x8xf32> to vector<8x1xf32>
    %456 = vector.extract_strided_slice %428 {offsets = [4, 0], sizes = [1, 256], strides = [1, 1]} : vector<8x256xf32> to vector<1x256xf32>
    %457 = vector.broadcast %455 : vector<8x1xf32> to vector<8x256xf32>
    %458 = vector.broadcast %456 : vector<1x256xf32> to vector<8x256xf32>
    %459 = arith.mulf %457, %458 : vector<8x256xf32>
    %460 = arith.addf %454, %459 : vector<8x256xf32>
    %461 = vector.extract_strided_slice %430 {offsets = [0, 5], sizes = [8, 1], strides = [1, 1]} : vector<8x8xf32> to vector<8x1xf32>
    %462 = vector.extract_strided_slice %428 {offsets = [5, 0], sizes = [1, 256], strides = [1, 1]} : vector<8x256xf32> to vector<1x256xf32>
    %463 = vector.broadcast %461 : vector<8x1xf32> to vector<8x256xf32>
    %464 = vector.broadcast %462 : vector<1x256xf32> to vector<8x256xf32>
    %465 = arith.mulf %463, %464 : vector<8x256xf32>
    %466 = arith.addf %460, %465 : vector<8x256xf32>
    %467 = vector.extract_strided_slice %430 {offsets = [0, 6], sizes = [8, 1], strides = [1, 1]} : vector<8x8xf32> to vector<8x1xf32>
    %468 = vector.extract_strided_slice %428 {offsets = [6, 0], sizes = [1, 256], strides = [1, 1]} : vector<8x256xf32> to vector<1x256xf32>
    %469 = vector.broadcast %467 : vector<8x1xf32> to vector<8x256xf32>
    %470 = vector.broadcast %468 : vector<1x256xf32> to vector<8x256xf32>
    %471 = arith.mulf %469, %470 : vector<8x256xf32>
    %472 = arith.addf %466, %471 : vector<8x256xf32>
    %473 = vector.extract_strided_slice %430 {offsets = [0, 7], sizes = [8, 1], strides = [1, 1]} : vector<8x8xf32> to vector<8x1xf32>
    %474 = vector.extract_strided_slice %428 {offsets = [7, 0], sizes = [1, 256], strides = [1, 1]} : vector<8x256xf32> to vector<1x256xf32>
    %475 = vector.broadcast %473 : vector<8x1xf32> to vector<8x256xf32>
    %476 = vector.broadcast %474 : vector<1x256xf32> to vector<8x256xf32>
    %477 = arith.mulf %475, %476 : vector<8x256xf32>
    %478 = arith.addf %472, %477 : vector<8x256xf32>
    %c0_73 = arith.constant 0 : index
    %c128_74 = arith.constant 128 : index
    %479 = vector.load %arg9[%c0_73, %c128_74] : memref<8x512xf32, #tpu.memory_space<vmem>>, vector<8x256xf32>
    %c4_75 = arith.constant 4 : index
    %c0_76 = arith.constant 0 : index
    %c0_77 = arith.constant 0 : index
    %480 = vector.load %arg4[%c4_75, %c0_76, %c0_77] : memref<9x8x8xf32, #tpu.memory_space<vmem>>, vector<1x8x8xf32>
    %481 = vector.shape_cast %480 : vector<1x8x8xf32> to vector<8x8xf32>
    %482 = vector.extract_strided_slice %481 {offsets = [0, 0], sizes = [8, 1], strides = [1, 1]} : vector<8x8xf32> to vector<8x1xf32>
    %483 = vector.extract_strided_slice %479 {offsets = [0, 0], sizes = [1, 256], strides = [1, 1]} : vector<8x256xf32> to vector<1x256xf32>
    %484 = vector.broadcast %482 : vector<8x1xf32> to vector<8x256xf32>
    %485 = vector.broadcast %483 : vector<1x256xf32> to vector<8x256xf32>
    %486 = arith.mulf %484, %485 : vector<8x256xf32>
    %487 = arith.addf %478, %486 : vector<8x256xf32>
    %488 = vector.extract_strided_slice %481 {offsets = [0, 1], sizes = [8, 1], strides = [1, 1]} : vector<8x8xf32> to vector<8x1xf32>
    %489 = vector.extract_strided_slice %479 {offsets = [1, 0], sizes = [1, 256], strides = [1, 1]} : vector<8x256xf32> to vector<1x256xf32>
    %490 = vector.broadcast %488 : vector<8x1xf32> to vector<8x256xf32>
    %491 = vector.broadcast %489 : vector<1x256xf32> to vector<8x256xf32>
    %492 = arith.mulf %490, %491 : vector<8x256xf32>
    %493 = arith.addf %487, %492 : vector<8x256xf32>
    %494 = vector.extract_strided_slice %481 {offsets = [0, 2], sizes = [8, 1], strides = [1, 1]} : vector<8x8xf32> to vector<8x1xf32>
    %495 = vector.extract_strided_slice %479 {offsets = [2, 0], sizes = [1, 256], strides = [1, 1]} : vector<8x256xf32> to vector<1x256xf32>
    %496 = vector.broadcast %494 : vector<8x1xf32> to vector<8x256xf32>
    %497 = vector.broadcast %495 : vector<1x256xf32> to vector<8x256xf32>
    %498 = arith.mulf %496, %497 : vector<8x256xf32>
    %499 = arith.addf %493, %498 : vector<8x256xf32>
    %500 = vector.extract_strided_slice %481 {offsets = [0, 3], sizes = [8, 1], strides = [1, 1]} : vector<8x8xf32> to vector<8x1xf32>
    %501 = vector.extract_strided_slice %479 {offsets = [3, 0], sizes = [1, 256], strides = [1, 1]} : vector<8x256xf32> to vector<1x256xf32>
    %502 = vector.broadcast %500 : vector<8x1xf32> to vector<8x256xf32>
    %503 = vector.broadcast %501 : vector<1x256xf32> to vector<8x256xf32>
    %504 = arith.mulf %502, %503 : vector<8x256xf32>
    %505 = arith.addf %499, %504 : vector<8x256xf32>
    %506 = vector.extract_strided_slice %481 {offsets = [0, 4], sizes = [8, 1], strides = [1, 1]} : vector<8x8xf32> to vector<8x1xf32>
    %507 = vector.extract_strided_slice %479 {offsets = [4, 0], sizes = [1, 256], strides = [1, 1]} : vector<8x256xf32> to vector<1x256xf32>
    %508 = vector.broadcast %506 : vector<8x1xf32> to vector<8x256xf32>
    %509 = vector.broadcast %507 : vector<1x256xf32> to vector<8x256xf32>
    %510 = arith.mulf %508, %509 : vector<8x256xf32>
    %511 = arith.addf %505, %510 : vector<8x256xf32>
    %512 = vector.extract_strided_slice %481 {offsets = [0, 5], sizes = [8, 1], strides = [1, 1]} : vector<8x8xf32> to vector<8x1xf32>
    %513 = vector.extract_strided_slice %479 {offsets = [5, 0], sizes = [1, 256], strides = [1, 1]} : vector<8x256xf32> to vector<1x256xf32>
    %514 = vector.broadcast %512 : vector<8x1xf32> to vector<8x256xf32>
    %515 = vector.broadcast %513 : vector<1x256xf32> to vector<8x256xf32>
    %516 = arith.mulf %514, %515 : vector<8x256xf32>
    %517 = arith.addf %511, %516 : vector<8x256xf32>
    %518 = vector.extract_strided_slice %481 {offsets = [0, 6], sizes = [8, 1], strides = [1, 1]} : vector<8x8xf32> to vector<8x1xf32>
    %519 = vector.extract_strided_slice %479 {offsets = [6, 0], sizes = [1, 256], strides = [1, 1]} : vector<8x256xf32> to vector<1x256xf32>
    %520 = vector.broadcast %518 : vector<8x1xf32> to vector<8x256xf32>
    %521 = vector.broadcast %519 : vector<1x256xf32> to vector<8x256xf32>
    %522 = arith.mulf %520, %521 : vector<8x256xf32>
    %523 = arith.addf %517, %522 : vector<8x256xf32>
    %524 = vector.extract_strided_slice %481 {offsets = [0, 7], sizes = [8, 1], strides = [1, 1]} : vector<8x8xf32> to vector<8x1xf32>
    %525 = vector.extract_strided_slice %479 {offsets = [7, 0], sizes = [1, 256], strides = [1, 1]} : vector<8x256xf32> to vector<1x256xf32>
    %526 = vector.broadcast %524 : vector<8x1xf32> to vector<8x256xf32>
    %527 = vector.broadcast %525 : vector<1x256xf32> to vector<8x256xf32>
    %528 = arith.mulf %526, %527 : vector<8x256xf32>
    %529 = arith.addf %523, %528 : vector<8x256xf32>
    %c0_78 = arith.constant 0 : index
    %c144_79 = arith.constant 144 : index
    %530 = vector.load %arg9[%c0_78, %c144_79] : memref<8x512xf32, #tpu.memory_space<vmem>>, vector<8x256xf32>
    %c7_80 = arith.constant 7 : index
    %c0_81 = arith.constant 0 : index
    %c0_82 = arith.constant 0 : index
    %531 = vector.load %arg4[%c7_80, %c0_81, %c0_82] : memref<9x8x8xf32, #tpu.memory_space<vmem>>, vector<1x8x8xf32>
    %532 = vector.shape_cast %531 : vector<1x8x8xf32> to vector<8x8xf32>
    %533 = vector.extract_strided_slice %532 {offsets = [0, 0], sizes = [8, 1], strides = [1, 1]} : vector<8x8xf32> to vector<8x1xf32>
    %534 = vector.extract_strided_slice %530 {offsets = [0, 0], sizes = [1, 256], strides = [1, 1]} : vector<8x256xf32> to vector<1x256xf32>
    %535 = vector.broadcast %533 : vector<8x1xf32> to vector<8x256xf32>
    %536 = vector.broadcast %534 : vector<1x256xf32> to vector<8x256xf32>
    %537 = arith.mulf %535, %536 : vector<8x256xf32>
    %538 = arith.addf %529, %537 : vector<8x256xf32>
    %539 = vector.extract_strided_slice %532 {offsets = [0, 1], sizes = [8, 1], strides = [1, 1]} : vector<8x8xf32> to vector<8x1xf32>
    %540 = vector.extract_strided_slice %530 {offsets = [1, 0], sizes = [1, 256], strides = [1, 1]} : vector<8x256xf32> to vector<1x256xf32>
    %541 = vector.broadcast %539 : vector<8x1xf32> to vector<8x256xf32>
    %542 = vector.broadcast %540 : vector<1x256xf32> to vector<8x256xf32>
    %543 = arith.mulf %541, %542 : vector<8x256xf32>
    %544 = arith.addf %538, %543 : vector<8x256xf32>
    %545 = vector.extract_strided_slice %532 {offsets = [0, 2], sizes = [8, 1], strides = [1, 1]} : vector<8x8xf32> to vector<8x1xf32>
    %546 = vector.extract_strided_slice %530 {offsets = [2, 0], sizes = [1, 256], strides = [1, 1]} : vector<8x256xf32> to vector<1x256xf32>
    %547 = vector.broadcast %545 : vector<8x1xf32> to vector<8x256xf32>
    %548 = vector.broadcast %546 : vector<1x256xf32> to vector<8x256xf32>
    %549 = arith.mulf %547, %548 : vector<8x256xf32>
    %550 = arith.addf %544, %549 : vector<8x256xf32>
    %551 = vector.extract_strided_slice %532 {offsets = [0, 3], sizes = [8, 1], strides = [1, 1]} : vector<8x8xf32> to vector<8x1xf32>
    %552 = vector.extract_strided_slice %530 {offsets = [3, 0], sizes = [1, 256], strides = [1, 1]} : vector<8x256xf32> to vector<1x256xf32>
    %553 = vector.broadcast %551 : vector<8x1xf32> to vector<8x256xf32>
    %554 = vector.broadcast %552 : vector<1x256xf32> to vector<8x256xf32>
    %555 = arith.mulf %553, %554 : vector<8x256xf32>
    %556 = arith.addf %550, %555 : vector<8x256xf32>
    %557 = vector.extract_strided_slice %532 {offsets = [0, 4], sizes = [8, 1], strides = [1, 1]} : vector<8x8xf32> to vector<8x1xf32>
    %558 = vector.extract_strided_slice %530 {offsets = [4, 0], sizes = [1, 256], strides = [1, 1]} : vector<8x256xf32> to vector<1x256xf32>
    %559 = vector.broadcast %557 : vector<8x1xf32> to vector<8x256xf32>
    %560 = vector.broadcast %558 : vector<1x256xf32> to vector<8x256xf32>
    %561 = arith.mulf %559, %560 : vector<8x256xf32>
    %562 = arith.addf %556, %561 : vector<8x256xf32>
    %563 = vector.extract_strided_slice %532 {offsets = [0, 5], sizes = [8, 1], strides = [1, 1]} : vector<8x8xf32> to vector<8x1xf32>
    %564 = vector.extract_strided_slice %530 {offsets = [5, 0], sizes = [1, 256], strides = [1, 1]} : vector<8x256xf32> to vector<1x256xf32>
    %565 = vector.broadcast %563 : vector<8x1xf32> to vector<8x256xf32>
    %566 = vector.broadcast %564 : vector<1x256xf32> to vector<8x256xf32>
    %567 = arith.mulf %565, %566 : vector<8x256xf32>
    %568 = arith.addf %562, %567 : vector<8x256xf32>
    %569 = vector.extract_strided_slice %532 {offsets = [0, 6], sizes = [8, 1], strides = [1, 1]} : vector<8x8xf32> to vector<8x1xf32>
    %570 = vector.extract_strided_slice %530 {offsets = [6, 0], sizes = [1, 256], strides = [1, 1]} : vector<8x256xf32> to vector<1x256xf32>
    %571 = vector.broadcast %569 : vector<8x1xf32> to vector<8x256xf32>
    %572 = vector.broadcast %570 : vector<1x256xf32> to vector<8x256xf32>
    %573 = arith.mulf %571, %572 : vector<8x256xf32>
    %574 = arith.addf %568, %573 : vector<8x256xf32>
    %575 = vector.extract_strided_slice %532 {offsets = [0, 7], sizes = [8, 1], strides = [1, 1]} : vector<8x8xf32> to vector<8x1xf32>
    %576 = vector.extract_strided_slice %530 {offsets = [7, 0], sizes = [1, 256], strides = [1, 1]} : vector<8x256xf32> to vector<1x256xf32>
    %577 = vector.broadcast %575 : vector<8x1xf32> to vector<8x256xf32>
    %578 = vector.broadcast %576 : vector<1x256xf32> to vector<8x256xf32>
    %579 = arith.mulf %577, %578 : vector<8x256xf32>
    %580 = arith.addf %574, %579 : vector<8x256xf32>
    %581 = arith.addf %426, %580 : vector<8x256xf32>
    %cst_83 = arith.constant 0.000000e+00 : f32
    %582 = vector.broadcast %cst_83 : f32 to vector<8x256xf32>
    %c0_84 = arith.constant 0 : index
    %c113_85 = arith.constant 113 : index
    %583 = vector.load %arg9[%c0_84, %c113_85] : memref<8x512xf32, #tpu.memory_space<vmem>>, vector<8x256xf32>
    %c2_86 = arith.constant 2 : index
    %c0_87 = arith.constant 0 : index
    %c0_88 = arith.constant 0 : index
    %584 = vector.load %arg4[%c2_86, %c0_87, %c0_88] : memref<9x8x8xf32, #tpu.memory_space<vmem>>, vector<1x8x8xf32>
    %585 = vector.shape_cast %584 : vector<1x8x8xf32> to vector<8x8xf32>
    %586 = vector.extract_strided_slice %585 {offsets = [0, 0], sizes = [8, 1], strides = [1, 1]} : vector<8x8xf32> to vector<8x1xf32>
    %587 = vector.extract_strided_slice %583 {offsets = [0, 0], sizes = [1, 256], strides = [1, 1]} : vector<8x256xf32> to vector<1x256xf32>
    %588 = vector.broadcast %586 : vector<8x1xf32> to vector<8x256xf32>
    %589 = vector.broadcast %587 : vector<1x256xf32> to vector<8x256xf32>
    %590 = arith.mulf %588, %589 : vector<8x256xf32>
    %591 = arith.addf %582, %590 : vector<8x256xf32>
    %592 = vector.extract_strided_slice %585 {offsets = [0, 1], sizes = [8, 1], strides = [1, 1]} : vector<8x8xf32> to vector<8x1xf32>
    %593 = vector.extract_strided_slice %583 {offsets = [1, 0], sizes = [1, 256], strides = [1, 1]} : vector<8x256xf32> to vector<1x256xf32>
    %594 = vector.broadcast %592 : vector<8x1xf32> to vector<8x256xf32>
    %595 = vector.broadcast %593 : vector<1x256xf32> to vector<8x256xf32>
    %596 = arith.mulf %594, %595 : vector<8x256xf32>
    %597 = arith.addf %591, %596 : vector<8x256xf32>
    %598 = vector.extract_strided_slice %585 {offsets = [0, 2], sizes = [8, 1], strides = [1, 1]} : vector<8x8xf32> to vector<8x1xf32>
    %599 = vector.extract_strided_slice %583 {offsets = [2, 0], sizes = [1, 256], strides = [1, 1]} : vector<8x256xf32> to vector<1x256xf32>
    %600 = vector.broadcast %598 : vector<8x1xf32> to vector<8x256xf32>
    %601 = vector.broadcast %599 : vector<1x256xf32> to vector<8x256xf32>
    %602 = arith.mulf %600, %601 : vector<8x256xf32>
    %603 = arith.addf %597, %602 : vector<8x256xf32>
    %604 = vector.extract_strided_slice %585 {offsets = [0, 3], sizes = [8, 1], strides = [1, 1]} : vector<8x8xf32> to vector<8x1xf32>
    %605 = vector.extract_strided_slice %583 {offsets = [3, 0], sizes = [1, 256], strides = [1, 1]} : vector<8x256xf32> to vector<1x256xf32>
    %606 = vector.broadcast %604 : vector<8x1xf32> to vector<8x256xf32>
    %607 = vector.broadcast %605 : vector<1x256xf32> to vector<8x256xf32>
    %608 = arith.mulf %606, %607 : vector<8x256xf32>
    %609 = arith.addf %603, %608 : vector<8x256xf32>
    %610 = vector.extract_strided_slice %585 {offsets = [0, 4], sizes = [8, 1], strides = [1, 1]} : vector<8x8xf32> to vector<8x1xf32>
    %611 = vector.extract_strided_slice %583 {offsets = [4, 0], sizes = [1, 256], strides = [1, 1]} : vector<8x256xf32> to vector<1x256xf32>
    %612 = vector.broadcast %610 : vector<8x1xf32> to vector<8x256xf32>
    %613 = vector.broadcast %611 : vector<1x256xf32> to vector<8x256xf32>
    %614 = arith.mulf %612, %613 : vector<8x256xf32>
    %615 = arith.addf %609, %614 : vector<8x256xf32>
    %616 = vector.extract_strided_slice %585 {offsets = [0, 5], sizes = [8, 1], strides = [1, 1]} : vector<8x8xf32> to vector<8x1xf32>
    %617 = vector.extract_strided_slice %583 {offsets = [5, 0], sizes = [1, 256], strides = [1, 1]} : vector<8x256xf32> to vector<1x256xf32>
    %618 = vector.broadcast %616 : vector<8x1xf32> to vector<8x256xf32>
    %619 = vector.broadcast %617 : vector<1x256xf32> to vector<8x256xf32>
    %620 = arith.mulf %618, %619 : vector<8x256xf32>
    %621 = arith.addf %615, %620 : vector<8x256xf32>
    %622 = vector.extract_strided_slice %585 {offsets = [0, 6], sizes = [8, 1], strides = [1, 1]} : vector<8x8xf32> to vector<8x1xf32>
    %623 = vector.extract_strided_slice %583 {offsets = [6, 0], sizes = [1, 256], strides = [1, 1]} : vector<8x256xf32> to vector<1x256xf32>
    %624 = vector.broadcast %622 : vector<8x1xf32> to vector<8x256xf32>
    %625 = vector.broadcast %623 : vector<1x256xf32> to vector<8x256xf32>
    %626 = arith.mulf %624, %625 : vector<8x256xf32>
    %627 = arith.addf %621, %626 : vector<8x256xf32>
    %628 = vector.extract_strided_slice %585 {offsets = [0, 7], sizes = [8, 1], strides = [1, 1]} : vector<8x8xf32> to vector<8x1xf32>
    %629 = vector.extract_strided_slice %583 {offsets = [7, 0], sizes = [1, 256], strides = [1, 1]} : vector<8x256xf32> to vector<1x256xf32>
    %630 = vector.broadcast %628 : vector<8x1xf32> to vector<8x256xf32>
    %631 = vector.broadcast %629 : vector<1x256xf32> to vector<8x256xf32>
    %632 = arith.mulf %630, %631 : vector<8x256xf32>
    %633 = arith.addf %627, %632 : vector<8x256xf32>
    %c0_89 = arith.constant 0 : index
    %c129_90 = arith.constant 129 : index
    %634 = vector.load %arg9[%c0_89, %c129_90] : memref<8x512xf32, #tpu.memory_space<vmem>>, vector<8x256xf32>
    %c5_91 = arith.constant 5 : index
    %c0_92 = arith.constant 0 : index
    %c0_93 = arith.constant 0 : index
    %635 = vector.load %arg4[%c5_91, %c0_92, %c0_93] : memref<9x8x8xf32, #tpu.memory_space<vmem>>, vector<1x8x8xf32>
    %636 = vector.shape_cast %635 : vector<1x8x8xf32> to vector<8x8xf32>
    %637 = vector.extract_strided_slice %636 {offsets = [0, 0], sizes = [8, 1], strides = [1, 1]} : vector<8x8xf32> to vector<8x1xf32>
    %638 = vector.extract_strided_slice %634 {offsets = [0, 0], sizes = [1, 256], strides = [1, 1]} : vector<8x256xf32> to vector<1x256xf32>
    %639 = vector.broadcast %637 : vector<8x1xf32> to vector<8x256xf32>
    %640 = vector.broadcast %638 : vector<1x256xf32> to vector<8x256xf32>
    %641 = arith.mulf %639, %640 : vector<8x256xf32>
    %642 = arith.addf %633, %641 : vector<8x256xf32>
    %643 = vector.extract_strided_slice %636 {offsets = [0, 1], sizes = [8, 1], strides = [1, 1]} : vector<8x8xf32> to vector<8x1xf32>
    %644 = vector.extract_strided_slice %634 {offsets = [1, 0], sizes = [1, 256], strides = [1, 1]} : vector<8x256xf32> to vector<1x256xf32>
    %645 = vector.broadcast %643 : vector<8x1xf32> to vector<8x256xf32>
    %646 = vector.broadcast %644 : vector<1x256xf32> to vector<8x256xf32>
    %647 = arith.mulf %645, %646 : vector<8x256xf32>
    %648 = arith.addf %642, %647 : vector<8x256xf32>
    %649 = vector.extract_strided_slice %636 {offsets = [0, 2], sizes = [8, 1], strides = [1, 1]} : vector<8x8xf32> to vector<8x1xf32>
    %650 = vector.extract_strided_slice %634 {offsets = [2, 0], sizes = [1, 256], strides = [1, 1]} : vector<8x256xf32> to vector<1x256xf32>
    %651 = vector.broadcast %649 : vector<8x1xf32> to vector<8x256xf32>
    %652 = vector.broadcast %650 : vector<1x256xf32> to vector<8x256xf32>
    %653 = arith.mulf %651, %652 : vector<8x256xf32>
    %654 = arith.addf %648, %653 : vector<8x256xf32>
    %655 = vector.extract_strided_slice %636 {offsets = [0, 3], sizes = [8, 1], strides = [1, 1]} : vector<8x8xf32> to vector<8x1xf32>
    %656 = vector.extract_strided_slice %634 {offsets = [3, 0], sizes = [1, 256], strides = [1, 1]} : vector<8x256xf32> to vector<1x256xf32>
    %657 = vector.broadcast %655 : vector<8x1xf32> to vector<8x256xf32>
    %658 = vector.broadcast %656 : vector<1x256xf32> to vector<8x256xf32>
    %659 = arith.mulf %657, %658 : vector<8x256xf32>
    %660 = arith.addf %654, %659 : vector<8x256xf32>
    %661 = vector.extract_strided_slice %636 {offsets = [0, 4], sizes = [8, 1], strides = [1, 1]} : vector<8x8xf32> to vector<8x1xf32>
    %662 = vector.extract_strided_slice %634 {offsets = [4, 0], sizes = [1, 256], strides = [1, 1]} : vector<8x256xf32> to vector<1x256xf32>
    %663 = vector.broadcast %661 : vector<8x1xf32> to vector<8x256xf32>
    %664 = vector.broadcast %662 : vector<1x256xf32> to vector<8x256xf32>
    %665 = arith.mulf %663, %664 : vector<8x256xf32>
    %666 = arith.addf %660, %665 : vector<8x256xf32>
    %667 = vector.extract_strided_slice %636 {offsets = [0, 5], sizes = [8, 1], strides = [1, 1]} : vector<8x8xf32> to vector<8x1xf32>
    %668 = vector.extract_strided_slice %634 {offsets = [5, 0], sizes = [1, 256], strides = [1, 1]} : vector<8x256xf32> to vector<1x256xf32>
    %669 = vector.broadcast %667 : vector<8x1xf32> to vector<8x256xf32>
    %670 = vector.broadcast %668 : vector<1x256xf32> to vector<8x256xf32>
    %671 = arith.mulf %669, %670 : vector<8x256xf32>
    %672 = arith.addf %666, %671 : vector<8x256xf32>
    %673 = vector.extract_strided_slice %636 {offsets = [0, 6], sizes = [8, 1], strides = [1, 1]} : vector<8x8xf32> to vector<8x1xf32>
    %674 = vector.extract_strided_slice %634 {offsets = [6, 0], sizes = [1, 256], strides = [1, 1]} : vector<8x256xf32> to vector<1x256xf32>
    %675 = vector.broadcast %673 : vector<8x1xf32> to vector<8x256xf32>
    %676 = vector.broadcast %674 : vector<1x256xf32> to vector<8x256xf32>
    %677 = arith.mulf %675, %676 : vector<8x256xf32>
    %678 = arith.addf %672, %677 : vector<8x256xf32>
    %679 = vector.extract_strided_slice %636 {offsets = [0, 7], sizes = [8, 1], strides = [1, 1]} : vector<8x8xf32> to vector<8x1xf32>
    %680 = vector.extract_strided_slice %634 {offsets = [7, 0], sizes = [1, 256], strides = [1, 1]} : vector<8x256xf32> to vector<1x256xf32>
    %681 = vector.broadcast %679 : vector<8x1xf32> to vector<8x256xf32>
    %682 = vector.broadcast %680 : vector<1x256xf32> to vector<8x256xf32>
    %683 = arith.mulf %681, %682 : vector<8x256xf32>
    %684 = arith.addf %678, %683 : vector<8x256xf32>
    %c0_94 = arith.constant 0 : index
    %c145_95 = arith.constant 145 : index
    %685 = vector.load %arg9[%c0_94, %c145_95] : memref<8x512xf32, #tpu.memory_space<vmem>>, vector<8x256xf32>
    %c8_96 = arith.constant 8 : index
    %c0_97 = arith.constant 0 : index
    %c0_98 = arith.constant 0 : index
    %686 = vector.load %arg4[%c8_96, %c0_97, %c0_98] : memref<9x8x8xf32, #tpu.memory_space<vmem>>, vector<1x8x8xf32>
    %687 = vector.shape_cast %686 : vector<1x8x8xf32> to vector<8x8xf32>
    %688 = vector.extract_strided_slice %687 {offsets = [0, 0], sizes = [8, 1], strides = [1, 1]} : vector<8x8xf32> to vector<8x1xf32>
    %689 = vector.extract_strided_slice %685 {offsets = [0, 0], sizes = [1, 256], strides = [1, 1]} : vector<8x256xf32> to vector<1x256xf32>
    %690 = vector.broadcast %688 : vector<8x1xf32> to vector<8x256xf32>
    %691 = vector.broadcast %689 : vector<1x256xf32> to vector<8x256xf32>
    %692 = arith.mulf %690, %691 : vector<8x256xf32>
    %693 = arith.addf %684, %692 : vector<8x256xf32>
    %694 = vector.extract_strided_slice %687 {offsets = [0, 1], sizes = [8, 1], strides = [1, 1]} : vector<8x8xf32> to vector<8x1xf32>
    %695 = vector.extract_strided_slice %685 {offsets = [1, 0], sizes = [1, 256], strides = [1, 1]} : vector<8x256xf32> to vector<1x256xf32>
    %696 = vector.broadcast %694 : vector<8x1xf32> to vector<8x256xf32>
    %697 = vector.broadcast %695 : vector<1x256xf32> to vector<8x256xf32>
    %698 = arith.mulf %696, %697 : vector<8x256xf32>
    %699 = arith.addf %693, %698 : vector<8x256xf32>
    %700 = vector.extract_strided_slice %687 {offsets = [0, 2], sizes = [8, 1], strides = [1, 1]} : vector<8x8xf32> to vector<8x1xf32>
    %701 = vector.extract_strided_slice %685 {offsets = [2, 0], sizes = [1, 256], strides = [1, 1]} : vector<8x256xf32> to vector<1x256xf32>
    %702 = vector.broadcast %700 : vector<8x1xf32> to vector<8x256xf32>
    %703 = vector.broadcast %701 : vector<1x256xf32> to vector<8x256xf32>
    %704 = arith.mulf %702, %703 : vector<8x256xf32>
    %705 = arith.addf %699, %704 : vector<8x256xf32>
    %706 = vector.extract_strided_slice %687 {offsets = [0, 3], sizes = [8, 1], strides = [1, 1]} : vector<8x8xf32> to vector<8x1xf32>
    %707 = vector.extract_strided_slice %685 {offsets = [3, 0], sizes = [1, 256], strides = [1, 1]} : vector<8x256xf32> to vector<1x256xf32>
    %708 = vector.broadcast %706 : vector<8x1xf32> to vector<8x256xf32>
    %709 = vector.broadcast %707 : vector<1x256xf32> to vector<8x256xf32>
    %710 = arith.mulf %708, %709 : vector<8x256xf32>
    %711 = arith.addf %705, %710 : vector<8x256xf32>
    %712 = vector.extract_strided_slice %687 {offsets = [0, 4], sizes = [8, 1], strides = [1, 1]} : vector<8x8xf32> to vector<8x1xf32>
    %713 = vector.extract_strided_slice %685 {offsets = [4, 0], sizes = [1, 256], strides = [1, 1]} : vector<8x256xf32> to vector<1x256xf32>
    %714 = vector.broadcast %712 : vector<8x1xf32> to vector<8x256xf32>
    %715 = vector.broadcast %713 : vector<1x256xf32> to vector<8x256xf32>
    %716 = arith.mulf %714, %715 : vector<8x256xf32>
    %717 = arith.addf %711, %716 : vector<8x256xf32>
    %718 = vector.extract_strided_slice %687 {offsets = [0, 5], sizes = [8, 1], strides = [1, 1]} : vector<8x8xf32> to vector<8x1xf32>
    %719 = vector.extract_strided_slice %685 {offsets = [5, 0], sizes = [1, 256], strides = [1, 1]} : vector<8x256xf32> to vector<1x256xf32>
    %720 = vector.broadcast %718 : vector<8x1xf32> to vector<8x256xf32>
    %721 = vector.broadcast %719 : vector<1x256xf32> to vector<8x256xf32>
    %722 = arith.mulf %720, %721 : vector<8x256xf32>
    %723 = arith.addf %717, %722 : vector<8x256xf32>
    %724 = vector.extract_strided_slice %687 {offsets = [0, 6], sizes = [8, 1], strides = [1, 1]} : vector<8x8xf32> to vector<8x1xf32>
    %725 = vector.extract_strided_slice %685 {offsets = [6, 0], sizes = [1, 256], strides = [1, 1]} : vector<8x256xf32> to vector<1x256xf32>
    %726 = vector.broadcast %724 : vector<8x1xf32> to vector<8x256xf32>
    %727 = vector.broadcast %725 : vector<1x256xf32> to vector<8x256xf32>
    %728 = arith.mulf %726, %727 : vector<8x256xf32>
    %729 = arith.addf %723, %728 : vector<8x256xf32>
    %730 = vector.extract_strided_slice %687 {offsets = [0, 7], sizes = [8, 1], strides = [1, 1]} : vector<8x8xf32> to vector<8x1xf32>
    %731 = vector.extract_strided_slice %685 {offsets = [7, 0], sizes = [1, 256], strides = [1, 1]} : vector<8x256xf32> to vector<1x256xf32>
    %732 = vector.broadcast %730 : vector<8x1xf32> to vector<8x256xf32>
    %733 = vector.broadcast %731 : vector<1x256xf32> to vector<8x256xf32>
    %734 = arith.mulf %732, %733 : vector<8x256xf32>
    %735 = arith.addf %729, %734 : vector<8x256xf32>
    %736 = vector.broadcast %1 : vector<1x256xf32> to vector<8x256xf32>
    %737 = arith.mulf %735, %736 : vector<8x256xf32>
    %738 = arith.addf %581, %737 : vector<8x256xf32>
    %c0_99 = arith.constant 0 : index
    %c0_100 = arith.constant 0 : index
    %739 = vector.load %arg5[%c0_99, %c0_100] : memref<8x1xf32, #tpu.memory_space<vmem>>, vector<8x1xf32>
    %740 = vector.broadcast %739 : vector<8x1xf32> to vector<8x256xf32>
    %741 = arith.addf %738, %740 : vector<8x256xf32>
    %cst_101 = arith.constant 0.000000e+00 : f32
    %742 = vector.broadcast %cst_101 : f32 to vector<8x256xf32>
    %743 = arith.maximumf %741, %742 : vector<8x256xf32>
    %c0_102 = arith.constant 0 : index
    %c0_103 = arith.constant 0 : index
    %c0_104 = arith.constant 0 : index
    %744 = vector.load %arg7[%c0_102, %c0_103, %c0_104] : memref<1x8x256xf32, #tpu.memory_space<vmem>>, vector<1x8x256xf32>
    %745 = vector.shape_cast %744 : vector<1x8x256xf32> to vector<8x256xf32>
    %746 = vector.shape_cast %743 : vector<8x256xf32> to vector<1x8x256xf32>
    tpu.vector_store %arg7[%c0_102, %c0_103, %c0_104], %746 {strides = array<i32>} : memref<1x8x256xf32, #tpu.memory_space<vmem>>, vector<1x8x256xf32>,
    return
  }
  func.func @transform_0(%arg0: i32) -> (i32, i32, i32) {
    %c0_i32 = arith.constant 0 : i32
    %c0_i32_0 = arith.constant 0 : i32
    %c0_i32_1 = arith.constant 0 : i32
    return %arg0, %c0_i32, %c0_i32_0 : i32, i32, i32
  }
  func.func @transform_1(%arg0: i32) -> (i32, i32, i32) {
    %c0_i32 = arith.constant 0 : i32
    %c0_i32_0 = arith.constant 0 : i32
    %c0_i32_1 = arith.constant 0 : i32
    %c0_i32_2 = arith.constant 0 : i32
    return %c0_i32, %c0_i32_0, %c0_i32_1 : i32, i32, i32
  }
  func.func @transform_2(%arg0: i32) -> (i32, i32) {
    %c0_i32 = arith.constant 0 : i32
    %c0_i32_0 = arith.constant 0 : i32
    %c0_i32_1 = arith.constant 0 : i32
    return %c0_i32, %c0_i32_0 : i32, i32
  }
  func.func @transform_3(%arg0: i32) -> (i32, i32, i32) {
    %c0_i32 = arith.constant 0 : i32
    %c0_i32_0 = arith.constant 0 : i32
    %c0_i32_1 = arith.constant 0 : i32
    %c0_i32_2 = arith.constant 0 : i32
    return %c0_i32, %c0_i32_0, %c0_i32_1 : i32, i32, i32
  }
  func.func @transform_4(%arg0: i32) -> (i32, i32) {
    %c0_i32 = arith.constant 0 : i32
    %c0_i32_0 = arith.constant 0 : i32
    %c0_i32_1 = arith.constant 0 : i32
    return %c0_i32, %c0_i32_0 : i32, i32
  }
  func.func @transform_5(%arg0: i32) -> (i32, i32) {
    %c0_i32 = arith.constant 0 : i32
    %c0_i32_0 = arith.constant 0 : i32
    %c0_i32_1 = arith.constant 0 : i32
    return %c0_i32, %c0_i32_0 : i32, i32
  }
  func.func @transform_6(%arg0: i32) -> (i32, i32, i32) {
    %c0_i32 = arith.constant 0 : i32
    %c0_i32_0 = arith.constant 0 : i32
    %c0_i32_1 = arith.constant 0 : i32
    return %arg0, %c0_i32, %c0_i32_0 : i32, i32, i32
  }
}

</mosaic_0001>

<bundles_post_ra>
// kernel: tpu_custom_call.1
= control target key start
LH: loop header
LB: loop body
LE: loop exit
PB: predicated region body
PF: predicated region fallthrough
CT: control target
= control target key end

     0   :  { %11 = vsyncpa [#allocation5], 0  ;;  %s5648_s0 = inlined_call_operand.vmem [shape: f32[2,4,256], index: 0, kind: input, shape index: {}]   ;;  %s5649_s1 = inlined_call_operand.vmem [shape: f32[9,8,4], index: 1, kind: input, shape index: {}]   ;;  %s5650_s2 = inlined_call_operand.vmem [shape: f32[8,1], index: 2, kind: input, shape index: {}]   ;;  %s5651_s3 = inlined_call_operand.vmem [shape: f32[9,8,8], index: 3, kind: input, shape index: {}]   ;;  %s5652_s4 = inlined_call_operand.vmem [shape: f32[8,1], index: 4, kind: input, shape index: {}]   ;;  %s5653_s5 = inlined_call_operand.vmem [shape: f32[2,256], index: 5, kind: input, shape index: {}]   ;;  %s5654_s6 = inlined_call_operand.hbm [shape: f32[2,8,256], index: 6, kind: output, shape index: {}]  }
   0x1   :  { %13 = vsyncpa [#allocation5 + $0x1], 0  ;;  %s3384_s21 = smov 0   ;;  %s3386_s22 = smov 0  }
   0x2   :  { %s3388_s23 = smov 0   ;;  %s3390_s24 = smov 0  }
   0x3 LB: > { %s3405_s25 = sadd.s32 4294967295, %s3330_s24   ;;  %s3092_s26 = sadd.s32 4294967294, %s3330_s24   ;;  %s3330_s24 = sphi %s3390_s24, %s6156_s24   ;;  %s3326_s23 = sphi %s3388_s23, %s6155_s23   ;;  %s3322_s22 = sphi %s3386_s22, %s6154_s22   ;;  %s3318_s21 = sphi %s3384_s21, %s6153_s21  }
   0x4   : > { %s3409_s27 = sadd.s32 1, %s3330_s24   ;;  %s157_s28 = sadd.s32 1, %s3326_s23 }
   0x5   : > { %s154_s29 = ssub.s32 %s3330_s24, %s3409_s27  ;;  %p167_p0 = scmp.ne.s32.totalorder %s3326_s23, %s3322_s22 }
   0x6   : > { %p155_p1 = scmp.eq.s32.totalorder %s154_s29, 0  ;;  %p168_p2 = scmp.eq.s32.totalorder %s3405_s25, 1 }
   0x7   : > { %p173_p3 = scmp.ne.s32.totalorder %s3322_s22, %s3318_s21  ;;  %p174_p4 = scmp.eq.s32.totalorder %s3092_s26, 1 }
   0x8   : > { %s3420_s30 = scalar_select %p155_p1, %s3326_s23, %s157_s28  }
   0x9   : > { %p3422_p5 = por %p168_p2, %p167_p0  ;;  %p3426_p6 = por %p174_p4, %p173_p3 }
   0xa   : > { %p3095_p7 = scmp.ge.s32.totalorder %s3330_s24, 1  ;;  %p215_p8 = scmp.lt.s32.totalorder %s3330_s24, 3 }
   0xc   : > { %p216_p9 = pnand %p3095_p7, %p215_p8 }
   0xe   : > { %219 = sbr.rel (%p216_p9) target bundleno = 2765 (0xacd), region = 44 }
  0x15   : > { %v3435_v0 = vld [vmem:[%s5649_s1] sm:$0xff]  ;;  %v5657_v1 = vmov 2   ;;  %v267_v2 = vlaneseq  ;;  %p245_p10 = scmp.lt.s32.totalorder %s3405_s25, 1  ;;  %v5655_v4 = vmov 0.0   ;;  %v5663_v6 = vmov 3   ;;  %v3100_v10 = vld [vmem:[%s5649_s1 + $0x18] sm:$0xff] }
  0x16   : > { %3178 = vset.pattern.permute.xlu1 %v5657_v1  ;;  %3192 = vset.pattern.permute.xlu0 %v5657_v1  ;;  %253 = vst [vmem:[#allocation2] sm:$0xff] %v5655_v4  ;;  %254 = vst [vmem:[#allocation2 + $0x8] sm:$0xff] %v5655_v4  ;;  %v250_v7 = vld [vmem:[%s5653_s5] ss:$2 sm:$0x3]  ;;  %s3335_s20 = smov 111  }
  0x17   : > { %338 = vperm.xlu1 %3178, %v3435_v0   ;;  %v3441_v3 = vshrl.u32 %v267_v2, 7  ;;  %s246_s11 = scalar_select %p245_p10, %s3405_s25, 1  ;;  %v3103_v11 = vld [vmem:[%s5649_s1 + $0x20] sm:$0xff]  ;;  %v5661_v12 = vmov 0   ;;  %v5659_v13 = vmov 1   ;;  %v3473_v14 = vld [vmem:[%s5649_s1 + $0x8] sm:$0xff] }
  0x18   : > { %v3101_v15 = vld [vmem:[%s5649_s1 + $0x30] sm:$0xff]  ;;  %v3487_v16 = vld [vmem:[%s5649_s1 + $0x38] sm:$0xff]  ;;  %s3339_s15 = smov 96   ;;  %s3340_s9 = smov 113   ;;  %vm430_vm0 = vcmask 916480   ;;  %vm561_vm1 = vcmask 785408  }
  0x19   : > { %v3447_v5 = vsub.s32 1, %v3441_v3  ;;  %s3121_s14 = sshll.u32 %s246_s11, 3  ;;  %v3494_v17 = vsub.s32 0, %v3441_v3  ;;  %v3510_v19 = vsub.s32 4, %v3441_v3  ;;  %v3517_v24 = vsub.s32 5, %v3441_v3  ;;  %s3343_s18 = smov 127  }
  0x1a   : > { %s249_s17 = scalar_lea.vmem %s5648_s0, %s3121_s14  ;;  %v3533_v31 = vsub.s32 6, %v3441_v3  ;;  %s3338_s14 = smov 112   ;;  %v3554_v43 = vsub.s32 7, %v3441_v3  ;;  %v3558_v45 = vsub.s32 2, %v3441_v3  ;;  %v3574_v53 = vsub.s32 3, %v3441_v3 }
  0x1b   : > { %5823 = vst [vmem:[#allocation7_spill] sm:$0xff] %v3447_v5  ;;  %3179 = vset.pattern.permute.xlu1 %v5663_v6  ;;  %v731_v8 = vrot.slane %v250_v7, %v3447_v5  ;;  %v3458_v9 = vld [vmem:[%s249_s17] sm:$0xff]  ;;  %5824 = vst [vmem:[#allocation8_spill] sm:$0xff] %v3494_v17  ;;  %v727_v18 = vrot.slane %v250_v7, %v3494_v17  ;;  %vm1314_vm2 = vcmask 924672   ;;  %s3344_s19 = smov 126   ;;  %vm1051_vm3 = vcmask 1039360  }
  0x1c   : > { %375 = vperm.xlu1 %3179, %v3435_v0   ;;  %256 = vst [vmem:[#allocation2 + $0x4] sm:$0xff] %v3458_v9  ;;  %5825 = vst [vmem:[#allocation9_spill] sm:$0xff] %v3510_v19  ;;  %v529_v55 = vrot.slane %v3458_v9, %v3510_v19  ;;  %v581_v63 = vrot.slane %v3458_v9, %v3517_v24  ;;  %vm1331_vm4 = vcmask 1031168   ;;  %vm736_vm5 = vcmask 908288   ;;  %s3347_s13 = smov 17  }
  0x1d   : > { %734 = vrot.lane.b32.xlu0 %v731_v8, %s3335_s20  ;;  %5827 = vst [vmem:[#allocation11_spill] sm:$0xff] %v3517_v24  ;;  %5830 = vst [vmem:[#allocation14_spill] sm:$0xff] %v3533_v31  ;;  %vm1365_vm6 = vcmask 138240  }
  0x1e   : > { %5832 = vst [vmem:[#allocation16_spill] sm:$0xff] %v3554_v43  ;;  %5833 = vst [vmem:[#allocation17_spill] sm:$0xff] %v3558_v45  ;;  %v3592_v62 = vrot.slane %v529_v55, %v3494_v17 }
  0x1f   : > { %5835 = vst [vmem:[#allocation19_spill] sm:$0xff] %v3574_v53 }
  0x20   : > { %3180 = vset.pattern.permute.xlu1 %v5661_v12 }
  0x21   : > { %415 = vperm.xlu1 %3180, %v3100_v10   ;;  %870 = vperm.xlu0 %3192, %v3103_v11  }
  0x23   : > { %v257_v21 = vld [vmem:[#allocation2] sm:$0xff]  ;;  %v3521_v26 = vld [vmem:[#allocation2 + $0x8] sm:$0xf] }
  0x24   : > { %v274_v22 = vrot.slane %v257_v21, %v3510_v19  ;;  %v270_v23 = vrot.slane %v257_v21, %v3494_v17  ;;  %v278_v29 = vrot.slane %v3521_v26, %v3494_v17  ;;  %v311_v30 = vrot.slane %v257_v21, %v3517_v24 }
  0x25   : > { %3181 = vset.pattern.permute.xlu1 %v5659_v13  ;;  %3193 = vset.pattern.permute.xlu0 %v5663_v6  ;;  %v307_v36 = vrot.slane %v257_v21, %v3447_v5  ;;  %v348_v38 = vrot.slane %v257_v21, %v3533_v31  ;;  %v315_v42 = vrot.slane %v3521_v26, %v3447_v5  ;;  %v5849_v24 = vmov 1  }
  0x26   : > { %440 = vperm.xlu1 %3181, %v3100_v10   ;;  %781 = vperm.xlu0 %3193, %v3473_v14   ;;  %v3524_v27 = vrot.slane %v274_v22, %v3494_v17  ;;  %v3527_v28 = vrot.slane %v270_v23, %v3494_v17  ;;  %v3538_v35 = vrot.slane %v278_v29, %v3494_v17 }
  0x27   : > { %v3542_v37 = vrot.slane %v311_v30, %v3447_v5  ;;  %v3549_v41 = vrot.slane %v307_v36, %v3447_v5  ;;  %v3563_v46 = vrot.slane %v348_v38, %v3558_v45  ;;  %v3567_v48 = vrot.slane %v315_v42, %v3447_v5 }
  0x28   : > { %5829 = vst [vmem:[#allocation13_spill] sm:$0xff] %v3524_v27  ;;  %5831 = vst [vmem:[#allocation15_spill] sm:$0xff] %v3538_v35  ;;  %v385_v49 = vrot.slane %v257_v21, %v3554_v43  ;;  %v344_v51 = vrot.slane %v257_v21, %v3558_v45  ;;  %v352_v57 = vrot.slane %v3521_v26, %v3558_v45 }
  0x29   : > { %5834 = vst [vmem:[#allocation18_spill] sm:$0xff] %v3567_v48  ;;  %v381_v3 = vrot.slane %v257_v21, %v3574_v53  ;;  %v632_v21 = vrot.slane %v3458_v9, %v3533_v31  ;;  %v525_v29 = vrot.slane %v3458_v9, %v3494_v17  ;;  %v5847_v31 = vmov 3  }
  0x2a   : > { %3182 = vset.pattern.permute.xlu1 %v5657_v1  ;;  %907 = vperm.xlu0 %3193, %v3103_v11   ;;  %v3581_v56 = vrot.slane %v385_v49, %v3574_v53  ;;  %v3586_v58 = vrot.slane %v344_v51, %v3558_v45  ;;  %v3598_v2 = vrot.slane %v352_v57, %v3558_v45 }
  0x2b   : > { %464 = vperm.xlu1 %3182, %v3100_v10   ;;  %v3632_v38 = vrot.slane %v525_v29, %v3494_v17 }
  0x2e   : > { %3194 = vset.pattern.permute.xlu0 %v5661_v12 }
  0x2f   : > { %3183 = vset.pattern.permute.xlu1 %v5663_v6  ;;  %262 = vperm.xlu0 %3194, %v3435_v0  }
  0x30   : > { %488 = vperm.xlu1 %3183, %v3100_v10  }
  0x33   : > { %947 = vperm.xlu0 %3194, %v3487_v16  }
  0x34   : > { %3184 = vset.pattern.permute.xlu1 %v5661_v12 }
  0x35   : > { %517 = vperm.xlu1 %3184, %v3101_v15  }
  0x39   : > { %3185 = vset.pattern.permute.xlu1 %v5659_v13 }
  0x3a   : > { %571 = vperm.xlu1 %3185, %v3101_v15  }
  0x3e   : > { %3186 = vset.pattern.permute.xlu1 %v5657_v1 }
  0x3f   : > { %622 = vperm.xlu1 %3186, %v3101_v15  }
  0x43   : > { %3187 = vset.pattern.permute.xlu1 %v5663_v6 }
  0x44   : > { %673 = vperm.xlu1 %3187, %v3101_v15   ;;  %v389_v15 = vrot.slane %v3521_v26, %v3574_v53  ;;  %v512_v26 = vld [vmem:[#allocation2 + $0xc] sm:$0xf] }
  0x45   : > { %v585_v57 = vrot.slane %v512_v26, %v3447_v5 }
  0x48   : > { %732 = vrot.lane.b32.xlu1 %v727_v18, %s3335_s20  ;;  %v3610_v18 = vrot.slane %v381_v3, %v3574_v53  ;;  %v628_v3 = vrot.slane %v3458_v9, %v3558_v45 }
  0x49   : > { %3188 = vset.pattern.permute.xlu1 %v5661_v12 }
  0x4c   : > { %751 = vperm.xlu1 %3188, %v3473_v14  }
  0x50   : > { %3189 = vset.pattern.permute.xlu1 %v5657_v1 }
  0x51   : > { %771 = vperm.xlu1 %3189, %v3473_v14  }
  0x55   : > { %3190 = vset.pattern.permute.xlu1 %v5661_v12 }
  0x56   : > { %795 = vperm.xlu1 %3190, %v3103_v11  }
  0x5a   : > { %3191 = vset.pattern.permute.xlu1 %v5659_v13 }
  0x5b   : > { %833 = vperm.xlu1 %3191, %v3103_v11   ;;  %v3605_v11 = vrot.slane %v581_v63, %v3447_v5  ;;  %v3662_v63 = vrot.slane %v585_v57, %v3447_v5 }
  0x5f   : > { %971 = vperm.xlu1 %3191, %v3487_v16  }
  0x63   : > { %3195 = vset.pattern.permute.xlu1 %v5657_v1 }
  0x64   : > { %995 = vperm.xlu1 %3195, %v3487_v16  }
  0x68   : > { %3196 = vset.pattern.permute.xlu1 %v5663_v6  ;;  %v3780_v6 = vld [vmem:[%s5649_s1 + $0x10] sm:$0xff] }
  0x96   : > { %v3512_v20 = vpop.permute.xlu1 %338 }
  0x97   : > { %5826 = vst [vmem:[#allocation10_spill] sm:$0xff] %v3512_v20 }
  0x9b   : > { %v3519_v25 = vpop.permute.xlu1 %375 }
  0x9c   : > { %5828 = vst [vmem:[#allocation12_spill] sm:$0xff] %v3519_v25 }
  0xa0   : > { %v416_v32 = vpop.permute.xlu1 %415 }
  0xa1   : > { %v419_v33 = vmul.f32 %v416_v32, %v3524_v27  ;;  %v418_v34 = vmul.f32 %v416_v32, %v3527_v28  ;;  %v420_v40 = vmul.f32 %v416_v32, %v3538_v35  ;;  %v3621_v32 = vrot.slane %v389_v15, %v3574_v53 }
  0xa2   : > { %v3671_v15 = vrot.slane %v628_v3, %v3558_v45 }
  0xa3   : > { %426 = vrot.lane.b32.xlu1 %v419_v33, %s3338_s14  ;;  %424 = vrot.lane.b32.xlu0 %v418_v34, %s3338_s14  ;;  %v3625_v33 = vrot.slane %v632_v21, %v3558_v45  ;;  %v683_v34 = vrot.slane %v3458_v9, %v3554_v43  ;;  %v636_v21 = vrot.slane %v512_v26, %v3558_v45 }
  0xa5   : > { %v441_v39 = vpop.permute.xlu1 %440 }
  0xa6   : > { %v444_v44 = vmul.f32 %v441_v39, %v3542_v37  ;;  %v443_v47 = vmul.f32 %v441_v39, %v3549_v41  ;;  %v445_v54 = vmul.f32 %v441_v39, %v3567_v48  ;;  %v533_v39 = vrot.slane %v512_v26, %v3494_v17 }
  0xa7   : > { %428 = vrot.lane.b32.xlu0 %v420_v40, %s3338_s14 }
  0xa8   : > { %451 = vrot.lane.b32.xlu1 %v444_v44, %s3338_s14  ;;  %v3638_v44 = vrot.slane %v683_v34, %v3574_v53  ;;  %v3643_v49 = vrot.slane %v533_v39, %v3494_v17  ;;  %v679_v34 = vrot.slane %v3458_v9, %v3574_v53 }
  0xaa   : > { %v465_v50 = vpop.permute.xlu1 %464 }
  0xab   : > { %449 = vrot.lane.b32.xlu0 %v443_v47, %s3338_s14  ;;  %v468_v52 = vmul.f32 %v465_v50, %v3563_v46  ;;  %v467_v61 = vmul.f32 %v465_v50, %v3586_v58  ;;  %v469_v10 = vmul.f32 %v465_v50, %v3598_v2  ;;  %v577_v50 = vrot.slane %v3458_v9, %v3447_v5 }
  0xad   : > { %475 = vrot.lane.b32.xlu1 %v468_v52, %s3338_s14  ;;  %v3651_v55 = vrot.slane %v577_v50, %v3447_v5 }
  0xaf   : > { %v489_v59 = vpop.permute.xlu1 %488  ;;  %453 = vrot.lane.b32.xlu0 %v445_v54, %s3338_s14 }
  0xb0   : > { %v492_v60 = vmul.f32 %v489_v59, %v3581_v56  ;;  %v491_v23 = vmul.f32 %v489_v59, %v3610_v18  ;;  %v493_v36 = vmul.f32 %v489_v59, %v3621_v32 }
  0xb2   : > { %499 = vrot.lane.b32.xlu1 %v492_v60, %s3338_s14  ;;  %v3658_v60 = vpop.permute.xlu0 %734 }
  0xb3   : > { %473 = vrot.lane.b32.xlu0 %v467_v61, %s3338_s14  ;;  %5837 = vst [vmem:[#allocation21_spill] sm:$0xff] %v3658_v60 }
  0xb4   : > { %v518_v7 = vpop.permute.xlu1 %517 }
  0xb5   : > { %v550_v8 = vmul.f32 %v3592_v62, %v518_v7  ;;  %v549_v47 = vmul.f32 %v3632_v38, %v518_v7  ;;  %v551_v54 = vmul.f32 %v3643_v49, %v518_v7 }
  0xb7   : > { %557 = vrot.lane.b32.xlu1 %v550_v8, %s3339_s15  ;;  %477 = vrot.lane.b32.xlu0 %v469_v10, %s3338_s14  ;;  %v871_v8 = vpop.permute.xlu0 %870 }
  0xb8   : > { %v891_v3 = vmul.f32 %v871_v8, %v3671_v15 }
  0xb9   : > { %v572_v22 = vpop.permute.xlu1 %571 }
  0xba   : > { %v602_v30 = vmul.f32 %v3605_v11, %v572_v22  ;;  %v601_v61 = vmul.f32 %v3651_v55, %v572_v22  ;;  %v603_v10 = vmul.f32 %v3662_v63, %v572_v22 }
  0xbb   : > { %497 = vrot.lane.b32.xlu0 %v491_v23, %s3338_s14 }
  0xbc   : > { %609 = vrot.lane.b32.xlu1 %v602_v30, %s3339_s15  ;;  %v3679_v30 = vrot.slane %v636_v21, %v3558_v45  ;;  %v892_v21 = vmul.f32 %v871_v8, %v3625_v33 }
  0xbe   : > { %v623_v40 = vpop.permute.xlu1 %622 }
  0xbf   : > { %501 = vrot.lane.b32.xlu0 %v493_v36, %s3338_s14  ;;  %v653_v42 = vmul.f32 %v3625_v33, %v623_v40  ;;  %v652_v29 = vmul.f32 %v3671_v15, %v623_v40  ;;  %v3683_v36 = vpop.permute.xlu0 %781  ;;  %v654_v39 = vmul.f32 %v3679_v30, %v623_v40 }
  0xc1   : > { %660 = vrot.lane.b32.xlu1 %v653_v42, %s3339_s15  ;;  %v3688_v42 = vrot.slane %v679_v34, %v3574_v53 }
  0xc3   : > { %v674_v51 = vpop.permute.xlu1 %673  ;;  %555 = vrot.lane.b32.xlu0 %v549_v47, %s3339_s15  ;;  %v687_v47 = vrot.slane %v512_v26, %v3574_v53 }
  0xc4   : > { %v704_v52 = vmul.f32 %v3638_v44, %v674_v51  ;;  %v703_v9 = vmul.f32 %v3688_v42, %v674_v51 }
  0xc6   : > { %711 = vrot.lane.b32.xlu1 %v704_v52, %s3339_s15  ;;  %v908_v52 = vpop.permute.xlu0 %907 }
  0xc7   : > { %v3655_v59 = vpop.permute.xlu1 %732  ;;  %559 = vrot.lane.b32.xlu0 %v551_v54, %s3339_s15  ;;  %v3696_v54 = vrot.slane %v687_v47, %v3574_v53  ;;  %v929_v47 = vmul.f32 %v908_v52, %v3638_v44 }
  0xc8   : > { %5836 = vst [vmem:[#allocation20_spill] sm:$0xff] %v3655_v59 }
  0xc9   : > { %v705_v26 = vmul.f32 %v3696_v54, %v674_v51  ;;  %v928_v51 = vmul.f32 %v908_v52, %v3688_v42 }
  0xcb   : > { %v3666_v7 = vpop.permute.xlu1 %751  ;;  %607 = vrot.lane.b32.xlu0 %v601_v61, %s3339_s15  ;;  %v3702_v61 = vpop.permute.xlu0 %262 }
  0xcc   : > { %5838 = vst [vmem:[#allocation22_spill] sm:$0xff] %v3702_v61 }
  0xcf   : > { %611 = vrot.lane.b32.xlu0 %v603_v10, %s3339_s15 }
  0xd0   : > { %v3675_v23 = vpop.permute.xlu1 %771 }
  0xd3   : > { %658 = vrot.lane.b32.xlu0 %v652_v29, %s3339_s15  ;;  %v948_v29 = vpop.permute.xlu0 %947 }
  0xd5   : > { %v796_v22 = vpop.permute.xlu1 %795 }
  0xd6   : > { %v817_v50 = vmul.f32 %v796_v22, %v3632_v38  ;;  %v818_v10 = vmul.f32 %v796_v22, %v3592_v62 }
  0xd7   : > { %662 = vrot.lane.b32.xlu0 %v654_v39, %s3339_s15  ;;  %v952_v39 = vmul.f32 %v948_v29, %v3643_v49 }
  0xd8   : > { %821 = vrot.lane.b32.xlu1 %v817_v50, %s3338_s14  ;;  %v950_v50 = vmul.f32 %v948_v29, %v3632_v38 }
  0xda   : > { %v834_v57 = vpop.permute.xlu1 %833 }
  0xdb   : > { %v855_v40 = vmul.f32 %v834_v57, %v3605_v11  ;;  %709 = vrot.lane.b32.xlu0 %v703_v9, %s3339_s15  ;;  %v854_v34 = vmul.f32 %v834_v57, %v3651_v55 }
  0xdd   : > { %860 = vrot.lane.b32.xlu1 %v855_v40, %s3338_s14  ;;  %v951_v40 = vmul.f32 %v948_v29, %v3592_v62 }
  0xde   : > { %v972_v22 = vpop.permute.xlu1 %971 }
  0xdf   : > { %713 = vrot.lane.b32.xlu0 %v705_v26, %s3339_s15  ;;  %v974_v8 = vmul.f32 %v972_v22, %v3651_v55  ;;  %v976_v57 = vmul.f32 %v972_v22, %v3662_v63  ;;  %v975_v26 = vmul.f32 %v972_v22, %v3605_v11 }
  0xe1   : > { %895 = vrot.lane.b32.xlu1 %v891_v3, %s3338_s14 }
  0xe3   : > { %823 = vrot.lane.b32.xlu0 %v818_v10, %s3338_s14  ;;  %v996_v9 = vpop.permute.xlu1 %995 }
  0xe4   : > { %v998_v52 = vmul.f32 %v996_v9, %v3671_v15  ;;  %v1000_v3 = vmul.f32 %v996_v9, %v3679_v30  ;;  %v999_v10 = vmul.f32 %v996_v9, %v3625_v33 }
  0xe5   : > { %897 = vrot.lane.b32.xlu1 %v892_v21, %s3338_s14 }
  0xe7   : > { %858 = vrot.lane.b32.xlu0 %v854_v34, %s3338_s14 }
  0xe9   : > { %932 = vrot.lane.b32.xlu1 %v928_v51, %s3338_s14 }
  0xeb   : > { %960 = vrot.lane.b32.xlu0 %v952_v39, %s3339_s15 }
  0xed   : > { %934 = vrot.lane.b32.xlu1 %v929_v47, %s3338_s14 }
  0xef   : > { %980 = vrot.lane.b32.xlu0 %v974_v8, %s3339_s15 }
  0xf1   : > { %956 = vrot.lane.b32.xlu1 %v950_v50, %s3339_s15 }
  0xf3   : > { %984 = vrot.lane.b32.xlu0 %v976_v57, %s3339_s15 }
  0xf5   : > { %958 = vrot.lane.b32.xlu1 %v951_v40, %s3339_s15 }
  0xf7   : > { %1004 = vrot.lane.b32.xlu0 %v998_v52, %s3339_s15 }
  0xf9   : > { %982 = vrot.lane.b32.xlu1 %v975_v26, %s3339_s15 }
  0xfb   : > { %1008 = vrot.lane.b32.xlu0 %v1000_v3, %s3339_s15 }
  0xfd   : > { %1006 = vrot.lane.b32.xlu1 %v999_v10, %s3339_s15 }
 0x101   : > { %1019 = vperm.xlu1 %3196, %v3487_v16  }
 0x105   : > { %3197 = vset.pattern.permute.xlu1 %v5659_v13 }
 0x115   : > { %v3737_v21 = vpop.permute.xlu1 %426 }
 0x116   : > { %5839 = vst [vmem:[#allocation23_spill] sm:$0xff] %v3737_v21 }
 0x11a   : > { %v3739_v29 = vpop.permute.xlu1 %451 }
 0x11b   : > { %5840 = vst [vmem:[#allocation24_spill] sm:$0xff] %v3739_v29 }
 0x11f   : > { %v3741_v34 = vpop.permute.xlu1 %475 }
 0x120   : > { %5841 = vst [vmem:[#allocation25_spill] sm:$0xff] %v3741_v34 }
 0x124   : > { %v3743_v51 = vpop.permute.xlu1 %499 }
 0x125   : > { %5842 = vst [vmem:[#allocation26_spill] sm:$0xff] %v3743_v51 }
 0x129   : > { %v3745_v39 = vpop.permute.xlu1 %557 }
 0x12a   : > { %5843 = vst [vmem:[#allocation27_spill] sm:$0xff] %v3745_v39 }
 0x12e   : > { %v3747_v22 = vpop.permute.xlu1 %609 }
 0x12f   : > { %5844 = vst [vmem:[#allocation28_spill] sm:$0xff] %v3747_v22 }
 0x133   : > { %v3749_v47 = vpop.permute.xlu1 %660 }
 0x134   : > { %5845 = vst [vmem:[#allocation29_spill] sm:$0xff] %v3749_v47 }
 0x138   : > { %v3751_v8 = vpop.permute.xlu1 %711 }
 0x139   : > { %5846 = vst [vmem:[#allocation30_spill] sm:$0xff] %v3751_v8  ;;  %v5850_v8 = vmov 2  }
 0x14a   : > { %v3753_v50 = vpop.permute.xlu1 %821 }
 0x14f   : > { %v3755_v16 = vpop.permute.xlu1 %860 }
 0x153   : > { %v3757_v9 = vpop.permute.xlu1 %895 }
 0x157   : > { %v3759_v57 = vpop.permute.xlu1 %897 }
 0x15b   : > { %v3761_v40 = vpop.permute.xlu1 %932 }
 0x15f   : > { %v3763_v52 = vpop.permute.xlu1 %934 }
 0x163   : > { %v3765_v26 = vpop.permute.xlu1 %956 }
 0x167   : > { %v3767_v3 = vpop.permute.xlu1 %958 }
 0x16b   : > { %v3769_v10 = vpop.permute.xlu1 %982 }
 0x16f   : > { %v3771_v4 = vpop.permute.xlu1 %1006 }
 0x180   : > { %v1020_v1 = vpop.permute.xlu1 %1019 }
 0x181   : > { %v1023_v13 = vmul.f32 %v1020_v1, %v3638_v44  ;;  %v1022_v12 = vmul.f32 %v1020_v1, %v3688_v42  ;;  %v1024_v43 = vmul.f32 %v1020_v1, %v3696_v54 }
 0x183   : > { %1030 = vrot.lane.b32.xlu1 %v1023_v13, %s3339_s15  ;;  %1028 = vrot.lane.b32.xlu0 %v1022_v12, %s3339_s15  ;;  %v3106_v12 = vld [vmem:[%s5649_s1 + $0x28] sm:$0xff]  ;;  %v5848_v13 = vmov 0  }
 0x187   : > { %1074 = vperm.xlu1 %3197, %v3780_v6   ;;  %1032 = vrot.lane.b32.xlu0 %v1024_v43, %s3339_s15 }
 0x18b   : > { %3198 = vset.pattern.permute.xlu1 %v5847_v31  ;;  %1064 = vperm.xlu0 %3194, %v3780_v6  }
 0x18c   : > { %1094 = vperm.xlu1 %3198, %v3780_v6  }
 0x190   : > { %3199 = vset.pattern.permute.xlu1 %v5848_v13 }
 0x191   : > { %1107 = vperm.xlu1 %3199, %v3106_v12  }
 0x195   : > { %3200 = vset.pattern.permute.xlu1 %v5849_v24 }
 0x1f5   : > { %v3793_v1 = vpop.permute.xlu1 %1030 }
 0x206   : > { %v3795_v19 = vpop.permute.xlu1 %1074 }
 0x20b   : > { %v3797_v43 = vpop.permute.xlu1 %1094 }
 0x210   : > { %v1108_v53 = vpop.permute.xlu1 %1107 }
 0x211   : > { %v1111_v45 = vmul.f32 %v1108_v53, %v3592_v62  ;;  %v1110_v60 = vmul.f32 %v1108_v53, %v3632_v38  ;;  %v1112_v59 = vmul.f32 %v1108_v53, %v3643_v49 }
 0x213   : > { %1118 = vrot.lane.b32.xlu1 %v1111_v45, %s3338_s14  ;;  %1116 = vrot.lane.b32.xlu0 %v1110_v60, %s3338_s14 }
 0x217   : > { %1131 = vperm.xlu1 %3200, %v3106_v12   ;;  %1120 = vrot.lane.b32.xlu0 %v1112_v59, %s3338_s14 }
 0x21b   : > { %3201 = vset.pattern.permute.xlu1 %v5850_v8 }
 0x285   : > { %v3806_v47 = vpop.permute.xlu1 %1118 }
 0x296   : > { %v1132_v22 = vpop.permute.xlu1 %1131 }
 0x297   : > { %v1135_v39 = vmul.f32 %v1132_v22, %v3605_v11  ;;  %v1134_v51 = vmul.f32 %v1132_v22, %v3651_v55  ;;  %v1136_v45 = vmul.f32 %v1132_v22, %v3662_v63 }
 0x299   : > { %1142 = vrot.lane.b32.xlu1 %v1135_v39, %s3338_s14  ;;  %1140 = vrot.lane.b32.xlu0 %v1134_v51, %s3338_s14 }
 0x29d   : > { %1155 = vperm.xlu1 %3201, %v3106_v12   ;;  %1144 = vrot.lane.b32.xlu0 %v1136_v45, %s3338_s14 }
 0x2a1   : > { %3202 = vset.pattern.permute.xlu1 %v5847_v31 }
 0x30b   : > { %v3815_v53 = vpop.permute.xlu1 %1142 }
 0x31c   : > { %v1156_v59 = vpop.permute.xlu1 %1155 }
 0x31d   : > { %v1159_v60 = vmul.f32 %v1156_v59, %v3625_v33  ;;  %v1158_v34 = vmul.f32 %v1156_v59, %v3671_v15  ;;  %v1160_v51 = vmul.f32 %v1156_v59, %v3679_v30 }
 0x31f   : > { %1166 = vrot.lane.b32.xlu1 %v1159_v60, %s3338_s14  ;;  %1164 = vrot.lane.b32.xlu0 %v1158_v34, %s3338_s14  ;;  %v3107_v34 = vld [vmem:[%s5649_s1 + $0x40] sm:$0xff] }
 0x323   : > { %1179 = vperm.xlu1 %3202, %v3106_v12   ;;  %1168 = vrot.lane.b32.xlu0 %v1160_v51, %s3338_s14 }
 0x327   : > { %3203 = vset.pattern.permute.xlu1 %v5848_v13 }
 0x391   : > { %v3824_v39 = vpop.permute.xlu1 %1166 }
 0x3a2   : > { %v1180_v22 = vpop.permute.xlu1 %1179 }
 0x3a3   : > { %v1183_v45 = vmul.f32 %v1180_v22, %v3638_v44  ;;  %v1182_v29 = vmul.f32 %v1180_v22, %v3688_v42  ;;  %v1184_v12 = vmul.f32 %v1180_v22, %v3696_v54 }
 0x3a5   : > { %1190 = vrot.lane.b32.xlu1 %v1183_v45, %s3338_s14  ;;  %1188 = vrot.lane.b32.xlu0 %v1182_v29, %s3338_s14 }
 0x3a9   : > { %1206 = vperm.xlu1 %3203, %v3107_v34   ;;  %1192 = vrot.lane.b32.xlu0 %v1184_v12, %s3338_s14 }
 0x3ad   : > { %3204 = vset.pattern.permute.xlu1 %v5849_v24 }
 0x417   : > { %v3836_v59 = vpop.permute.xlu1 %1190 }
 0x418   : > { %5851 = vst [vmem:[#allocation31_spill] sm:$0xff] %v3836_v59 }
 0x428   : > { %v1207_v60 = vpop.permute.xlu1 %1206 }
 0x429   : > { %v1210_v51 = vmul.f32 %v1207_v60, %v3592_v62  ;;  %v1209_v45 = vmul.f32 %v1207_v60, %v3632_v38  ;;  %v1211_v29 = vmul.f32 %v1207_v60, %v3643_v49 }
 0x42b   : > { %1217 = vrot.lane.b32.xlu1 %v1210_v51, %s3339_s15  ;;  %1215 = vrot.lane.b32.xlu0 %v1209_v45, %s3339_s15 }
 0x42f   : > { %1230 = vperm.xlu1 %3204, %v3107_v34   ;;  %1219 = vrot.lane.b32.xlu0 %v1211_v29, %s3339_s15 }
 0x433   : > { %3205 = vset.pattern.permute.xlu1 %v5850_v8 }
 0x49d   : > { %v3845_v22 = vpop.permute.xlu1 %1217 }
 0x49e   : > { %5852 = vst [vmem:[#allocation32_spill] sm:$0xff] %v3845_v22  ;;  %v775_v22 = vmul.f32 %v3675_v23, %v3563_v46 }
 0x4ae   : > { %v1231_v12 = vpop.permute.xlu1 %1230 }
 0x4af   : > { %v1234_v21 = vmul.f32 %v1231_v12, %v3605_v11  ;;  %v1233_v62 = vmul.f32 %v1231_v12, %v3651_v55  ;;  %v1235_v38 = vmul.f32 %v1231_v12, %v3662_v63  ;;  %v3863_v63 = vpop.permute.xlu0 %424 }
 0x4b0   : > { %5854 = vst [vmem:[#allocation34_spill] sm:$0xff] %v3863_v63 }
 0x4b1   : > { %1241 = vrot.lane.b32.xlu1 %v1234_v21, %s3339_s15  ;;  %1239 = vrot.lane.b32.xlu0 %v1233_v62, %s3339_s15 }
 0x4b3   : > { %v3865_v21 = vpop.permute.xlu0 %428 }
 0x4b4   : > { %5855 = vst [vmem:[#allocation35_spill] sm:$0xff] %v3865_v21 }
 0x4b5   : > { %1254 = vperm.xlu1 %3205, %v3107_v34   ;;  %1243 = vrot.lane.b32.xlu0 %v1235_v38, %s3339_s15 }
 0x4b7   : > { %v3867_v45 = vpop.permute.xlu0 %449 }
 0x4b8   : > { %5856 = vst [vmem:[#allocation36_spill] sm:$0xff] %v3867_v45 }
 0x4b9   : > { %3206 = vset.pattern.permute.xlu1 %v5847_v31 }
 0x523   : > { %v3854_v49 = vpop.permute.xlu1 %1241 }
 0x524   : > { %5853 = vst [vmem:[#allocation33_spill] sm:$0xff] %v3854_v49 }
 0x534   : > { %v1255_v60 = vpop.permute.xlu1 %1254 }
 0x535   : > { %v1258_v51 = vmul.f32 %v1255_v60, %v3625_v33  ;;  %v1257_v11 = vmul.f32 %v1255_v60, %v3671_v15  ;;  %v1259_v55 = vmul.f32 %v1255_v60, %v3679_v30  ;;  %v3869_v33 = vpop.permute.xlu0 %453 }
 0x536   : > { %5857 = vst [vmem:[#allocation37_spill] sm:$0xff] %v3869_v33 }
 0x537   : > { %1265 = vrot.lane.b32.xlu1 %v1258_v51, %s3339_s15  ;;  %1263 = vrot.lane.b32.xlu0 %v1257_v11, %s3339_s15 }
 0x539   : > { %v3871_v15 = vpop.permute.xlu0 %473 }
 0x53a   : > { %5858 = vst [vmem:[#allocation38_spill] sm:$0xff] %v3871_v15 }
 0x53b   : > { %1278 = vperm.xlu1 %3206, %v3107_v34   ;;  %1267 = vrot.lane.b32.xlu0 %v1259_v55, %s3339_s15 }
 0x53d   : > { %v3873_v29 = vpop.permute.xlu0 %477 }
 0x53e   : > { %5859 = vst [vmem:[#allocation39_spill] sm:$0xff] %v3873_v29 }
 0x53f   : > { %3208 = vset.pattern.permute.xlu1 %v5848_v13 }
 0x541   : > { %v3875_v12 = vpop.permute.xlu0 %497 }
 0x542   : > { %5860 = vst [vmem:[#allocation40_spill] sm:$0xff] %v3875_v12 }
 0x545   : > { %v3877_v30 = vpop.permute.xlu0 %501 }
 0x546   : > { %5861 = vst [vmem:[#allocation41_spill] sm:$0xff] %v3877_v30 }
 0x549   : > { %v3879_v34 = vpop.permute.xlu0 %555 }
 0x54a   : > { %5862 = vst [vmem:[#allocation42_spill] sm:$0xff] %v3879_v34  ;;  %v3099_v34 = vld [vmem:[%s5653_s5 + $0x1] ss:$2 sm:$0x3] }
 0x54d   : > { %v3881_v62 = vpop.permute.xlu0 %559 }
 0x54e   : > { %5863 = vst [vmem:[#allocation43_spill] sm:$0xff] %v3881_v62 }
 0x551   : > { %v3883_v38 = vpop.permute.xlu0 %607 }
 0x552   : > { %5864 = vst [vmem:[#allocation44_spill] sm:$0xff] %v3883_v38 }
 0x555   : > { %v3885_v60 = vpop.permute.xlu0 %611 }
 0x556   : > { %5865 = vst [vmem:[#allocation45_spill] sm:$0xff] %v3885_v60 }
 0x559   : > { %v3887_v51 = vpop.permute.xlu0 %658 }
 0x55a   : > { %5866 = vst [vmem:[#allocation46_spill] sm:$0xff] %v3887_v51 }
 0x55d   : > { %v3889_v11 = vpop.permute.xlu0 %662 }
 0x55e   : > { %5867 = vst [vmem:[#allocation47_spill] sm:$0xff] %v3889_v11  ;;  %v1305_v11 = vrot.slane %v3099_v34, %v3494_v17 }
 0x561   : > { %v3891_v55 = vpop.permute.xlu0 %709 }
 0x562   : > { %5868 = vst [vmem:[#allocation48_spill] sm:$0xff] %v3891_v55 }
 0x565   : > { %v3895_v29 = vpop.permute.xlu0 %713 }
 0x566   : > { %5870 = vst [vmem:[#allocation50_spill] sm:$0xff] %v3895_v29  ;;  %v1309_v29 = vrot.slane %v3099_v34, %v3447_v5  ;;  %v5693_v34 = vmov 5  }
 0x569   : > { %v3905_v60 = vpop.permute.xlu0 %823 }
 0x5a9   : > { %v3893_v15 = vpop.permute.xlu1 %1265 }
 0x5aa   : > { %5869 = vst [vmem:[#allocation49_spill] sm:$0xff] %v3893_v15 }
 0x5ba   : > { %v1279_v12 = vpop.permute.xlu1 %1278 }
 0x5bb   : > { %v1282_v62 = vmul.f32 %v1279_v12, %v3638_v44  ;;  %v1281_v38 = vmul.f32 %v1279_v12, %v3688_v42  ;;  %v1283_v55 = vmul.f32 %v1279_v12, %v3696_v54  ;;  %v3913_v44 = vld [vmem:[%s5651_s3] sm:$0xff]  ;;  %v3915_v42 = vpop.permute.xlu0 %858 }
 0x5bc   : > { %5871 = vst [vmem:[#allocation51_spill] sm:$0xff] %v3913_v44  ;;  %v1340_v54 = vld [vmem:[%s5650_s2] sm:$0xff] }
 0x5bd   : > { %1289 = vrot.lane.b32.xlu1 %v1282_v62, %s3339_s15  ;;  %1287 = vrot.lane.b32.xlu0 %v1281_v38, %s3339_s15  ;;  %v5691_v38 = vmov 6  }
 0x5bf   : > { %v3922_v12 = vpop.permute.xlu0 %960 }
 0x5c1   : > { %1291 = vrot.lane.b32.xlu0 %v1283_v55, %s3339_s15  ;;  %1310 = vrot.lane.b32.xlu1 %v1305_v11, %s3340_s9 }
 0x5c5   : > { %1312 = vrot.lane.b32.xlu0 %v1309_v29, %s3340_s9  ;;  %1378 = vperm.xlu1 %3208, %v3913_v44   ;;  %v3929_v29 = vpop.permute.xlu0 %980 }
 0x5c9   : > { %1343 = vperm.xlu0 %3194, %v1340_v54   ;;  %3209 = vset.pattern.permute.xlu1 %v5850_v8  ;;  %v3934_v62 = vpop.permute.xlu0 %984 }
 0x5ca   : > { %1422 = vperm.xlu1 %3209, %v3913_v44  }
 0x5cd   : > { %3207 = vset.pattern.permute.xlu0 %v5849_v24 }
 0x5ce   : > { %301 = vperm.xlu0 %3207, %v3435_v0   ;;  %3210 = vset.pattern.permute.xlu1 %v5847_v31  ;;  %v3940_v0 = vld [vmem:[%s5651_s3 + $0x18] sm:$0xff] }
 0x5cf   : > { %1444 = vperm.xlu1 %3210, %v3913_v44   ;;  %5872 = vst [vmem:[#allocation52_spill] sm:$0xff] %v3940_v0 }
 0x5d2   : > { %761 = vperm.xlu0 %3207, %v3473_v14   ;;  %v3944_v14 = vpop.permute.xlu0 %1004 }
 0x5d3   : > { %3211 = vset.pattern.permute.xlu1 %v5693_v34 }
 0x5d4   : > { %1488 = vperm.xlu1 %3211, %v3913_v44  }
 0x5d6   : > { %1400 = vperm.xlu0 %3207, %v3913_v44   ;;  %v3951_v11 = vpop.permute.xlu0 %1008 }
 0x5d8   : > { %3212 = vset.pattern.permute.xlu1 %v5691_v38 }
 0x5d9   : > { %1510 = vperm.xlu1 %3212, %v3913_v44  }
 0x5da   : > { %1581 = vperm.xlu0 %3207, %v3940_v0   ;;  %v3954_v55 = vpop.permute.xlu0 %1028 }
 0x5dd   : > { %3213 = vset.pattern.permute.xlu1 %v5848_v13 }
 0x5de   : > { %3214 = vset.pattern.permute.xlu0 %v5850_v8  ;;  %1557 = vperm.xlu1 %3213, %v3940_v0   ;;  %v3956_v54 = vpop.permute.xlu0 %1032 }
 0x5df   : > { %1084 = vperm.xlu0 %3214, %v3780_v6   ;;  %5873 = vst [vmem:[#allocation53_spill] sm:$0xff] %v3956_v54 }
 0x5e2   : > { %3215 = vset.pattern.permute.xlu1 %v5850_v8  ;;  %v3958_v38 = vpop.permute.xlu0 %1064 }
 0x5e6   : > { %v3960_v34 = vpop.permute.xlu0 %1116 }
 0x5ea   : > { %v3962_v44 = vpop.permute.xlu0 %1120 }
 0x5ee   : > { %v3964_v51 = vpop.permute.xlu0 %1140 }
 0x5f2   : > { %v3966_v30 = vpop.permute.xlu0 %1144 }
 0x5f6   : > { %v3968_v33 = vpop.permute.xlu0 %1164 }
 0x5fa   : > { %v3970_v6 = vpop.permute.xlu0 %1168 }
 0x5fe   : > { %v3972_v45 = vpop.permute.xlu0 %1188 }
 0x5ff   : > { %5874 = vst [vmem:[#allocation54_spill] sm:$0xff] %v3972_v45  ;;  %v825_v45 = vsel %vm430_vm0, %v3753_v50, %v3905_v60 }
 0x602   : > { %v3974_v21 = vpop.permute.xlu0 %1192 }
 0x603   : > { %5875 = vst [vmem:[#allocation55_spill] sm:$0xff] %v3974_v21 }
 0x606   : > { %v3976_v63 = vpop.permute.xlu0 %1215 }
 0x607   : > { %5876 = vst [vmem:[#allocation56_spill] sm:$0xff] %v3976_v63 }
 0x60a   : > { %v3978_v25 = vpop.permute.xlu0 %1219 }
 0x60b   : > { %5877 = vst [vmem:[#allocation57_spill] sm:$0xff] %v3978_v25 }
 0x60e   : > { %v3980_v20 = vpop.permute.xlu0 %1239 }
 0x60f   : > { %5878 = vst [vmem:[#allocation58_spill] sm:$0xff] %v3980_v20 }
 0x612   : > { %v3982_v61 = vpop.permute.xlu0 %1243 }
 0x613   : > { %5879 = vst [vmem:[#allocation59_spill] sm:$0xff] %v3982_v61 }
 0x616   : > { %v3984_v8 = vpop.permute.xlu0 %1263 }
 0x617   : > { %5880 = vst [vmem:[#allocation60_spill] sm:$0xff] %v3984_v8 }
 0x61a   : > { %v3986_v24 = vpop.permute.xlu0 %1267 }
 0x61b   : > { %5881 = vst [vmem:[#allocation61_spill] sm:$0xff] %v3986_v24 }
 0x62f   : > { %v3988_v13 = vpop.permute.xlu0 %1287  ;;  %v3990_v31 = vpop.permute.xlu1 %1289 }
 0x630   : > { %5882 = vst [vmem:[#allocation62_spill] sm:$0xff] %v3988_v13  ;;  %5883 = vst [vmem:[#allocation63_spill] sm:$0xff] %v3990_v31  ;;  %v754_v13 = vmul.f32 %v3666_v7, %v3527_v28  ;;  %v785_v31 = vmul.f32 %v3683_v36, %v3581_v56 }
 0x633   : > { %v3992_v0 = vpop.permute.xlu0 %1291  ;;  %v3994_v5 = vpop.permute.xlu1 %1310 }
 0x634   : > { %5884 = vst [vmem:[#allocation64_spill] sm:$0xff] %v3992_v0  ;;  %5885 = vst [vmem:[#allocation65_spill] sm:$0xff] %v3994_v5  ;;  %v755_v5 = vmul.f32 %v3666_v7, %v3524_v27 }
 0x637   : > { %v3996_v15 = vpop.permute.xlu0 %1312 }
 0x638   : > { %5886 = vst [vmem:[#allocation66_spill] sm:$0xff] %v3996_v15  ;;  %v784_v15 = vmul.f32 %v3683_v36, %v3610_v18 }
 0x644   : > { %v3998_v49 = vpop.permute.xlu1 %1378 }
 0x645   : > { %5887 = vst [vmem:[#allocation67_spill] sm:$0xff] %v3998_v49  ;;  %v756_v49 = vmul.f32 %v3666_v7, %v3538_v35  ;;  %v776_v7 = vmul.f32 %v3675_v23, %v3598_v2 }
 0x648   : > { %v4000_v25 = vpop.permute.xlu0 %1343 }
 0x649   : > { %5888 = vst [vmem:[#allocation68_spill] sm:$0xff] %v4000_v25  ;;  %v4002_v20 = vpop.permute.xlu1 %1422 }
 0x64a   : > { %5889 = vst [vmem:[#allocation69_spill] sm:$0xff] %v4002_v20 }
 0x64d   : > { %v4004_v61 = vpop.permute.xlu0 %301 }
 0x64e   : > { %5890 = vst [vmem:[#allocation70_spill] sm:$0xff] %v4004_v61  ;;  %v4006_v8 = vpop.permute.xlu1 %1444 }
 0x64f   : > { %5891 = vst [vmem:[#allocation71_spill] sm:$0xff] %v4006_v8  ;;  %v774_v8 = vmul.f32 %v3675_v23, %v3586_v58  ;;  %v936_v23 = vsel %vm430_vm0, %v3761_v40, %v3763_v52 }
 0x651   : > { %v762_v24 = vpop.permute.xlu0 %761 }
 0x652   : > { %v764_v0 = vmul.f32 %v762_v24, %v3549_v41  ;;  %v765_v25 = vmul.f32 %v762_v24, %v3542_v37  ;;  %v766_v20 = vmul.f32 %v762_v24, %v3567_v48 }
 0x653   : > { %v4017_v61 = vpop.permute.xlu1 %1488 }
 0x654   : > { %5892 = vst [vmem:[#allocation72_spill] sm:$0xff] %v4017_v61  ;;  %v767_v63 = vadd.f32 %v764_v0, %v754_v13  ;;  %v768_v54 = vadd.f32 %v765_v25, %v755_v5  ;;  %v769_v24 = vadd.f32 %v766_v20, %v756_v49  ;;  %v786_v61 = vmul.f32 %v3683_v36, %v3621_v32 }
 0x655   : > { %v4029_v21 = vpop.permute.xlu0 %1400  ;;  %v899_v13 = vsel %vm430_vm0, %v3757_v9, %v3759_v57  ;;  %v862_v5 = vsel %vm430_vm0, %v3915_v42, %v3755_v16  ;;  %v962_v36 = vsel %vm561_vm1, %v3765_v26, %v3767_v3  ;;  %v1067_v0 = vmul.f32 %v3958_v38, %v3527_v28 }
 0x656   : > { %5893 = vst [vmem:[#allocation73_spill] sm:$0xff] %v4029_v21  ;;  %v777_v59 = vadd.f32 %v774_v8, %v767_v63  ;;  %v778_v20 = vadd.f32 %v775_v22, %v768_v54  ;;  %v779_v25 = vadd.f32 %v776_v7, %v769_v24  ;;  %v963_v8 = vsel %vm561_vm1, %v3767_v3, %v3922_v12 }
 0x657   : > { %v986_v22 = vsel %vm561_vm1, %v3929_v29, %v3769_v10  ;;  %v987_v21 = vsel %vm561_vm1, %v3769_v10, %v3934_v62  ;;  %v1068_v3 = vmul.f32 %v3958_v38, %v3524_v27  ;;  %v1010_v12 = vsel %vm561_vm1, %v3944_v14, %v3771_v4 }
 0x658   : > { %v787_v49 = vadd.f32 %v784_v15, %v777_v59  ;;  %v4051_v63 = vpop.permute.xlu1 %1510  ;;  %v788_v54 = vadd.f32 %v785_v31, %v778_v20  ;;  %v789_v7 = vadd.f32 %v786_v61, %v779_v25  ;;  %v1069_v59 = vmul.f32 %v3958_v38, %v3538_v35 }
 0x659   : > { %5894 = vst [vmem:[#allocation74_spill] sm:$0xff] %v4051_v63  ;;  %v4058_v24 = vpop.permute.xlu0 %1581  ;;  %v1077_v31 = vmul.f32 %v3795_v19, %v3549_v41  ;;  %v1078_v10 = vmul.f32 %v3795_v19, %v3542_v37  ;;  %v1079_v62 = vmul.f32 %v3795_v19, %v3567_v48  ;;  %v5895_v38 = vmov 0.0  }
 0x65a   : > { %v829_v15 = vadd.f32 %v3753_v50, %v787_v49  ;;  %v830_v61 = vadd.f32 %v825_v45, %v788_v54  ;;  %v831_v20 = vadd.f32 %v3905_v60, %v789_v7  ;;  %v4080_v25 = vrot.slane %v5895_v38, %v3494_v17 }
 0x65b   : > { %v1080_v49 = vadd.f32 %v1077_v31, %v1067_v0  ;;  %v1097_v63 = vmul.f32 %v3797_v43, %v3610_v18  ;;  %v1081_v54 = vadd.f32 %v1078_v10, %v1068_v3  ;;  %v1082_v7 = vadd.f32 %v1079_v62, %v1069_v59 }
 0x65c   : > { %v866_v50 = vadd.f32 %v3915_v42, %v829_v15  ;;  %v867_v35 = vadd.f32 %v862_v5, %v830_v61  ;;  %v868_v45 = vadd.f32 %v3755_v16, %v831_v20  ;;  %v1098_v16 = vmul.f32 %v3797_v43, %v3581_v56 }
 0x65d   : > { %v4086_v60 = vpop.permute.xlu1 %1557  ;;  %v1099_v5 = vmul.f32 %v3797_v43, %v3621_v32 }
 0x65e   : > { %v1085_v27 = vpop.permute.xlu0 %1084  ;;  %v1560_v19 = vmul.f32 %v4086_v60, %v4080_v25  ;;  %v903_v17 = vadd.f32 %v3757_v9, %v866_v50  ;;  %v904_v15 = vadd.f32 %v899_v13, %v867_v35  ;;  %v905_v59 = vadd.f32 %v3759_v57, %v868_v45 }
 0x65f   : > { %v1087_v48 = vmul.f32 %v1085_v27, %v3586_v58  ;;  %v1088_v42 = vmul.f32 %v1085_v27, %v3563_v46  ;;  %v1089_v0 = vmul.f32 %v1085_v27, %v3598_v2  ;;  %v1011_v27 = vsel %vm561_vm1, %v3771_v4, %v3951_v11 }
 0x660   : > { %1566 = vrot.lane.b32.xlu1 %v1560_v19, %s3338_s14  ;;  %v940_v3 = vadd.f32 %v3761_v40, %v903_v17  ;;  %v941_v20 = vadd.f32 %v936_v23, %v904_v15  ;;  %v1034_v35 = vsel %vm561_vm1, %v3954_v55, %v3793_v1  ;;  %v942_v13 = vadd.f32 %v3763_v52, %v905_v59  ;;  %v5897_v19 = vld [vmem:[#allocation54_spill] sm:$0xff]  ;;  %v5902_v59 = vld [vmem:[#allocation57_spill] sm:$0xff] }
 0x661   : > { %v1090_v9 = vadd.f32 %v1087_v48, %v1080_v49  ;;  %v1091_v31 = vadd.f32 %v1088_v42, %v1081_v54  ;;  %v1092_v61 = vadd.f32 %v1089_v0, %v1082_v7  ;;  %v1122_v48 = vsel %vm430_vm0, %v3960_v34, %v3806_v47  ;;  %v5898_v42 = vld [vmem:[#allocation55_spill] sm:$0xff] }
 0x662   : > { %v967_v43 = vadd.f32 %v3765_v26, %v940_v3  ;;  %v968_v57 = vadd.f32 %v962_v36, %v941_v20  ;;  %v1123_v4 = vsel %vm430_vm0, %v3806_v47, %v3962_v44  ;;  %v969_v23 = vadd.f32 %v963_v8, %v942_v13  ;;  %v5905_v13 = vld [vmem:[#allocation59_spill] sm:$0xff] }
 0x663   : > { %v1100_v10 = vadd.f32 %v1097_v63, %v1090_v9  ;;  %v1101_v17 = vadd.f32 %v1098_v16, %v1091_v31  ;;  %v1102_v40 = vadd.f32 %v1099_v5, %v1092_v61  ;;  %v1146_v36 = vsel %vm430_vm0, %v3964_v51, %v3815_v53  ;;  %v5900_v16 = vld [vmem:[#allocation32_spill] sm:$0xff] }
 0x664   : > { %v991_v11 = vadd.f32 %v3929_v29, %v967_v43  ;;  %v992_v52 = vadd.f32 %v986_v22, %v968_v57  ;;  %v1147_v63 = vsel %vm430_vm0, %v3815_v53, %v3966_v30  ;;  %v993_v45 = vadd.f32 %v987_v21, %v969_v23  ;;  %v5901_v5 = vld [vmem:[#allocation56_spill] sm:$0xff]  ;;  %v5908_v23 = vld [vmem:[#allocation61_spill] sm:$0xff] }
 0x665   : > { %v1127_v62 = vadd.f32 %v3960_v34, %v1100_v10  ;;  %v1128_v26 = vadd.f32 %v1122_v48, %v1101_v17  ;;  %v1129_v50 = vadd.f32 %v1123_v4, %v1102_v40  ;;  %v1170_v34 = vsel %vm430_vm0, %v3968_v33, %v3824_v39  ;;  %v5906_v48 = vld [vmem:[#allocation49_spill] sm:$0xff]  ;;  %v5907_v4 = vld [vmem:[#allocation60_spill] sm:$0xff] }
 0x666   : > { %v1015_v49 = vadd.f32 %v3944_v14, %v991_v11  ;;  %v1016_v8 = vadd.f32 %v1010_v12, %v992_v52  ;;  %v1171_v22 = vsel %vm430_vm0, %v3824_v39, %v3970_v6  ;;  %v1017_v7 = vadd.f32 %v1011_v27, %v993_v45  ;;  %v5899_v39 = vld [vmem:[#allocation53_spill] sm:$0xff] }
 0x667   : > { %v1151_v47 = vadd.f32 %v3964_v51, %v1127_v62  ;;  %v1152_v44 = vadd.f32 %v1146_v36, %v1128_v26  ;;  %v1153_v29 = vadd.f32 %v1147_v63, %v1129_v50  ;;  %v5896_v51 = vld [vmem:[#allocation31_spill] sm:$0xff]  ;;  %v1221_v3 = vsel %vm561_vm1, %v5901_v5, %v5900_v16  ;;  %v5910_v63 = vld [vmem:[#allocation62_spill] sm:$0xff] }
 0x668   : > { %v1039_v54 = vadd.f32 %v3954_v55, %v1015_v49  ;;  %v1040_v14 = vadd.f32 %v1034_v35, %v1016_v8  ;;  %v1194_v12 = vsel %vm430_vm0, %v5897_v19, %v5896_v51  ;;  %v1195_v0 = vsel %vm430_vm0, %v5896_v51, %v5898_v42  ;;  %v5904_v35 = vld [vmem:[#allocation58_spill] sm:$0xff]  ;;  %v5909_v36 = vld [vmem:[#allocation63_spill] sm:$0xff] }
 0x669   : > { %v1175_v53 = vadd.f32 %v3968_v33, %v1151_v47  ;;  %v1176_v30 = vadd.f32 %v1170_v34, %v1152_v44  ;;  %v1177_v21 = vadd.f32 %v1171_v22, %v1153_v29  ;;  %v1035_v55 = vsel %vm561_vm1, %v3793_v1, %v5899_v39  ;;  %v5903_v1 = vld [vmem:[#allocation33_spill] sm:$0xff]  ;;  %v5911_v44 = vld [vmem:[#allocation64_spill] sm:$0xff]  ;;  %v5912_v8 = vld [vmem:[#allocation66_spill] sm:$0xff] }
 0x66a   : > { %1045 = vrot.lane.b32.xlu1 %v1039_v54, %s3343_s18  ;;  %1047 = vrot.lane.b32.xlu0 %v1040_v14, %s3343_s18  ;;  %v1222_v9 = vsel %vm561_vm1, %v5900_v16, %v5902_v59  ;;  %v1041_v31 = vadd.f32 %v1035_v55, %v1017_v7  ;;  %v1245_v43 = vsel %vm561_vm1, %v5904_v35, %v5903_v1  ;;  %v5913_v34 = vld [vmem:[#allocation65_spill] sm:$0xff]  ;;  %v5739_v42 = vmov 4   ;;  %v5924_v59 = vld [vmem:[#allocation22_spill] sm:$0xff] }
 0x66b   : > { %v1200_v33 = vadd.f32 %v1194_v12, %v1176_v30  ;;  %v1199_v6 = vadd.f32 %v5897_v19, %v1175_v53  ;;  %v1201_v15 = vadd.f32 %v1195_v0, %v1177_v21  ;;  %v1246_v10 = vsel %vm561_vm1, %v5903_v1, %v5905_v13  ;;  %v5915_v21 = vld [vmem:[#allocation7_spill] sm:$0xff]  ;;  %v5916_v19 = vld [vmem:[#allocation52_spill] sm:$0xff]  ;;  %v5926_v1 = vld [vmem:[#allocation13_spill] sm:$0xff] }
 0x66c   : > { %v1269_v11 = vsel %vm561_vm1, %v5907_v4, %v5906_v48  ;;  %v1270_v62 = vsel %vm561_vm1, %v5906_v48, %v5908_v23  ;;  %v1293_v49 = vsel %vm561_vm1, %v5910_v63, %v5909_v36  ;;  %v1294_v29 = vsel %vm561_vm1, %v5909_v36, %v5911_v44  ;;  %v5927_v13 = vld [vmem:[#allocation12_spill] sm:$0xff]  ;;  %v5929_v48 = vld [vmem:[#allocation34_spill] sm:$0xff]  ;;  %v5933_v36 = vld [vmem:[#allocation37_spill] sm:$0xff] }
 0x66d   : > { %v1227_v61 = vadd.f32 %v1221_v3, %v1200_v33  ;;  %v1226_v20 = vadd.f32 %v5901_v5, %v1199_v6  ;;  %v1228_v27 = vadd.f32 %v1222_v9, %v1201_v15  ;;  %v4176_v22 = vsel %vm1314_vm2, %v5913_v34, %v5912_v8  ;;  %v3109_v33 = vld [vmem:[%s5651_s3 + $0x30] sm:$0xff]  ;;  %v5923_v5 = vld [vmem:[#allocation70_spill] sm:$0xff] }
 0x66e   : > { %1049 = vrot.lane.b32.xlu1 %v1041_v31, %s3343_s18  ;;  %5914 = vst [vmem:[#allocation31_spill] sm:$0xff] %v4176_v22  ;;  %v4185_v14 = vrot.slane %v5895_v38, %v5915_v21  ;;  %v5917_v12 = vmov 3   ;;  %v5918_v0 = vmov 5   ;;  %v5919_v39 = vmov 6  }
 0x66f   : > { %v1251_v17 = vadd.f32 %v1245_v43, %v1227_v61  ;;  %v1250_v40 = vadd.f32 %v5904_v35, %v1226_v20  ;;  %v1252_v57 = vadd.f32 %v1246_v10, %v1228_v27  ;;  %v5737_v55 = vmov 7   ;;  %v5925_v20 = vld [vmem:[#allocation10_spill] sm:$0xff] }
 0x670   : > { %v1584_v51 = vmul.f32 %v4058_v24, %v4185_v14  ;;  %v5920_v6 = vmov 0   ;;  %v5921_v15 = vmov 1   ;;  %v5922_v16 = vmov 2  }
 0x671   : > { %v1275_v26 = vadd.f32 %v1269_v11, %v1251_v17  ;;  %v1274_v50 = vadd.f32 %v5907_v4, %v1250_v40  ;;  %v1276_v52 = vadd.f32 %v1270_v62, %v1252_v57  ;;  %v331_v3 = vmul.f32 %v3549_v41, %v5923_v5  ;;  %v4226_v41 = vld [vmem:[%s5651_s3 + $0x8] sm:$0xff]  ;;  %v5928_v57 = vld [vmem:[#allocation23_spill] sm:$0xff]  ;;  %v5931_v62 = vld [vmem:[#allocation24_spill] sm:$0xff] }
 0x672   : > { %v294_v9 = vmul.f32 %v3527_v28, %v5924_v59  ;;  %v332_v31 = vmul.f32 %v3542_v37, %v5923_v5  ;;  %v368_v27 = vmul.f32 %v3586_v58, %v5925_v20  ;;  %v295_v35 = vmul.f32 %v5926_v1, %v5924_v59 }
 0x673   : > { %v1299_v45 = vadd.f32 %v1293_v49, %v1275_v26  ;;  %v1298_v47 = vadd.f32 %v5910_v63, %v1274_v50  ;;  %v1300_v53 = vadd.f32 %v1294_v29, %v1276_v52  ;;  %v369_v37 = vmul.f32 %v3563_v46, %v5925_v20  ;;  %v5930_v46 = vld [vmem:[#allocation35_spill] sm:$0xff]  ;;  %v5932_v26 = vld [vmem:[#allocation36_spill] sm:$0xff]  ;;  %v5934_v49 = vld [vmem:[#allocation25_spill] sm:$0xff] }
 0x674   : > { %v334_v61 = vadd.f32 %v331_v3, %v294_v9  ;;  %v335_v43 = vadd.f32 %v332_v31, %v295_v35  ;;  %v405_v58 = vmul.f32 %v3610_v18, %v5927_v13  ;;  %v406_v40 = vmul.f32 %v3581_v56, %v5927_v13  ;;  %v5940_v9 = vld [vmem:[#allocation41_spill] sm:$0xff] }
 0x675   : > { %v1320_v54 = vmul.f32 %v4176_v22, %v1299_v45  ;;  %v1319_v7 = vmul.f32 %v5913_v34, %v1298_v47  ;;  %v1321_v30 = vmul.f32 %v5912_v8, %v1300_v53  ;;  %v431_v4 = vsel %vm430_vm0, %v5929_v48, %v5928_v57  ;;  %v5935_v45 = vld [vmem:[#allocation38_spill] sm:$0xff] }
 0x676   : > { %v371_v28 = vadd.f32 %v368_v27, %v334_v61  ;;  %v372_v10 = vadd.f32 %v369_v37, %v335_v43  ;;  %v432_v18 = vsel %vm430_vm0, %v5928_v57, %v5930_v46  ;;  %v455_v50 = vsel %vm430_vm0, %v5932_v26, %v5931_v62  ;;  %v5937_v53 = vld [vmem:[#allocation26_spill] sm:$0xff]  ;;  %v4273_v61 = vld [vmem:[%s5651_s3 + $0x20] sm:$0xff]  ;;  %v5944_v57 = vld [vmem:[#allocation28_spill] sm:$0xff] }
 0x677   : > { %1327 = vrot.lane.b32.xlu0 %v1320_v54, %s3344_s19  ;;  %1325 = vrot.lane.b32.xlu1 %v1319_v7, %s3344_s19  ;;  %v456_v63 = vsel %vm430_vm0, %v5931_v62, %v5933_v36  ;;  %v479_v47 = vsel %vm430_vm0, %v5935_v45, %v5934_v49  ;;  %v5936_v54 = vld [vmem:[#allocation39_spill] sm:$0xff]  ;;  %v504_v31 = vsel %vm430_vm0, %v5937_v53, %v5940_v9  ;;  %v5941_v27 = vld [vmem:[#allocation42_spill] sm:$0xff]  ;;  %v5946_v26 = vld [vmem:[#allocation29_spill] sm:$0xff] }
 0x678   : > { %v408_v17 = vadd.f32 %v405_v58, %v371_v28  ;;  %v409_v11 = vadd.f32 %v406_v40, %v372_v10  ;;  %v480_v7 = vsel %vm430_vm0, %v5934_v49, %v5936_v54  ;;  %v5942_v28 = vld [vmem:[#allocation27_spill] sm:$0xff]  ;;  %v4284_v58 = vld [vmem:[%s5651_s3 + $0x28] sm:$0xff]  ;;  %v5943_v10 = vld [vmem:[#allocation44_spill] sm:$0xff]  ;;  %v407_v34 = vmul.f32 %v3621_v32, %v5927_v13 }
 0x679   : > { %v562_v37 = vsel %vm561_vm1, %v5941_v27, %v5942_v28  ;;  %v613_v48 = vsel %vm561_vm1, %v5943_v10, %v5944_v57 }
 0x67a   : > { %v436_v23 = vadd.f32 %v431_v4, %v408_v17  ;;  %v437_v56 = vadd.f32 %v432_v18, %v409_v11  ;;  %v5945_v4 = vld [vmem:[#allocation46_spill] sm:$0xff] }
 0x67b   : > { %1329 = vrot.lane.b32.xlu1 %v1321_v30, %s3344_s19  ;;  %v5938_v30 = vld [vmem:[#allocation40_spill] sm:$0xff] }
 0x67c   : > { %v460_v52 = vadd.f32 %v455_v50, %v436_v23  ;;  %v461_v44 = vadd.f32 %v456_v63, %v437_v56  ;;  %v664_v50 = vsel %vm561_vm1, %v5945_v4, %v5946_v26  ;;  %v5947_v56 = vld [vmem:[#allocation48_spill] sm:$0xff] }
 0x67e   : > { %v484_v29 = vadd.f32 %v479_v47, %v460_v52  ;;  %v5948_v47 = vld [vmem:[#allocation30_spill] sm:$0xff] }
 0x67f   : > { %1590 = vrot.lane.b32.xlu1 %v1584_v51, %s3338_s14  ;;  %v503_v51 = vsel %vm430_vm0, %v5938_v30, %v5937_v53 }
 0x680   : > { %v508_v3 = vadd.f32 %v503_v51, %v484_v29 }
 0x682   : > { %v567_v1 = vadd.f32 %v5941_v27, %v508_v3 }
 0x683   : > { %1605 = vperm.xlu1 %3215, %v5916_v19  }
 0x684   : > { %v618_v17 = vadd.f32 %v5943_v10, %v567_v1 }
 0x686   : > { %v669_v11 = vadd.f32 %v5945_v4, %v618_v17  ;;  %v5952_v17 = vld [vmem:[#allocation68_spill] sm:$0xff] }
 0x687   : > { %3216 = vset.pattern.permute.xlu1 %v5917_v12 }
 0x688   : > { %1629 = vperm.xlu1 %3216, %v5916_v19   ;;  %v720_v52 = vadd.f32 %v5947_v56, %v669_v11 }
 0x68c   : > { %3217 = vset.pattern.permute.xlu1 %v5739_v42 }
 0x68d   : > { %1653 = vperm.xlu1 %3217, %v5916_v19  }
 0x691   : > { %3218 = vset.pattern.permute.xlu1 %v5918_v0 }
 0x692   : > { %1677 = vperm.xlu1 %3218, %v5916_v19  }
 0x696   : > { %3219 = vset.pattern.permute.xlu1 %v5919_v39 }
 0x697   : > { %1701 = vperm.xlu1 %3219, %v5916_v19  }
 0x69b   : > { %3220 = vset.pattern.permute.xlu1 %v5737_v55 }
 0x69c   : > { %1725 = vperm.xlu1 %3220, %v5916_v19   ;;  %v485_v19 = vadd.f32 %v480_v7, %v461_v44  ;;  %v715_v44 = vsel %vm561_vm1, %v5947_v56, %v5948_v47  ;;  %v5949_v7 = vld [vmem:[#allocation20_spill] sm:$0xff] }
 0x69d   : > { %v741_v53 = vmul.f32 %v5949_v7, %v720_v52 }
 0x69e   : > { %v509_v35 = vadd.f32 %v504_v31, %v485_v19  ;;  %v5950_v31 = vld [vmem:[#allocation21_spill] sm:$0xff] }
 0x69f   : > { %v4312_v27 = vsel %vm736_vm5, %v5949_v7, %v5950_v31 }
 0x6a0   : > { %3221 = vset.pattern.permute.xlu1 %v5920_v6  ;;  %v568_v40 = vadd.f32 %v562_v37, %v509_v35  ;;  %5951 = vst [vmem:[#allocation55_spill] sm:$0xff] %v4312_v27 }
 0x6a1   : > { %1755 = vperm.xlu1 %3221, %v3109_v33  }
 0x6a2   : > { %v619_v23 = vadd.f32 %v613_v48, %v568_v40 }
 0x6a4   : > { %v670_v63 = vadd.f32 %v664_v50, %v619_v23  ;;  %v5954_v50 = vld [vmem:[#allocation17_spill] sm:$0xff] }
 0x6a5   : > { %3222 = vset.pattern.permute.xlu1 %v5921_v15  ;;  %v4331_v56 = vrot.slane %v5895_v38, %v5954_v50 }
 0x6a6   : > { %1791 = vperm.xlu1 %3222, %v3109_v33   ;;  %v721_v30 = vadd.f32 %v715_v44, %v670_v63 }
 0x6a8   : > { %v742_v35 = vmul.f32 %v4312_v27, %v721_v30  ;;  %v5963_v27 = vld [vmem:[#allocation18_spill] sm:$0xff] }
 0x6a9   : > { %v333_v7 = vmul.f32 %v5963_v27, %v5923_v5 }
 0x6aa   : > { %3223 = vset.pattern.permute.xlu1 %v5922_v16 }
 0x6ab   : > { %1827 = vperm.xlu1 %3223, %v3109_v33  }
 0x6af   : > { %3224 = vset.pattern.permute.xlu1 %v5917_v12 }
 0x6b0   : > { %1863 = vperm.xlu1 %3224, %v3109_v33  }
 0x6b4   : > { %3225 = vset.pattern.permute.xlu1 %v5739_v42 }
 0x6b5   : > { %1899 = vperm.xlu1 %3225, %v3109_v33  }
 0x6b9   : > { %3226 = vset.pattern.permute.xlu1 %v5918_v0 }
 0x6ba   : > { %1935 = vperm.xlu1 %3226, %v3109_v33  }
 0x6be   : > { %3227 = vset.pattern.permute.xlu1 %v5919_v39 }
 0x6bf   : > { %1971 = vperm.xlu1 %3227, %v3109_v33  }
 0x6c3   : > { %3228 = vset.pattern.permute.xlu1 %v5737_v55 }
 0x6c4   : > { %2007 = vperm.xlu1 %3228, %v3109_v33  }
 0x6c8   : > { %3229 = vset.pattern.permute.xlu1 %v5920_v6 }
 0x6c9   : > { %2052 = vperm.xlu1 %3229, %v4226_v41  }
 0x6cd   : > { %3230 = vset.pattern.permute.xlu1 %v5922_v16 }
 0x6ce   : > { %2072 = vperm.xlu1 %3230, %v4226_v41  }
 0x6d2   : > { %3231 = vset.pattern.permute.xlu1 %v5739_v42  ;;  %v4263_v33 = vpop.permute.xlu1 %1566 }
 0x6d3   : > { %2092 = vperm.xlu1 %3231, %v4226_v41   ;;  %5939 = vst [vmem:[#allocation54_spill] sm:$0xff] %v4263_v33 }
 0x6d7   : > { %3232 = vset.pattern.permute.xlu1 %v5918_v0 }
 0x6d8   : > { %2102 = vperm.xlu1 %3232, %v4226_v41  }
 0x6dc   : > { %3233 = vset.pattern.permute.xlu1 %v5737_v55  ;;  %v1046_v43 = vpop.permute.xlu1 %1045  ;;  %v1048_v62 = vpop.permute.xlu0 %1047 }
 0x6dd   : > { %2122 = vperm.xlu1 %3233, %v4226_v41   ;;  %v1052_v29 = vsel %vm1051_vm3, %v1046_v43, %v1048_v62 }
 0x6de   : > { %v1057_v19 = vadd.f32 %v1052_v29, %v741_v53  ;;  %v5956_v53 = vld [vmem:[#allocation9_spill] sm:$0xff] }
 0x6df   : > { %v4349_v30 = vrot.slane %v5895_v38, %v5956_v53 }
 0x6e0   : > { %v4292_v18 = vpop.permute.xlu1 %1049 }
 0x6e1   : > { %3234 = vset.pattern.permute.xlu1 %v5920_v6  ;;  %v1053_v1 = vsel %vm1051_vm3, %v1048_v62, %v4292_v18 }
 0x6e2   : > { %2135 = vperm.xlu1 %3234, %v4273_v61   ;;  %v1058_v10 = vadd.f32 %v1053_v1, %v742_v35  ;;  %v5957_v1 = vld [vmem:[#allocation11_spill] sm:$0xff] }
 0x6e3   : > { %v4359_v35 = vrot.slane %v5895_v38, %v5957_v1 }
 0x6e5   : > { %5958 = vst [vmem:[#allocation32_spill] sm:$0xff] %v4359_v35 }
 0x6e6   : > { %2585 = vperm.xlu1 %3234, %v4284_v58  }
 0x6e9   : > { %v1326_v49 = vpop.permute.xlu1 %1325  ;;  %v1328_v45 = vpop.permute.xlu0 %1327 }
 0x6ea   : > { %3242 = vset.pattern.permute.xlu1 %v5922_v16  ;;  %v1332_v51 = vsel %vm1331_vm4, %v1326_v49, %v1328_v45  ;;  %v5955_v49 = vld [vmem:[#allocation19_spill] sm:$0xff] }
 0x6eb   : > { %2633 = vperm.xlu1 %3242, %v4284_v58   ;;  %v1337_v43 = vadd.f32 %v1332_v51, %v1057_v19 }
 0x6ed   : > { %v4308_v3 = vpop.permute.xlu1 %1329  ;;  %v1346_v40 = vadd.f32 %v5952_v17, %v1337_v43 }
 0x6ee   : > { %v1333_v37 = vsel %vm1331_vm4, %v1328_v45, %v4308_v3  ;;  %v4341_v45 = vrot.slane %v5895_v38, %v5955_v49 }
 0x6ef   : > { %3243 = vset.pattern.permute.xlu1 %v5917_v12  ;;  %v1338_v48 = vadd.f32 %v1333_v37, %v1058_v10  ;;  %v1349_v4 = vmax.f32 %v1346_v40, 0.0  ;;  %v5959_v10 = vld [vmem:[#allocation14_spill] sm:$0xff] }
 0x6f0   : > { %2657 = vperm.xlu1 %3243, %v4284_v58   ;;  %v4368_v40 = vrot.slane %v5895_v38, %v5959_v10 }
 0x6f1   : > { %v1347_v11 = vadd.f32 %v5952_v17, %v1338_v48  ;;  %v4325_v23 = vpop.permute.xlu1 %1590 }
 0x6f2   : > { %5953 = vst [vmem:[#allocation53_spill] sm:$0xff] %v4325_v23  ;;  %5960 = vst [vmem:[#allocation56_spill] sm:$0xff] %v4368_v40  ;;  %v5964_v23 = vld [vmem:[#allocation15_spill] sm:$0xff] }
 0x6f3   : > { %v1350_v62 = vmax.f32 %v1347_v11, 0.0  ;;  %v5961_v11 = vld [vmem:[#allocation16_spill] sm:$0xff]  ;;  %v296_v33 = vmul.f32 %v5964_v23, %v5924_v59 }
 0x6f4   : > { %3244 = vset.pattern.permute.xlu1 %v5918_v0 }
 0x6f5   : > { %2705 = vperm.xlu1 %3244, %v4284_v58  }
 0x6f9   : > { %3245 = vset.pattern.permute.xlu1 %v5919_v39 }
 0x6fa   : > { %2729 = vperm.xlu1 %3245, %v4284_v58  }
 0x6fe   : > { %1359 = vrot.lane.b32.xlu1 %v1349_v4, %s3347_s13 }
 0x6ff   : > { %3246 = vset.pattern.permute.xlu1 %v5920_v6 }
 0x702   : > { %v4333_v52 = vpop.permute.xlu1 %1605  ;;  %1361 = vrot.lane.b32.xlu1 %v1350_v62, %s3347_s13  ;;  %v4376_v62 = vrot.slane %v5895_v38, %v5961_v11 }
 0x703   : > { %v1608_v63 = vmul.f32 %v4333_v52, %v4331_v56 }
 0x704   : > { %5962 = vst [vmem:[#allocation57_spill] sm:$0xff] %v4376_v62 }
 0x705   : > { %1614 = vrot.lane.b32.xlu0 %v1608_v63, %s3338_s14 }
 0x707   : > { %v4343_v44 = vpop.permute.xlu1 %1629 }
 0x708   : > { %v1632_v29 = vmul.f32 %v4343_v44, %v4341_v45 }
 0x70a   : > { %1638 = vrot.lane.b32.xlu0 %v1632_v29, %s3338_s14 }
 0x70c   : > { %v4352_v51 = vpop.permute.xlu1 %1653 }
 0x70d   : > { %v1656_v19 = vmul.f32 %v4352_v51, %v4349_v30 }
 0x70f   : > { %1662 = vrot.lane.b32.xlu0 %v1656_v19, %s3338_s14 }
 0x711   : > { %v4361_v43 = vpop.permute.xlu1 %1677 }
 0x712   : > { %v1680_v37 = vmul.f32 %v4361_v43, %v4359_v35 }
 0x714   : > { %1686 = vrot.lane.b32.xlu0 %v1680_v37, %s3338_s14 }
 0x716   : > { %v4370_v48 = vpop.permute.xlu1 %1701 }
 0x717   : > { %v1704_v4 = vmul.f32 %v4370_v48, %v4368_v40 }
 0x719   : > { %1710 = vrot.lane.b32.xlu0 %v1704_v4, %s3338_s14 }
 0x71b   : > { %v4379_v63 = vpop.permute.xlu1 %1725 }
 0x71c   : > { %v1728_v29 = vmul.f32 %v4379_v63, %v4376_v62 }
 0x71e   : > { %1734 = vrot.lane.b32.xlu0 %v1728_v29, %s3338_s14 }
 0x720   : > { %v4384_v19 = vpop.permute.xlu1 %1755 }
 0x721   : > { %v1772_v37 = vmul.f32 %v4384_v19, %v4080_v25 }
 0x723   : > { %1780 = vrot.lane.b32.xlu0 %v1772_v37, %s3339_s15 }
 0x725   : > { %v4389_v55 = vpop.permute.xlu1 %1791 }
 0x726   : > { %v1808_v38 = vmul.f32 %v4389_v55, %v4185_v14 }
 0x728   : > { %1816 = vrot.lane.b32.xlu0 %v1808_v38, %s3339_s15  ;;  %v336_v38 = vadd.f32 %v333_v7, %v296_v33 }
 0x72a   : > { %v4394_v4 = vpop.permute.xlu1 %1827 }
 0x72b   : > { %v1844_v42 = vmul.f32 %v4394_v4, %v4331_v56 }
 0x72d   : > { %1852 = vrot.lane.b32.xlu0 %v1844_v42, %s3339_s15  ;;  %v370_v42 = vmul.f32 %v3598_v2, %v5925_v20 }
 0x72f   : > { %v4399_v29 = vpop.permute.xlu1 %1863  ;;  %v373_v5 = vadd.f32 %v370_v42, %v336_v38  ;;  %v5966_v38 = vld [vmem:[#allocation45_spill] sm:$0xff] }
 0x730   : > { %v1880_v37 = vmul.f32 %v4399_v29, %v4341_v45  ;;  %v614_v42 = vsel %vm561_vm1, %v5944_v57, %v5966_v38 }
 0x731   : > { %v410_v33 = vadd.f32 %v407_v34, %v373_v5  ;;  %v5967_v5 = vld [vmem:[#allocation47_spill] sm:$0xff] }
 0x732   : > { %1888 = vrot.lane.b32.xlu0 %v1880_v37, %s3339_s15 }
 0x733   : > { %v438_v2 = vadd.f32 %v5930_v46, %v410_v33  ;;  %v5965_v46 = vld [vmem:[#allocation43_spill] sm:$0xff] }
 0x734   : > { %v4408_v8 = vpop.permute.xlu1 %1899  ;;  %v563_v37 = vsel %vm561_vm1, %v5942_v28, %v5965_v46  ;;  %v5970_v28 = vld [vmem:[#allocation50_spill] sm:$0xff] }
 0x735   : > { %v1916_v22 = vmul.f32 %v4408_v8, %v4349_v30  ;;  %v462_v20 = vadd.f32 %v5933_v36, %v438_v2  ;;  %v716_v2 = vsel %vm561_vm1, %v5948_v47, %v5970_v28 }
 0x737   : > { %1924 = vrot.lane.b32.xlu0 %v1916_v22, %s3339_s15  ;;  %v486_v34 = vadd.f32 %v5936_v54, %v462_v20 }
 0x739   : > { %v4415_v27 = vpop.permute.xlu1 %1935  ;;  %v510_v13 = vadd.f32 %v5940_v9, %v486_v34  ;;  %v665_v9 = vsel %vm561_vm1, %v5946_v26, %v5967_v5 }
 0x73a   : > { %v1952_v59 = vmul.f32 %v4415_v27, %v4359_v35 }
 0x73b   : > { %v569_v36 = vadd.f32 %v563_v37, %v510_v13  ;;  %v5971_v13 = vmov 7  }
 0x73c   : > { %1960 = vrot.lane.b32.xlu0 %v1952_v59, %s3339_s15  ;;  %v5968_v59 = vmov 4  }
 0x73d   : > { %v620_v54 = vadd.f32 %v614_v42, %v569_v36 }
 0x73e   : > { %v4422_v7 = vpop.permute.xlu1 %1971 }
 0x73f   : > { %v1988_v23 = vmul.f32 %v4422_v7, %v4368_v40  ;;  %v671_v33 = vadd.f32 %v665_v9, %v620_v54 }
 0x741   : > { %1996 = vrot.lane.b32.xlu0 %v1988_v23, %s3339_s15  ;;  %v5969_v23 = vld [vmem:[#allocation51_spill] sm:$0xff]  ;;  %v722_v20 = vadd.f32 %v716_v2, %v671_v33 }
 0x743   : > { %v4428_v22 = vpop.permute.xlu1 %2007  ;;  %v743_v57 = vmul.f32 %v5950_v31, %v722_v20 }
 0x744   : > { %v2024_v32 = vmul.f32 %v4428_v22, %v4376_v62 }
 0x745   : > { %v1059_v26 = vadd.f32 %v4292_v18, %v743_v57 }
 0x746   : > { %2032 = vrot.lane.b32.xlu0 %v2024_v32, %s3339_s15 }
 0x747   : > { %v1339_v32 = vadd.f32 %v4308_v3, %v1059_v26  ;;  %v4473_v3 = vld [vmem:[%s5651_s3 + $0x38] sm:$0xff] }
 0x748   : > { %v4494_v5 = vpop.permute.xlu1 %2052 }
 0x749   : > { %v1348_v34 = vadd.f32 %v5952_v17, %v1339_v32  ;;  %5980 = vst [vmem:[#allocation64_spill] sm:$0xff] %v4494_v5 }
 0x74a   : > { %2173 = vperm.xlu0 %3214, %v4273_v61  }
 0x74b   : > { %v1351_v47 = vmax.f32 %v1348_v34, 0.0 }
 0x74d   : > { %v4498_v33 = vpop.permute.xlu1 %2072 }
 0x74e   : > { %3235 = vset.pattern.permute.xlu0 %v5917_v12  ;;  %5982 = vst [vmem:[#allocation52_spill] sm:$0xff] %v4498_v33 }
 0x74f   : > { %2082 = vperm.xlu0 %3235, %v4226_v41  }
 0x753   : > { %2192 = vperm.xlu0 %3235, %v4273_v61  }
 0x757   : > { %3236 = vset.pattern.permute.xlu0 %v5968_v59 }
 0x758   : > { %1466 = vperm.xlu0 %3236, %v5969_v23  }
 0x75c   : > { %2211 = vperm.xlu0 %3236, %v4273_v61  }
 0x760   : > { %3237 = vset.pattern.permute.xlu0 %v5918_v0 }
 0x761   : > { %2230 = vperm.xlu0 %3237, %v4273_v61  }
 0x765   : > { %3238 = vset.pattern.permute.xlu0 %v5919_v39 }
 0x766   : > { %2112 = vperm.xlu0 %3238, %v4226_v41  }
 0x76a   : > { %2249 = vperm.xlu0 %3238, %v4273_v61  }
 0x76e   : > { %1363 = vrot.lane.b32.xlu0 %v1351_v47, %s3347_s13 }
 0x76f   : > { %3239 = vset.pattern.permute.xlu0 %v5971_v13 }
 0x772   : > { %1532 = vperm.xlu0 %3239, %v5969_v23   ;;  %v4502_v23 = vpop.permute.xlu1 %2092 }
 0x773   : > { %5984 = vst [vmem:[#allocation22_spill] sm:$0xff] %v4502_v23 }
 0x776   : > { %2268 = vperm.xlu0 %3239, %v4273_v61   ;;  %v4506_v28 = vpop.permute.xlu1 %2102 }
 0x777   : > { %v4468_v18 = vpop.permute.xlu0 %1614  ;;  %5986 = vst [vmem:[#allocation13_spill] sm:$0xff] %v4506_v28 }
 0x778   : > { %5972 = vst [vmem:[#allocation33_spill] sm:$0xff] %v4468_v18 }
 0x77a   : > { %3240 = vset.pattern.permute.xlu0 %v5920_v6  ;;  %v4510_v20 = vpop.permute.xlu1 %2122 }
 0x77b   : > { %2290 = vperm.xlu0 %3240, %v4473_v3   ;;  %5988 = vst [vmem:[#allocation23_spill] sm:$0xff] %v4510_v20  ;;  %v5996_v20 = vld [vmem:[#allocation8_spill] sm:$0xff] }
 0x77c   : > { %v4477_v17 = vpop.permute.xlu0 %1638 }
 0x77d   : > { %5973 = vst [vmem:[#allocation58_spill] sm:$0xff] %v4477_v17 }
 0x77e   : > { %v4514_v26 = vpop.permute.xlu1 %2135 }
 0x77f   : > { %3241 = vset.pattern.permute.xlu0 %v5921_v15 }
 0x780   : > { %2062 = vperm.xlu0 %3241, %v4226_v41  }
 0x781   : > { %v4481_v46 = vpop.permute.xlu0 %1662 }
 0x782   : > { %5974 = vst [vmem:[#allocation59_spill] sm:$0xff] %v4481_v46  ;;  %v4518_v34 = vpop.permute.xlu1 %2585 }
 0x784   : > { %2154 = vperm.xlu0 %3241, %v4273_v61  }
 0x786   : > { %v4484_v37 = vpop.permute.xlu0 %1686  ;;  %v4522_v31 = vpop.permute.xlu1 %2633 }
 0x787   : > { %5975 = vst [vmem:[#allocation49_spill] sm:$0xff] %v4484_v37 }
 0x78b   : > { %v4486_v36 = vpop.permute.xlu0 %1710 }
 0x78c   : > { %5976 = vst [vmem:[#allocation60_spill] sm:$0xff] %v4486_v36 }
 0x790   : > { %v4488_v38 = vpop.permute.xlu0 %1734 }
 0x791   : > { %5977 = vst [vmem:[#allocation61_spill] sm:$0xff] %v4488_v38  ;;  %v4528_v38 = vpop.permute.xlu1 %2657 }
 0x795   : > { %v4490_v42 = vpop.permute.xlu0 %1780 }
 0x796   : > { %5978 = vst [vmem:[#allocation63_spill] sm:$0xff] %v4490_v42 }
 0x79a   : > { %v4492_v54 = vpop.permute.xlu0 %1816 }
 0x79b   : > { %5979 = vst [vmem:[#allocation62_spill] sm:$0xff] %v4492_v54 }
 0x79f   : > { %v4496_v9 = vpop.permute.xlu0 %1852 }
 0x7a0   : > { %5981 = vst [vmem:[#allocation7_spill] sm:$0xff] %v4496_v9  ;;  %v4532_v9 = vpop.permute.xlu1 %2705 }
 0x7a1   : > { %5993 = vst [vmem:[#allocation37_spill] sm:$0xff] %v4532_v9 }
 0x7a4   : > { %v4500_v41 = vpop.permute.xlu0 %1888  ;;  %v4536_v36 = vpop.permute.xlu1 %2729 }
 0x7a5   : > { %5983 = vst [vmem:[#allocation70_spill] sm:$0xff] %v4500_v41  ;;  %5994 = vst [vmem:[#allocation25_spill] sm:$0xff] %v4536_v36 }
 0x7a8   : > { %v1360_v54 = vpop.permute.xlu1 %1359 }
 0x7a9   : > { %v4504_v61 = vpop.permute.xlu0 %1924 }
 0x7aa   : > { %5985 = vst [vmem:[#allocation10_spill] sm:$0xff] %v4504_v61 }
 0x7ac   : > { %v1362_v46 = vpop.permute.xlu1 %1361 }
 0x7ad   : > { %v1366_v18 = vsel %vm1365_vm6, %v1360_v54, %v1362_v46 }
 0x7ae   : > { %v4508_v2 = vpop.permute.xlu0 %1960  ;;  %v4550_v23 = vrot.slane %v1366_v18, %v5915_v21  ;;  %v4558_v33 = vrot.slane %v1366_v18, %v5954_v50  ;;  %v4576_v62 = vrot.slane %v1366_v18, %v5956_v53  ;;  %v4582_v40 = vrot.slane %v1366_v18, %v5996_v20 }
 0x7af   : > { %5987 = vst [vmem:[#allocation12_spill] sm:$0xff] %v4508_v2  ;;  %v4586_v35 = vrot.slane %v1366_v18, %v5957_v1 }
 0x7b0   : > { %5997 = vst [vmem:[#allocation39_spill] sm:$0xff] %v4550_v23  ;;  %5999 = vst [vmem:[#allocation40_spill] sm:$0xff] %v4558_v33  ;;  %v1609_v54 = vmul.f32 %v4333_v52, %v4558_v33 }
 0x7b1   : > { %6001 = vst [vmem:[#allocation42_spill] sm:$0xff] %v4576_v62  ;;  %6002 = vst [vmem:[#allocation27_spill] sm:$0xff] %v4582_v40 }
 0x7b2   : > { %6003 = vst [vmem:[#allocation44_spill] sm:$0xff] %v4586_v35 }
 0x7b3   : > { %v4512_v57 = vpop.permute.xlu0 %1996 }
 0x7b4   : > { %5989 = vst [vmem:[#allocation34_spill] sm:$0xff] %v4512_v57 }
 0x7b8   : > { %v4516_v32 = vpop.permute.xlu0 %2032 }
 0x7b9   : > { %5990 = vst [vmem:[#allocation35_spill] sm:$0xff] %v4516_v32 }
 0x7c9   : > { %v4520_v47 = vpop.permute.xlu0 %2173 }
 0x7ce   : > { %v4524_v41 = vpop.permute.xlu0 %2082 }
 0x7cf   : > { %5991 = vst [vmem:[#allocation24_spill] sm:$0xff] %v4524_v41 }
 0x7d2   : > { %v4526_v61 = vpop.permute.xlu0 %2192 }
 0x7d7   : > { %v4530_v2 = vpop.permute.xlu0 %1466 }
 0x7d8   : > { %5992 = vst [vmem:[#allocation36_spill] sm:$0xff] %v4530_v2 }
 0x7db   : > { %v4534_v57 = vpop.permute.xlu0 %2211 }
 0x7e0   : > { %v4538_v32 = vpop.permute.xlu0 %2230 }
 0x7e5   : > { %v4540_v37 = vpop.permute.xlu0 %2112 }
 0x7e6   : > { %5995 = vst [vmem:[#allocation38_spill] sm:$0xff] %v4540_v37 }
 0x7e9   : > { %v4542_v42 = vpop.permute.xlu0 %2249 }
 0x7ed   : > { %v1364_v17 = vpop.permute.xlu0 %1363 }
 0x7ee   : > { %v1367_v2 = vsel %vm1365_vm6, %v1362_v46, %v1364_v17  ;;  %v1585_v17 = vmul.f32 %v4058_v24, %v4550_v23  ;;  %v4566_v46 = vrot.slane %v1366_v18, %v5955_v49 }
 0x7ef   : > { %v4547_v28 = vrot.slane %v1367_v2, %v5996_v20  ;;  %v4592_v36 = vrot.slane %v1367_v2, %v5915_v21  ;;  %v4598_v20 = vrot.slane %v1366_v18, %v5959_v10  ;;  %v4604_v9 = vrot.slane %v1367_v2, %v5954_v50 }
 0x7f0   : > { %6000 = vst [vmem:[#allocation41_spill] sm:$0xff] %v4566_v46 }
 0x7f1   : > { %v4552_v41 = vpop.permute.xlu0 %1532  ;;  %v1562_v37 = vmul.f32 %v4086_v60, %v4547_v28  ;;  %6004 = vst [vmem:[#allocation28_spill] sm:$0xff] %v4598_v20  ;;  %v1586_v21 = vmul.f32 %v4058_v24, %v4592_v36  ;;  %v1610_v50 = vmul.f32 %v4333_v52, %v4604_v9  ;;  %v4634_v52 = vrot.slane %v1367_v2, %v5957_v1 }
 0x7f2   : > { %5998 = vst [vmem:[#allocation26_spill] sm:$0xff] %v4552_v41  ;;  %v1843_v1 = vmul.f32 %v4394_v4, %v4604_v9 }
 0x7f3   : > { %1570 = vrot.lane.b32.xlu1 %v1562_v37, %s3338_s14  ;;  %6006 = vst [vmem:[#allocation29_spill] sm:$0xff] %v4634_v52 }
 0x7f5   : > { %v4560_v5 = vpop.permute.xlu0 %2268 }
 0x7f7   : > { %1592 = vrot.lane.b32.xlu1 %v1585_v17, %s3338_s14  ;;  %v1633_v17 = vmul.f32 %v4343_v44, %v4566_v46 }
 0x7fa   : > { %v4570_v41 = vpop.permute.xlu0 %2290 }
 0x7fb   : > { %v2295_v37 = vmul.f32 %v4570_v41, %v4080_v25  ;;  %1616 = vrot.lane.b32.xlu1 %v1609_v54, %s3338_s14  ;;  %v1657_v54 = vmul.f32 %v4352_v51, %v4576_v62 }
 0x7fd   : > { %2303 = vrot.lane.b32.xlu0 %v2295_v37, %s3339_s15  ;;  %v1561_v37 = vmul.f32 %v4086_v60, %v4582_v40  ;;  %v1705_v60 = vmul.f32 %v4370_v48, %v4598_v20 }
 0x7ff   : > { %1640 = vrot.lane.b32.xlu1 %v1633_v17, %s3338_s14  ;;  %v1681_v17 = vmul.f32 %v4361_v43, %v4586_v35 }
 0x801   : > { %2609 = vperm.xlu0 %3241, %v4284_v58  }
 0x803   : > { %1664 = vrot.lane.b32.xlu1 %v1657_v54, %s3338_s14  ;;  %v4610_v54 = vrot.slane %v1366_v18, %v5961_v11  ;;  %v4625_v18 = vrot.slane %v1367_v2, %v5956_v53  ;;  %v1807_v53 = vmul.f32 %v4389_v55, %v4592_v36 }
 0x805   : > { %1568 = vrot.lane.b32.xlu0 %v1561_v37, %s3338_s14  ;;  %6005 = vst [vmem:[#allocation46_spill] sm:$0xff] %v4610_v54  ;;  %v4616_v37 = vrot.slane %v1367_v2, %v5955_v49  ;;  %v1729_v24 = vmul.f32 %v4379_v63, %v4610_v54  ;;  %v1771_v49 = vmul.f32 %v4384_v19, %v4547_v28 }
 0x807   : > { %1688 = vrot.lane.b32.xlu1 %v1681_v17, %s3338_s14  ;;  %v1634_v17 = vmul.f32 %v4343_v44, %v4616_v37  ;;  %v4643_v44 = vrot.slane %v1367_v2, %v5959_v10  ;;  %v1879_v10 = vmul.f32 %v4399_v29, %v4616_v37 }
 0x809   : > { %1594 = vrot.lane.b32.xlu0 %v1586_v21, %s3338_s14  ;;  %v1658_v21 = vmul.f32 %v4352_v51, %v4625_v18  ;;  %6007 = vst [vmem:[#allocation48_spill] sm:$0xff] %v4643_v44  ;;  %v4652_v51 = vrot.slane %v1367_v2, %v5961_v11  ;;  %v1915_v11 = vmul.f32 %v4408_v8, %v4625_v18 }
 0x80a   : > { %v1951_v2 = vmul.f32 %v4415_v27, %v4634_v52 }
 0x80b   : > { %1712 = vrot.lane.b32.xlu1 %v1705_v60, %s3338_s14  ;;  %v1682_v60 = vmul.f32 %v4361_v43, %v4634_v52  ;;  %6008 = vst [vmem:[#allocation30_spill] sm:$0xff] %v4652_v51  ;;  %v1730_v43 = vmul.f32 %v4379_v63, %v4652_v51  ;;  %v1806_v63 = vmul.f32 %v4389_v55, %v4550_v23 }
 0x80c   : > { %v1878_v55 = vmul.f32 %v4399_v29, %v4566_v46  ;;  %v1950_v29 = vmul.f32 %v4415_v27, %v4586_v35  ;;  %v2177_v27 = vmul.f32 %v4520_v47, %v4604_v9 }
 0x80d   : > { %1618 = vrot.lane.b32.xlu0 %v1610_v50, %s3338_s14  ;;  %v1706_v50 = vmul.f32 %v4370_v48, %v4643_v44  ;;  %v1770_v48 = vmul.f32 %v4384_v19, %v4582_v40  ;;  %v1842_v19 = vmul.f32 %v4394_v4, %v4558_v33  ;;  %v1914_v4 = vmul.f32 %v4408_v8, %v4576_v62 }
 0x80e   : > { %v2176_v8 = vmul.f32 %v4520_v47, %v4558_v33  ;;  %v2215_v47 = vmul.f32 %v4534_v57, %v4625_v18 }
 0x80f   : > { %1736 = vrot.lane.b32.xlu1 %v1729_v24, %s3338_s14  ;;  %v1987_v24 = vmul.f32 %v4422_v7, %v4643_v44 }
 0x811   : > { %1642 = vrot.lane.b32.xlu0 %v1634_v17, %s3338_s14  ;;  %v4681_v17 = vpop.permute.xlu0 %2062 }
 0x813   : > { %1778 = vrot.lane.b32.xlu1 %v1771_v49, %s3339_s15  ;;  %v2023_v49 = vmul.f32 %v4428_v22, %v4652_v51 }
 0x815   : > { %1666 = vrot.lane.b32.xlu0 %v1658_v21, %s3338_s14  ;;  %v2139_v21 = vmul.f32 %v4514_v26, %v4547_v28 }
 0x817   : > { %1814 = vrot.lane.b32.xlu1 %v1807_v53, %s3339_s15  ;;  %v2155_v53 = vpop.permute.xlu0 %2154 }
 0x819   : > { %1690 = vrot.lane.b32.xlu0 %v1682_v60, %s3338_s14  ;;  %v2157_v60 = vmul.f32 %v2155_v53, %v4550_v23 }
 0x81b   : > { %1850 = vrot.lane.b32.xlu1 %v1843_v1, %s3339_s15  ;;  %v2158_v1 = vmul.f32 %v2155_v53, %v4592_v36  ;;  %v2590_v53 = vmul.f32 %v4518_v34, %v4080_v25 }
 0x81d   : > { %1714 = vrot.lane.b32.xlu0 %v1706_v50, %s3338_s14  ;;  %v1986_v50 = vmul.f32 %v4422_v7, %v4598_v20  ;;  %v2138_v7 = vmul.f32 %v4514_v26, %v4582_v40  ;;  %v2214_v26 = vmul.f32 %v4534_v57, %v4576_v62  ;;  %v2252_v57 = vmul.f32 %v4542_v42, %v4598_v20 }
 0x81f   : > { %1886 = vrot.lane.b32.xlu1 %v1879_v10, %s3339_s15  ;;  %v2022_v10 = vmul.f32 %v4428_v22, %v4610_v54  ;;  %v2196_v22 = vmul.f32 %v4526_v61, %v4616_v37 }
 0x821   : > { %1738 = vrot.lane.b32.xlu0 %v1730_v43, %s3338_s14  ;;  %v2195_v43 = vmul.f32 %v4526_v61, %v4566_v46  ;;  %v2233_v61 = vmul.f32 %v4538_v32, %v4586_v35 }
 0x823   : > { %1922 = vrot.lane.b32.xlu1 %v1915_v11, %s3339_s15  ;;  %v4723_v11 = vld [vmem:[%s5651_s3 + $0x40] sm:$0xff] }
 0x825   : > { %1776 = vrot.lane.b32.xlu0 %v1770_v48, %s3339_s15  ;;  %v2234_v48 = vmul.f32 %v4538_v32, %v4634_v52  ;;  %v2271_v32 = vmul.f32 %v4560_v5, %v4610_v54 }
 0x827   : > { %1958 = vrot.lane.b32.xlu1 %v1951_v2, %s3339_s15  ;;  %v2253_v2 = vmul.f32 %v4542_v42, %v4643_v44 }
 0x829   : > { %1812 = vrot.lane.b32.xlu0 %v1806_v63, %s3339_s15 }
 0x82b   : > { %1994 = vrot.lane.b32.xlu1 %v1987_v24, %s3339_s15  ;;  %v4766_v24 = vld [vmem:[%s5651_s3 + $0x10] sm:$0xff] }
 0x82d   : > { %1848 = vrot.lane.b32.xlu0 %v1842_v19, %s3339_s15  ;;  %v2293_v19 = vmul.f32 %v4570_v41, %v4582_v40 }
 0x82f   : > { %2030 = vrot.lane.b32.xlu1 %v2023_v49, %s3339_s15 }
 0x831   : > { %1884 = vrot.lane.b32.xlu0 %v1878_v55, %s3339_s15 }
 0x833   : > { %2144 = vrot.lane.b32.xlu1 %v2139_v21, %s3338_s14  ;;  %v2588_v21 = vmul.f32 %v4518_v34, %v4582_v40 }
 0x835   : > { %1920 = vrot.lane.b32.xlu0 %v1914_v4, %s3339_s15 }
 0x837   : > { %2161 = vrot.lane.b32.xlu1 %v2157_v60, %s3338_s14 }
 0x839   : > { %1956 = vrot.lane.b32.xlu0 %v1950_v29, %s3339_s15 }
 0x83b   : > { %2163 = vrot.lane.b32.xlu1 %v2158_v1, %s3338_s14 }
 0x83d   : > { %1992 = vrot.lane.b32.xlu0 %v1986_v50, %s3339_s15 }
 0x83f   : > { %2180 = vrot.lane.b32.xlu1 %v2176_v8, %s3338_s14 }
 0x841   : > { %2028 = vrot.lane.b32.xlu0 %v2022_v10, %s3339_s15 }
 0x843   : > { %2182 = vrot.lane.b32.xlu1 %v2177_v27, %s3338_s14 }
 0x845   : > { %2142 = vrot.lane.b32.xlu0 %v2138_v7, %s3338_s14  ;;  %v2636_v7 = vmul.f32 %v4522_v31, %v4558_v33 }
 0x847   : > { %2199 = vrot.lane.b32.xlu1 %v2195_v43, %s3338_s14  ;;  %v2638_v43 = vmul.f32 %v4522_v31, %v4331_v56 }
 0x849   : > { %2804 = vperm.xlu0 %3241, %v4723_v11  }
 0x84b   : > { %2201 = vrot.lane.b32.xlu1 %v2196_v22, %s3338_s14 }
 0x84d   : > { %3249 = vset.pattern.permute.xlu0 %v5917_v12 }
 0x84e   : > { %2362 = vperm.xlu0 %3249, %v4473_v3  }
 0x84f   : > { %2218 = vrot.lane.b32.xlu1 %v2214_v26, %s3338_s14 }
 0x852   : > { %3250 = vset.pattern.permute.xlu0 %v5968_v59 }
 0x853   : > { %2220 = vrot.lane.b32.xlu1 %v2215_v47, %s3338_s14  ;;  %2681 = vperm.xlu0 %3250, %v4284_v58  }
 0x857   : > { %2237 = vrot.lane.b32.xlu1 %v2233_v61, %s3338_s14  ;;  %2876 = vperm.xlu0 %3250, %v4723_v11   ;;  %v2661_v61 = vmul.f32 %v4528_v38, %v4616_v37 }
 0x85b   : > { %2239 = vrot.lane.b32.xlu1 %v2234_v48, %s3338_s14  ;;  %3254 = vset.pattern.permute.xlu0 %v5919_v39 }
 0x85c   : > { %2434 = vperm.xlu0 %3254, %v4473_v3  }
 0x85f   : > { %2256 = vrot.lane.b32.xlu1 %v2252_v57, %s3338_s14 }
 0x860   : > { %3255 = vset.pattern.permute.xlu0 %v5971_v13 }
 0x861   : > { %2753 = vperm.xlu0 %3255, %v4284_v58   ;;  %v2272_v58 = vmul.f32 %v4560_v5, %v4652_v51  ;;  %v2294_v5 = vmul.f32 %v4570_v41, %v4547_v28 }
 0x863   : > { %2258 = vrot.lane.b32.xlu1 %v2253_v2, %s3338_s14 }
 0x865   : > { %v4759_v63 = vpop.permute.xlu1 %1570  ;;  %2948 = vperm.xlu0 %3255, %v4723_v11  }
 0x866   : > { %6009 = vst [vmem:[#allocation68_spill] sm:$0xff] %v4759_v63 }
 0x867   : > { %2275 = vrot.lane.b32.xlu1 %v2271_v32, %s3338_s14 }
 0x869   : > { %v4770_v42 = vpop.permute.xlu1 %1592  ;;  %3260 = vset.pattern.permute.xlu0 %v5922_v16 }
 0x86a   : > { %6010 = vst [vmem:[#allocation17_spill] sm:$0xff] %v4770_v42  ;;  %2522 = vperm.xlu0 %3260, %v4766_v24  }
 0x86b   : > { %2277 = vrot.lane.b32.xlu1 %v2272_v58, %s3338_s14 }
 0x86d   : > { %v4777_v49 = vpop.permute.xlu1 %1616 }
 0x86e   : > { %6011 = vst [vmem:[#allocation19_spill] sm:$0xff] %v4777_v49  ;;  %3263 = vset.pattern.permute.xlu0 %v5918_v0 }
 0x86f   : > { %2299 = vrot.lane.b32.xlu1 %v2293_v19, %s3339_s15  ;;  %2552 = vperm.xlu0 %3263, %v4766_v24   ;;  %v4799_v60 = vpop.permute.xlu0 %2303 }
 0x870   : > { %6015 = vst [vmem:[#allocation16_spill] sm:$0xff] %v4799_v60 }
 0x871   : > { %v4784_v55 = vpop.permute.xlu1 %1640 }
 0x872   : > { %6012 = vst [vmem:[#allocation9_spill] sm:$0xff] %v4784_v55 }
 0x873   : > { %2301 = vrot.lane.b32.xlu1 %v2294_v5, %s3339_s15  ;;  %2594 = vrot.lane.b32.xlu0 %v2588_v21, %s3338_s14 }
 0x874   : > { %3267 = vset.pattern.permute.xlu0 %v5920_v6 }
 0x875   : > { %v4793_v4 = vpop.permute.xlu1 %1664 }
 0x876   : > { %6013 = vst [vmem:[#allocation11_spill] sm:$0xff] %v4793_v4 }
 0x877   : > { %2780 = vperm.xlu1 %3246, %v4723_v11   ;;  %2598 = vrot.lane.b32.xlu0 %v2590_v53, %s3338_s14 }
 0x879   : > { %v4797_v41 = vpop.permute.xlu1 %1688 }
 0x87a   : > { %6014 = vst [vmem:[#allocation14_spill] sm:$0xff] %v4797_v41 }
 0x87b   : > { %3247 = vset.pattern.permute.xlu1 %v5921_v15 }
 0x87c   : > { %2314 = vperm.xlu1 %3247, %v4473_v3  }
 0x87d   : > { %v4803_v29 = vpop.permute.xlu1 %1712 }
 0x87e   : > { %6016 = vst [vmem:[#allocation18_spill] sm:$0xff] %v4803_v29  ;;  %v6049_v29 = vld [vmem:[#allocation37_spill] sm:$0xff] }
 0x880   : > { %v4805_v1 = vpop.permute.xlu0 %2609  ;;  %3248 = vset.pattern.permute.xlu1 %v5922_v16 }
 0x881   : > { %v2613_v50 = vmul.f32 %v4805_v1, %v4592_v36  ;;  %v4810_v8 = vpop.permute.xlu1 %1736  ;;  %2338 = vperm.xlu1 %3248, %v4473_v3  }
 0x882   : > { %6017 = vst [vmem:[#allocation15_spill] sm:$0xff] %v4810_v8 }
 0x883   : > { %2620 = vrot.lane.b32.xlu0 %v2613_v50, %s3338_s14 }
 0x884   : > { %v4814_v10 = vpop.permute.xlu0 %1568 }
 0x885   : > { %6018 = vst [vmem:[#allocation43_spill] sm:$0xff] %v4814_v10  ;;  %v4816_v27 = vpop.permute.xlu1 %1778  ;;  %2828 = vperm.xlu1 %3248, %v4723_v11  }
 0x886   : > { %6019 = vst [vmem:[#allocation45_spill] sm:$0xff] %v4816_v27 }
 0x887   : > { %2642 = vrot.lane.b32.xlu0 %v2636_v7, %s3338_s14 }
 0x888   : > { %v4822_v16 = vpop.permute.xlu0 %1594 }
 0x889   : > { %6020 = vst [vmem:[#allocation47_spill] sm:$0xff] %v4822_v16  ;;  %v4826_v22 = vpop.permute.xlu1 %1814  ;;  %3251 = vset.pattern.permute.xlu1 %v5917_v12 }
 0x88a   : > { %6021 = vst [vmem:[#allocation51_spill] sm:$0xff] %v4826_v22  ;;  %2852 = vperm.xlu1 %3251, %v4723_v11  }
 0x88b   : > { %2646 = vrot.lane.b32.xlu0 %v2638_v43, %s3338_s14 }
 0x88c   : > { %v4831_v26 = vpop.permute.xlu0 %1618 }
 0x88d   : > { %6022 = vst [vmem:[#allocation50_spill] sm:$0xff] %v4831_v26  ;;  %v4833_v47 = vpop.permute.xlu1 %1850 }
 0x88e   : > { %6023 = vst [vmem:[#allocation8_spill] sm:$0xff] %v4833_v47  ;;  %3252 = vset.pattern.permute.xlu1 %v5968_v59 }
 0x88f   : > { %2386 = vperm.xlu1 %3252, %v4473_v3   ;;  %2668 = vrot.lane.b32.xlu0 %v2661_v61, %s3338_s14 }
 0x890   : > { %v4840_v48 = vpop.permute.xlu0 %1642 }
 0x891   : > { %6024 = vst [vmem:[#allocation75_spill] sm:$0xff] %v4840_v48  ;;  %v4842_v57 = vpop.permute.xlu1 %1886 }
 0x892   : > { %6025 = vst [vmem:[#allocation76_spill] sm:$0xff] %v4842_v57 }
 0x893   : > { %3253 = vset.pattern.permute.xlu1 %v5918_v0 }
 0x894   : > { %2410 = vperm.xlu1 %3253, %v4473_v3   ;;  %v4846_v2 = vpop.permute.xlu0 %1666 }
 0x895   : > { %6026 = vst [vmem:[#allocation77_spill] sm:$0xff] %v4846_v2  ;;  %v4848_v32 = vpop.permute.xlu1 %1922 }
 0x896   : > { %6027 = vst [vmem:[#allocation78_spill] sm:$0xff] %v4848_v32 }
 0x898   : > { %2900 = vperm.xlu1 %3253, %v4723_v11   ;;  %v4851_v58 = vpop.permute.xlu0 %1690 }
 0x899   : > { %6028 = vst [vmem:[#allocation79_spill] sm:$0xff] %v4851_v58  ;;  %v4853_v19 = vpop.permute.xlu1 %1958 }
 0x89a   : > { %6029 = vst [vmem:[#allocation80_spill] sm:$0xff] %v4853_v19 }
 0x89c   : > { %3256 = vset.pattern.permute.xlu1 %v5919_v39  ;;  %v4856_v5 = vpop.permute.xlu0 %1714 }
 0x89d   : > { %6030 = vst [vmem:[#allocation81_spill] sm:$0xff] %v4856_v5  ;;  %v4858_v21 = vpop.permute.xlu1 %1994  ;;  %2924 = vperm.xlu1 %3256, %v4723_v11  }
 0x89e   : > { %6031 = vst [vmem:[#allocation82_spill] sm:$0xff] %v4858_v21 }
 0x8a0   : > { %v4861_v0 = vpop.permute.xlu0 %1738 }
 0x8a1   : > { %6032 = vst [vmem:[#allocation83_spill] sm:$0xff] %v4861_v0  ;;  %v4863_v53 = vpop.permute.xlu1 %2030  ;;  %3257 = vset.pattern.permute.xlu1 %v5971_v13 }
 0x8a2   : > { %6033 = vst [vmem:[#allocation84_spill] sm:$0xff] %v4863_v53  ;;  %2458 = vperm.xlu1 %3257, %v4473_v3  }
 0x8a4   : > { %v4867_v50 = vpop.permute.xlu0 %1776 }
 0x8a5   : > { %6034 = vst [vmem:[#allocation85_spill] sm:$0xff] %v4867_v50  ;;  %v4869_v7 = vpop.permute.xlu1 %2144 }
 0x8a6   : > { %3258 = vset.pattern.permute.xlu1 %v5920_v6 }
 0x8a7   : > { %2502 = vperm.xlu1 %3258, %v4766_v24  }
 0x8a8   : > { %v4873_v43 = vpop.permute.xlu0 %1812 }
 0x8a9   : > { %6035 = vst [vmem:[#allocation86_spill] sm:$0xff] %v4873_v43  ;;  %v4875_v61 = vpop.permute.xlu1 %2161 }
 0x8ab   : > { %3259 = vset.pattern.permute.xlu1 %v5921_v15 }
 0x8ac   : > { %2512 = vperm.xlu1 %3259, %v4766_v24   ;;  %v4879_v11 = vpop.permute.xlu0 %1848 }
 0x8ad   : > { %6036 = vst [vmem:[#allocation87_spill] sm:$0xff] %v4879_v11  ;;  %v4881_v53 = vpop.permute.xlu1 %2163 }
 0x8b0   : > { %3261 = vset.pattern.permute.xlu1 %v5917_v12  ;;  %v4884_v3 = vpop.permute.xlu0 %1884 }
 0x8b1   : > { %6037 = vst [vmem:[#allocation88_spill] sm:$0xff] %v4884_v3  ;;  %v4886_v21 = vpop.permute.xlu1 %2180  ;;  %2532 = vperm.xlu1 %3261, %v4766_v24  }
 0x8b4   : > { %v4889_v19 = vpop.permute.xlu0 %1920 }
 0x8b5   : > { %6038 = vst [vmem:[#allocation89_spill] sm:$0xff] %v4889_v19  ;;  %v4891_v32 = vpop.permute.xlu1 %2182  ;;  %3262 = vset.pattern.permute.xlu1 %v5968_v59 }
 0x8b6   : > { %2542 = vperm.xlu1 %3262, %v4766_v24  }
 0x8b8   : > { %v4895_v15 = vpop.permute.xlu0 %1956 }
 0x8b9   : > { %6039 = vst [vmem:[#allocation90_spill] sm:$0xff] %v4895_v15  ;;  %v4897_v11 = vpop.permute.xlu1 %2199  ;;  %v2589_v15 = vmul.f32 %v4518_v34, %v4547_v28  ;;  %v2614_v34 = vmul.f32 %v4805_v1, %v4185_v14 }
 0x8ba   : > { %3264 = vset.pattern.permute.xlu1 %v5919_v39 }
 0x8bb   : > { %2562 = vperm.xlu1 %3264, %v4766_v24  }
 0x8bc   : > { %v4901_v12 = vpop.permute.xlu0 %1992 }
 0x8bd   : > { %6040 = vst [vmem:[#allocation91_spill] sm:$0xff] %v4901_v12  ;;  %v4903_v3 = vpop.permute.xlu1 %2201 }
 0x8be   : > { %6041 = vst [vmem:[#allocation92_spill] sm:$0xff] %v4903_v3 }
 0x8bf   : > { %3265 = vset.pattern.permute.xlu1 %v5971_v13  ;;  %v2612_v13 = vmul.f32 %v4805_v1, %v4550_v23 }
 0x8c0   : > { %2572 = vperm.xlu1 %3265, %v4766_v24   ;;  %v4907_v19 = vpop.permute.xlu0 %2028 }
 0x8c1   : > { %6042 = vst [vmem:[#allocation93_spill] sm:$0xff] %v4907_v19  ;;  %v4909_v59 = vpop.permute.xlu1 %2218 }
 0x8c2   : > { %6043 = vst [vmem:[#allocation94_spill] sm:$0xff] %v4909_v59 }
 0x8c4   : > { %2596 = vrot.lane.b32.xlu1 %v2589_v15, %s3338_s14  ;;  %v4914_v39 = vpop.permute.xlu0 %2142 }
 0x8c5   : > { %v4916_v43 = vpop.permute.xlu1 %2220  ;;  %3266 = vset.pattern.permute.xlu1 %v5920_v6  ;;  %v2637_v6 = vmul.f32 %v4522_v31, %v4604_v9 }
 0x8c6   : > { %6044 = vst [vmem:[#allocation95_spill] sm:$0xff] %v4916_v43 }
 0x8c8   : > { %2618 = vrot.lane.b32.xlu1 %v2612_v13, %s3338_s14  ;;  %v4922_v24 = vpop.permute.xlu0 %2804  ;;  %v2660_v13 = vmul.f32 %v4528_v38, %v4566_v46 }
 0x8c9   : > { %v4924_v19 = vpop.permute.xlu1 %2237 }
 0x8ca   : > { %6045 = vst [vmem:[#allocation96_spill] sm:$0xff] %v4924_v19 }
 0x8cc   : > { %2622 = vrot.lane.b32.xlu1 %v2614_v34, %s3338_s14  ;;  %v2662_v34 = vmul.f32 %v4528_v38, %v4341_v45  ;;  %v2708_v38 = vmul.f32 %v6049_v29, %v4586_v35 }
 0x8cd   : > { %v4929_v15 = vpop.permute.xlu0 %2362  ;;  %v4931_v12 = vpop.permute.xlu1 %2239 }
 0x8ce   : > { %6046 = vst [vmem:[#allocation97_spill] sm:$0xff] %v4931_v12 }
 0x8d0   : > { %2644 = vrot.lane.b32.xlu1 %v2637_v6, %s3338_s14 }
 0x8d1   : > { %v4939_v8 = vpop.permute.xlu1 %2256 }
 0x8d2   : > { %v2682_v50 = vpop.permute.xlu0 %2681  ;;  %6047 = vst [vmem:[#allocation98_spill] sm:$0xff] %v4939_v8 }
 0x8d3   : > { %v2684_v57 = vmul.f32 %v2682_v50, %v4576_v62  ;;  %v2686_v1 = vmul.f32 %v2682_v50, %v4349_v30  ;;  %v2685_v6 = vmul.f32 %v2682_v50, %v4625_v18  ;;  %v6052_v50 = vld [vmem:[#allocation32_spill] sm:$0xff] }
 0x8d4   : > { %2666 = vrot.lane.b32.xlu1 %v2660_v13, %s3338_s14  ;;  %v2709_v13 = vmul.f32 %v6049_v29, %v4634_v52  ;;  %v2710_v41 = vmul.f32 %v6049_v29, %v6052_v50 }
 0x8d5   : > { %2690 = vrot.lane.b32.xlu0 %v2684_v57, %s3338_s14  ;;  %v4951_v47 = vpop.permute.xlu1 %2258 }
 0x8d6   : > { %v4946_v31 = vpop.permute.xlu0 %2876  ;;  %6048 = vst [vmem:[#allocation99_spill] sm:$0xff] %v4951_v47 }
 0x8d7   : > { %v2880_v16 = vmul.f32 %v4946_v31, %v4625_v18 }
 0x8d8   : > { %2670 = vrot.lane.b32.xlu1 %v2662_v34, %s3338_s14  ;;  %v6050_v34 = vld [vmem:[#allocation25_spill] sm:$0xff] }
 0x8d9   : > { %2694 = vrot.lane.b32.xlu0 %v2686_v1, %s3338_s14  ;;  %v2732_v22 = vmul.f32 %v6050_v34, %v4598_v20  ;;  %v4963_v1 = vpop.permute.xlu1 %2275  ;;  %v2733_v0 = vmul.f32 %v6050_v34, %v4643_v44 }
 0x8da   : > { %6051 = vst [vmem:[#allocation37_spill] sm:$0xff] %v4963_v1 }
 0x8db   : > { %v4957_v57 = vpop.permute.xlu0 %2434 }
 0x8dc   : > { %2692 = vrot.lane.b32.xlu1 %v2685_v6, %s3338_s14  ;;  %v6053_v6 = vld [vmem:[#allocation56_spill] sm:$0xff] }
 0x8dd   : > { %2716 = vrot.lane.b32.xlu0 %v2709_v13, %s3338_s14  ;;  %v2734_v13 = vmul.f32 %v6050_v34, %v6053_v6  ;;  %v4973_v4 = vpop.permute.xlu1 %2277 }
 0x8de   : > { %6054 = vst [vmem:[#allocation25_spill] sm:$0xff] %v4973_v4 }
 0x8e0   : > { %2714 = vrot.lane.b32.xlu1 %v2708_v38, %s3338_s14  ;;  %v2754_v27 = vpop.permute.xlu0 %2753 }
 0x8e1   : > { %2738 = vrot.lane.b32.xlu0 %v2732_v22, %s3338_s14  ;;  %v2757_v38 = vmul.f32 %v2754_v27, %v4652_v51  ;;  %v2756_v29 = vmul.f32 %v2754_v27, %v4610_v54  ;;  %v6055_v22 = vld [vmem:[#allocation57_spill] sm:$0xff]  ;;  %v4982_v5 = vpop.permute.xlu1 %2299 }
 0x8e2   : > { %v2758_v55 = vmul.f32 %v2754_v27, %v6055_v22  ;;  %6056 = vst [vmem:[#allocation100_spill] sm:$0xff] %v4982_v5 }
 0x8e4   : > { %2718 = vrot.lane.b32.xlu1 %v2710_v41, %s3338_s14 }
 0x8e5   : > { %2742 = vrot.lane.b32.xlu0 %v2734_v13, %s3338_s14  ;;  %v4986_v41 = vpop.permute.xlu1 %2301 }
 0x8e6   : > { %6057 = vst [vmem:[#allocation101_spill] sm:$0xff] %v4986_v41 }
 0x8e8   : > { %2740 = vrot.lane.b32.xlu1 %v2733_v0, %s3338_s14 }
 0x8e9   : > { %2764 = vrot.lane.b32.xlu0 %v2757_v38, %s3338_s14 }
 0x8ec   : > { %2762 = vrot.lane.b32.xlu1 %v2756_v29, %s3338_s14 }
 0x8f0   : > { %2766 = vrot.lane.b32.xlu1 %v2758_v55, %s3338_s14 }
 0x8f6   : > { %v2781_v13 = vpop.permute.xlu1 %2780 }
 0x8f7   : > { %v2783_v34 = vmul.f32 %v2781_v13, %v4582_v40  ;;  %v2784_v58 = vmul.f32 %v2781_v13, %v4547_v28  ;;  %v2785_v0 = vmul.f32 %v2781_v13, %v4080_v25  ;;  %v2808_v13 = vmul.f32 %v4922_v24, %v4592_v36 }
 0x8f9   : > { %2789 = vrot.lane.b32.xlu0 %v2783_v34, %s3339_s15  ;;  %2791 = vrot.lane.b32.xlu1 %v2784_v58, %s3339_s15  ;;  %v2807_v58 = vmul.f32 %v4922_v24, %v4550_v23 }
 0x8fb   : > { %v2315_v27 = vpop.permute.xlu1 %2314 }
 0x8fc   : > { %v2317_v38 = vmul.f32 %v2315_v27, %v4550_v23  ;;  %v2318_v55 = vmul.f32 %v2315_v27, %v4592_v36  ;;  %v2319_v29 = vmul.f32 %v2315_v27, %v4185_v14 }
 0x8fd   : > { %2793 = vrot.lane.b32.xlu0 %v2785_v0, %s3339_s15  ;;  %v2809_v0 = vmul.f32 %v4922_v24, %v4185_v14 }
 0x8fe   : > { %2323 = vrot.lane.b32.xlu1 %v2317_v38, %s3339_s15 }
 0x900   : > { %v2339_v49 = vpop.permute.xlu1 %2338 }
 0x901   : > { %2325 = vrot.lane.b32.xlu0 %v2318_v55, %s3339_s15  ;;  %v2341_v27 = vmul.f32 %v2339_v49, %v4558_v33  ;;  %v2342_v55 = vmul.f32 %v2339_v49, %v4604_v9 }
 0x902   : > { %2327 = vrot.lane.b32.xlu1 %v2319_v29, %s3339_s15  ;;  %v2343_v29 = vmul.f32 %v2339_v49, %v4331_v56  ;;  %v5022_v49 = vpop.permute.xlu0 %2948 }
 0x904   : > { %v2829_v34 = vpop.permute.xlu1 %2828 }
 0x905   : > { %2813 = vrot.lane.b32.xlu0 %v2807_v58, %s3339_s15  ;;  %v2831_v58 = vmul.f32 %v2829_v34, %v4558_v33  ;;  %v2832_v24 = vmul.f32 %v2829_v34, %v4604_v9 }
 0x906   : > { %2815 = vrot.lane.b32.xlu1 %v2808_v13, %s3339_s15  ;;  %v2833_v13 = vmul.f32 %v2829_v34, %v4331_v56  ;;  %v2523_v34 = vpop.permute.xlu0 %2522 }
 0x907   : > { %v2527_v41 = vmul.f32 %v2523_v34, %v4604_v9 }
 0x909   : > { %v2853_v38 = vpop.permute.xlu1 %2852  ;;  %2817 = vrot.lane.b32.xlu0 %v2809_v0, %s3339_s15 }
 0x90a   : > { %2347 = vrot.lane.b32.xlu1 %v2341_v27, %s3339_s15  ;;  %v2365_v27 = vmul.f32 %v4929_v15, %v4566_v46  ;;  %v2856_v48 = vmul.f32 %v2853_v38, %v4616_v37 }
 0x90d   : > { %2349 = vrot.lane.b32.xlu0 %v2342_v55, %s3339_s15  ;;  %v2366_v55 = vmul.f32 %v4929_v15, %v4616_v37 }
 0x90e   : > { %v2387_v2 = vpop.permute.xlu1 %2386  ;;  %2351 = vrot.lane.b32.xlu1 %v2343_v29, %s3339_s15 }
 0x90f   : > { %v2389_v42 = vmul.f32 %v2387_v2, %v4576_v62 }
 0x911   : > { %2837 = vrot.lane.b32.xlu0 %v2831_v58, %s3339_s15  ;;  %v2367_v58 = vmul.f32 %v4929_v15, %v4341_v45  ;;  %v2553_v15 = vpop.permute.xlu0 %2552 }
 0x912   : > { %2839 = vrot.lane.b32.xlu1 %v2832_v24, %s3339_s15  ;;  %v2855_v24 = vmul.f32 %v2853_v38, %v4566_v46 }
 0x913   : > { %v2411_v0 = vpop.permute.xlu1 %2410 }
 0x914   : > { %v2415_v47 = vmul.f32 %v2411_v0, %v6052_v50 }
 0x915   : > { %2841 = vrot.lane.b32.xlu0 %v2833_v13, %s3339_s15 }
 0x916   : > { %2371 = vrot.lane.b32.xlu1 %v2365_v27, %s3339_s15  ;;  %v2857_v27 = vmul.f32 %v2853_v38, %v4341_v45  ;;  %v5052_v38 = vpop.permute.xlu0 %2594 }
 0x917   : > { %v5028_v29 = vpop.permute.xlu1 %2900 }
 0x919   : > { %2373 = vrot.lane.b32.xlu0 %v2366_v55, %s3339_s15  ;;  %v2390_v55 = vmul.f32 %v2387_v2, %v4625_v18 }
 0x91a   : > { %2375 = vrot.lane.b32.xlu1 %v2367_v58, %s3339_s15  ;;  %v2391_v58 = vmul.f32 %v2387_v2, %v4349_v30  ;;  %v2525_v2 = vmul.f32 %v2523_v34, %v4331_v56 }
 0x91c   : > { %v5036_v13 = vpop.permute.xlu1 %2924 }
 0x91d   : > { %2861 = vrot.lane.b32.xlu0 %v2855_v24, %s3339_s15 }
 0x91e   : > { %2863 = vrot.lane.b32.xlu1 %v2856_v48, %s3339_s15  ;;  %v2879_v48 = vmul.f32 %v4946_v31, %v4576_v62 }
 0x921   : > { %v5042_v26 = vpop.permute.xlu1 %2458  ;;  %2865 = vrot.lane.b32.xlu0 %v2857_v27, %s3339_s15  ;;  %v2413_v27 = vmul.f32 %v2411_v0, %v4586_v35 }
 0x922   : > { %2395 = vrot.lane.b32.xlu1 %v2389_v42, %s3339_s15  ;;  %v2881_v42 = vmul.f32 %v4946_v31, %v4349_v30  ;;  %v2526_v31 = vmul.f32 %v2523_v34, %v4558_v33 }
 0x925   : > { %2397 = vrot.lane.b32.xlu0 %v2390_v55, %s3339_s15 }
 0x926   : > { %v2503_v24 = vpop.permute.xlu1 %2502  ;;  %2399 = vrot.lane.b32.xlu1 %v2391_v58, %s3339_s15 }
 0x927   : > { %v2505_v55 = vmul.f32 %v2503_v24, %v4080_v25  ;;  %v2506_v58 = vmul.f32 %v2503_v24, %v4582_v40  ;;  %v2507_v10 = vmul.f32 %v2503_v24, %v4547_v28  ;;  %v2414_v24 = vmul.f32 %v2411_v0, %v4634_v52 }
 0x929   : > { %2885 = vrot.lane.b32.xlu0 %v2879_v48, %s3339_s15 }
 0x92a   : > { %2887 = vrot.lane.b32.xlu1 %v2880_v16, %s3339_s15  ;;  %v5069_v16 = vpop.permute.xlu0 %2598 }
 0x92b   : > { %v2513_v63 = vpop.permute.xlu1 %2512 }
 0x92c   : > { %v2515_v60 = vmul.f32 %v2513_v63, %v4185_v14  ;;  %v2516_v48 = vmul.f32 %v2513_v63, %v4550_v23  ;;  %v2517_v5 = vmul.f32 %v2513_v63, %v4592_v36 }
 0x92d   : > { %2889 = vrot.lane.b32.xlu0 %v2881_v42, %s3339_s15 }
 0x92e   : > { %v2518_v1 = vadd.f32 %v2515_v60, %v2505_v55  ;;  %v2519_v4 = vadd.f32 %v2516_v48, %v2506_v58  ;;  %v2520_v8 = vadd.f32 %v2517_v5, %v2507_v10  ;;  %2419 = vrot.lane.b32.xlu1 %v2413_v27, %s3339_s15  ;;  %v5081_v60 = vpop.permute.xlu0 %2620  ;;  %v2903_v10 = vmul.f32 %v5028_v29, %v4586_v35 }
 0x930   : > { %v2533_v12 = vpop.permute.xlu1 %2532  ;;  %v2528_v19 = vadd.f32 %v2525_v2, %v2518_v1  ;;  %v2529_v63 = vadd.f32 %v2526_v31, %v2519_v4  ;;  %v2530_v43 = vadd.f32 %v2527_v41, %v2520_v8  ;;  %v2904_v4 = vmul.f32 %v5028_v29, %v4634_v52 }
 0x931   : > { %v2535_v59 = vmul.f32 %v2533_v12, %v4341_v45  ;;  %v2536_v3 = vmul.f32 %v2533_v12, %v4566_v46  ;;  %v2537_v42 = vmul.f32 %v2533_v12, %v4616_v37  ;;  %2421 = vrot.lane.b32.xlu0 %v2414_v24, %s3339_s15  ;;  %v2555_v12 = vmul.f32 %v2553_v15, %v6052_v50 }
 0x932   : > { %2423 = vrot.lane.b32.xlu1 %v2415_v47, %s3339_s15  ;;  %v5099_v58 = vpop.permute.xlu0 %2642 }
 0x933   : > { %v2538_v5 = vadd.f32 %v2535_v59, %v2528_v19  ;;  %v2539_v0 = vadd.f32 %v2536_v3, %v2529_v63  ;;  %v2540_v1 = vadd.f32 %v2537_v42, %v2530_v43  ;;  %v2437_v19 = vmul.f32 %v4957_v57, %v4598_v20 }
 0x934   : > { %v2556_v43 = vmul.f32 %v2553_v15, %v4586_v35  ;;  %v2905_v3 = vmul.f32 %v5028_v29, %v6052_v50  ;;  %v2557_v59 = vmul.f32 %v2553_v15, %v4634_v52  ;;  %v2438_v42 = vmul.f32 %v4957_v57, %v4643_v44 }
 0x935   : > { %v2543_v8 = vpop.permute.xlu1 %2542  ;;  %2909 = vrot.lane.b32.xlu0 %v2903_v10, %s3339_s15 }
 0x936   : > { %v2545_v41 = vmul.f32 %v2543_v8, %v4349_v30  ;;  %v2546_v47 = vmul.f32 %v2543_v8, %v4576_v62  ;;  %v2547_v34 = vmul.f32 %v2543_v8, %v4625_v18  ;;  %2911 = vrot.lane.b32.xlu1 %v2904_v4, %s3339_s15  ;;  %v2647_v8 = vpop.permute.xlu0 %2646 }
 0x938   : > { %v2548_v2 = vadd.f32 %v2545_v41, %v2538_v5  ;;  %v2549_v27 = vadd.f32 %v2546_v47, %v2539_v0  ;;  %v2550_v55 = vadd.f32 %v2547_v34, %v2540_v1  ;;  %v2439_v5 = vmul.f32 %v4957_v57, %v6053_v6 }
 0x939   : > { %2913 = vrot.lane.b32.xlu0 %v2905_v3, %s3339_s15  ;;  %v2928_v47 = vmul.f32 %v5036_v13, %v4643_v44 }
 0x93a   : > { %v2563_v48 = vpop.permute.xlu1 %2562  ;;  %v2558_v31 = vadd.f32 %v2555_v12, %v2548_v2  ;;  %v2559_v24 = vadd.f32 %v2556_v43, %v2549_v27  ;;  %v2560_v63 = vadd.f32 %v2557_v59, %v2550_v55  ;;  %2443 = vrot.lane.b32.xlu1 %v2437_v19, %s3339_s15  ;;  %v2927_v12 = vmul.f32 %v5036_v13, %v4598_v20 }
 0x93b   : > { %v2565_v29 = vmul.f32 %v2563_v48, %v6053_v6  ;;  %v2566_v15 = vmul.f32 %v2563_v48, %v4598_v20  ;;  %v2567_v10 = vmul.f32 %v2563_v48, %v4643_v44  ;;  %v2929_v2 = vmul.f32 %v5036_v13, %v6053_v6 }
 0x93c   : > { %v2461_v55 = vmul.f32 %v5042_v26, %v4610_v54  ;;  %v2462_v13 = vmul.f32 %v5042_v26, %v4652_v51 }
 0x93d   : > { %v2568_v0 = vadd.f32 %v2565_v29, %v2558_v31  ;;  %v2569_v1 = vadd.f32 %v2566_v15, %v2559_v24  ;;  %v2570_v4 = vadd.f32 %v2567_v10, %v2560_v63  ;;  %2445 = vrot.lane.b32.xlu0 %v2438_v42, %s3339_s15  ;;  %v2669_v24 = vpop.permute.xlu0 %2668  ;;  %v2463_v10 = vmul.f32 %v5042_v26, %v6055_v22 }
 0x93e   : > { %2447 = vrot.lane.b32.xlu1 %v2439_v5, %s3339_s15 }
 0x93f   : > { %v2573_v41 = vpop.permute.xlu1 %2572 }
 0x940   : > { %v2575_v34 = vmul.f32 %v2573_v41, %v6055_v22  ;;  %v2576_v19 = vmul.f32 %v2573_v41, %v4610_v54  ;;  %v2577_v57 = vmul.f32 %v2573_v41, %v4652_v51 }
 0x941   : > { %2933 = vrot.lane.b32.xlu0 %v2927_v12, %s3339_s15  ;;  %v2952_v12 = vmul.f32 %v5022_v49, %v4652_v51 }
 0x942   : > { %v2578_v43 = vadd.f32 %v2575_v34, %v2568_v0  ;;  %2935 = vrot.lane.b32.xlu1 %v2928_v47, %s3339_s15  ;;  %v2579_v3 = vadd.f32 %v2576_v19, %v2569_v1  ;;  %v2580_v59 = vadd.f32 %v2577_v57, %v2570_v4  ;;  %v2953_v47 = vmul.f32 %v5022_v49, %v6055_v22  ;;  %v2991_v57 = vld [vmem:[%s5652_s4] sm:$0xff] }
 0x943   : > { %v2597_v27 = vpop.permute.xlu1 %2596 }
 0x944   : > { %v2600_v48 = vsel %vm430_vm0, %v5052_v38, %v2597_v27  ;;  %v2601_v31 = vsel %vm430_vm0, %v2597_v27, %v5069_v16  ;;  %v2605_v29 = vadd.f32 %v5052_v38, %v2578_v43  ;;  %v2951_v38 = vmul.f32 %v5022_v49, %v4610_v54 }
 0x945   : > { %v2606_v63 = vadd.f32 %v2600_v48, %v2579_v3  ;;  %v2607_v42 = vadd.f32 %v2601_v31, %v2580_v59  ;;  %2937 = vrot.lane.b32.xlu0 %v2929_v2, %s3339_s15 }
 0x946   : > { %2467 = vrot.lane.b32.xlu1 %v2461_v55, %s3339_s15 }
 0x947   : > { %v2619_v15 = vpop.permute.xlu1 %2618  ;;  %v2691_v1 = vpop.permute.xlu0 %2690 }
 0x948   : > { %v2624_v5 = vsel %vm430_vm0, %v2619_v15, %v5081_v60  ;;  %v2629_v16 = vadd.f32 %v2619_v15, %v2605_v29 }
 0x949   : > { %v2630_v0 = vadd.f32 %v2624_v5, %v2606_v63  ;;  %2469 = vrot.lane.b32.xlu0 %v2462_v13, %s3339_s15 }
 0x94a   : > { %2471 = vrot.lane.b32.xlu1 %v2463_v10, %s3339_s15  ;;  %v2653_v2 = vadd.f32 %v5099_v58, %v2629_v16 }
 0x94b   : > { %v2623_v4 = vpop.permute.xlu1 %2622  ;;  %v2695_v34 = vpop.permute.xlu0 %2694 }
 0x94c   : > { %v2625_v26 = vsel %vm430_vm0, %v5081_v60, %v2623_v4 }
 0x94d   : > { %v2631_v41 = vadd.f32 %v2625_v26, %v2607_v42  ;;  %2957 = vrot.lane.b32.xlu0 %v2951_v38, %s3339_s15 }
 0x94e   : > { %2959 = vrot.lane.b32.xlu1 %v2952_v12, %s3339_s15 }
 0x94f   : > { %v2645_v19 = vpop.permute.xlu1 %2644  ;;  %v2717_v48 = vpop.permute.xlu0 %2716 }
 0x950   : > { %v2648_v43 = vsel %vm430_vm0, %v5099_v58, %v2645_v19  ;;  %v2649_v3 = vsel %vm430_vm0, %v2645_v19, %v2647_v8 }
 0x951   : > { %v2654_v60 = vadd.f32 %v2648_v43, %v2630_v0  ;;  %v2655_v59 = vadd.f32 %v2649_v3, %v2631_v41  ;;  %2961 = vrot.lane.b32.xlu0 %v2953_v47, %s3339_s15  ;;  %s242_s15 = sand.u32 1, %s3322_s22  }
 0x952   : > { %2994 = vperm.xlu1 %3266, %v2991_v57  }
 0x953   : > { %v2667_v27 = vpop.permute.xlu1 %2666  ;;  %v2739_v15 = vpop.permute.xlu0 %2738 }
 0x954   : > { %v2672_v49 = vsel %vm430_vm0, %v2667_v27, %v2669_v24  ;;  %v2677_v55 = vadd.f32 %v2667_v27, %v2653_v2 }
 0x955   : > { %v2678_v31 = vadd.f32 %v2672_v49, %v2654_v60 }
 0x956   : > { %v2701_v63 = vadd.f32 %v2691_v1, %v2677_v55 }
 0x957   : > { %v2671_v42 = vpop.permute.xlu1 %2670  ;;  %v2743_v12 = vpop.permute.xlu0 %2742 }
 0x958   : > { %v2673_v29 = vsel %vm430_vm0, %v2669_v24, %v2671_v42 }
 0x959   : > { %v2679_v13 = vadd.f32 %v2673_v29, %v2655_v59 }
 0x95b   : > { %v2693_v8 = vpop.permute.xlu1 %2692  ;;  %v2765_v57 = vpop.permute.xlu0 %2764 }
 0x95c   : > { %v2696_v10 = vsel %vm430_vm0, %v2691_v1, %v2693_v8  ;;  %v2697_v5 = vsel %vm430_vm0, %v2693_v8, %v2695_v34 }
 0x95d   : > { %v2702_v0 = vadd.f32 %v2696_v10, %v2678_v31  ;;  %v2703_v58 = vadd.f32 %v2697_v5, %v2679_v13 }
 0x95f   : > { %v2715_v16 = vpop.permute.xlu1 %2714 }
 0x960   : > { %v2720_v38 = vsel %vm430_vm0, %v2715_v16, %v2717_v48  ;;  %v2725_v4 = vadd.f32 %v2715_v16, %v2701_v63 }
 0x961   : > { %v2726_v26 = vadd.f32 %v2720_v38, %v2702_v0  ;;  %v2065_v38 = vmul.f32 %v4681_v17, %v4185_v14 }
 0x962   : > { %v2749_v41 = vadd.f32 %v2739_v15, %v2725_v4  ;;  %v6058_v4 = vld [vmem:[#allocation64_spill] sm:$0xff] }
 0x963   : > { %v2719_v47 = vpop.permute.xlu1 %2718 }
 0x964   : > { %v2721_v19 = vsel %vm430_vm0, %v2717_v48, %v2719_v47 }
 0x965   : > { %v2727_v24 = vadd.f32 %v2721_v19, %v2703_v58 }
 0x967   : > { %v2741_v43 = vpop.permute.xlu1 %2740 }
 0x968   : > { %v2744_v3 = vsel %vm430_vm0, %v2739_v15, %v2741_v43  ;;  %v2745_v1 = vsel %vm430_vm0, %v2741_v43, %v2743_v12  ;;  %v2055_v12 = vmul.f32 %v6058_v4, %v4080_v25 }
 0x969   : > { %v2750_v34 = vadd.f32 %v2744_v3, %v2726_v26  ;;  %v2751_v60 = vadd.f32 %v2745_v1, %v2727_v24  ;;  %v2066_v26 = vmul.f32 %v4681_v17, %v4550_v23  ;;  %v2056_v24 = vmul.f32 %v6058_v4, %v4582_v40  ;;  %v6074_v40 = vld [vmem:[#allocation101_spill] sm:$0xff] }
 0x96a   : > { %v2068_v19 = vadd.f32 %v2065_v38, %v2055_v12 }
 0x96b   : > { %v2763_v59 = vpop.permute.xlu1 %2762  ;;  %v2790_v2 = vpop.permute.xlu0 %2789  ;;  %v2069_v3 = vadd.f32 %v2066_v26, %v2056_v24  ;;  %v2067_v26 = vmul.f32 %v4681_v17, %v4592_v36 }
 0x96c   : > { %v2768_v27 = vsel %vm430_vm0, %v2763_v59, %v2765_v57  ;;  %v2773_v49 = vadd.f32 %v2763_v59, %v2749_v41 }
 0x96d   : > { %v2774_v55 = vadd.f32 %v2768_v27, %v2750_v34 }
 0x96e   : > { %v5167_v31 = vadd.f32 %v2790_v2, %v2773_v49  ;;  %v6060_v49 = vld [vmem:[#allocation24_spill] sm:$0xff] }
 0x96f   : > { %v2767_v63 = vpop.permute.xlu1 %2766  ;;  %v2794_v42 = vpop.permute.xlu0 %2793 }
 0x970   : > { %v2769_v48 = vsel %vm430_vm0, %v2765_v57, %v2767_v63  ;;  %v6059_v57 = vld [vmem:[#allocation52_spill] sm:$0xff] }
 0x971   : > { %v2775_v29 = vadd.f32 %v2769_v48, %v2751_v60  ;;  %v2075_v43 = vmul.f32 %v6059_v57, %v4331_v56 }
 0x973   : > { %v2792_v13 = vpop.permute.xlu1 %2791  ;;  %v5170_v8 = vpop.permute.xlu0 %2325  ;;  %v2078_v60 = vadd.f32 %v2075_v43, %v2068_v19  ;;  %v6062_v43 = vld [vmem:[#allocation13_spill] sm:$0xff] }
 0x974   : > { %v2795_v15 = vsel %vm561_vm1, %v2790_v2, %v2792_v13  ;;  %v2796_v10 = vsel %vm561_vm1, %v2792_v13, %v2794_v42  ;;  %v2076_v2 = vmul.f32 %v6059_v57, %v4558_v33  ;;  %v2086_v13 = vmul.f32 %v6060_v49, %v4566_v46 }
 0x975   : > { %v2801_v5 = vadd.f32 %v2795_v15, %v2774_v55  ;;  %v5174_v0 = vadd.f32 %v2796_v10, %v2775_v29  ;;  %v2085_v55 = vmul.f32 %v6060_v49, %v4341_v45  ;;  %v6061_v15 = vld [vmem:[#allocation22_spill] sm:$0xff]  ;;  %v2106_v17 = vmul.f32 %v6062_v43, %v4586_v35 }
 0x976   : > { %v2079_v63 = vadd.f32 %v2076_v2, %v2069_v3  ;;  %v2095_v10 = vmul.f32 %v6061_v15, %v4349_v30  ;;  %v2096_v24 = vmul.f32 %v6061_v15, %v4576_v62  ;;  %v2105_v3 = vmul.f32 %v6062_v43, %v6052_v50 }
 0x977   : > { %v5176_v58 = vpop.permute.xlu1 %2323  ;;  %v5178_v16 = vpop.permute.xlu0 %2813  ;;  %v2088_v29 = vadd.f32 %v2085_v55, %v2078_v60  ;;  %v2057_v60 = vmul.f32 %v6058_v4, %v4547_v28  ;;  %v2077_v62 = vmul.f32 %v6059_v57, %v4604_v9 }
 0x978   : > { %v2089_v38 = vadd.f32 %v2086_v13, %v2079_v63 }
 0x979   : > { %v2098_v19 = vadd.f32 %v2095_v10, %v2088_v29  ;;  %v2070_v63 = vadd.f32 %v2067_v26, %v2057_v60  ;;  %v6063_v29 = vld [vmem:[#allocation38_spill] sm:$0xff]  ;;  %v2087_v60 = vmul.f32 %v6060_v49, %v4616_v37 }
 0x97a   : > { %v2115_v10 = vmul.f32 %v6063_v29, %v6053_v6  ;;  %v2116_v26 = vmul.f32 %v6063_v29, %v4598_v20 }
 0x97b   : > { %v5186_v41 = vpop.permute.xlu1 %2327  ;;  %v5188_v47 = vpop.permute.xlu0 %2817  ;;  %v2108_v13 = vadd.f32 %v2105_v3, %v2098_v19  ;;  %v6064_v19 = vld [vmem:[#allocation23_spill] sm:$0xff] }
 0x97c   : > { %v2125_v3 = vmul.f32 %v6064_v19, %v6055_v22  ;;  %v6068_v22 = vld [vmem:[#allocation96_spill] sm:$0xff] }
 0x97f   : > { %v5194_v1 = vpop.permute.xlu1 %2815  ;;  %v5196_v34 = vpop.permute.xlu0 %2349 }
 0x980   : > { %v2819_v59 = vsel %vm561_vm1, %v5178_v16, %v5194_v1 }
 0x981   : > { %v5203_v27 = vadd.f32 %v2819_v59, %v2801_v5  ;;  %v2099_v59 = vadd.f32 %v2096_v24, %v2089_v38  ;;  %v2080_v38 = vadd.f32 %v2077_v62, %v2070_v63  ;;  %v2118_v24 = vadd.f32 %v2115_v10, %v2108_v13 }
 0x982   : > { %v2126_v62 = vmul.f32 %v6064_v19, %v4610_v54  ;;  %v2097_v63 = vmul.f32 %v6061_v15, %v4625_v18  ;;  %v2146_v13 = vsel %vm430_vm0, %v4914_v39, %v4869_v7 }
 0x983   : > { %v5207_v42 = vpop.permute.xlu1 %2347  ;;  %v5209_v48 = vpop.permute.xlu0 %2837  ;;  %v2109_v46 = vadd.f32 %v2106_v17, %v2099_v59  ;;  %v2090_v59 = vadd.f32 %v2087_v60, %v2080_v38  ;;  %v2128_v17 = vadd.f32 %v2125_v3, %v2118_v24  ;;  %v2107_v24 = vmul.f32 %v6062_v43, %v4634_v52  ;;  %v6075_v52 = vld [vmem:[#allocation100_spill] sm:$0xff] }
 0x985   : > { %v2119_v35 = vadd.f32 %v2116_v26, %v2109_v46  ;;  %v2150_v10 = vadd.f32 %v4914_v39, %v2128_v17  ;;  %v2100_v20 = vadd.f32 %v2097_v63, %v2090_v59  ;;  %v2117_v17 = vmul.f32 %v6063_v29, %v4643_v44 }
 0x987   : > { %v5215_v12 = vpop.permute.xlu1 %2351  ;;  %v5217_v5 = vpop.permute.xlu0 %2841  ;;  %v2129_v49 = vadd.f32 %v2126_v62, %v2119_v35  ;;  %v2169_v3 = vadd.f32 %v4875_v61, %v2150_v10  ;;  %v2110_v54 = vadd.f32 %v2107_v24, %v2100_v20  ;;  %v2165_v35 = vsel %vm430_vm0, %v4875_v61, %v4881_v53  ;;  %v6065_v24 = vld [vmem:[#allocation92_spill] sm:$0xff] }
 0x988   : > { %v2127_v10 = vmul.f32 %v6064_v19, %v4652_v51 }
 0x989   : > { %v2151_v38 = vadd.f32 %v2146_v13, %v2129_v49  ;;  %v2188_v59 = vadd.f32 %v4886_v21, %v2169_v3  ;;  %v2120_v63 = vadd.f32 %v2117_v17, %v2110_v54  ;;  %v2184_v13 = vsel %vm430_vm0, %v4886_v21, %v4891_v32  ;;  %v6066_v17 = vld [vmem:[#allocation94_spill] sm:$0xff] }
 0x98a   : > { %v2203_v3 = vsel %vm430_vm0, %v4897_v11, %v6065_v24 }
 0x98b   : > { %v5227_v2 = vpop.permute.xlu1 %2839  ;;  %v5229_v55 = vpop.permute.xlu0 %2373  ;;  %v2170_v39 = vadd.f32 %v2165_v35, %v2151_v38  ;;  %v2207_v61 = vadd.f32 %v4897_v11, %v2188_v59  ;;  %v2130_v38 = vadd.f32 %v2127_v10, %v2120_v63  ;;  %v6067_v59 = vld [vmem:[#allocation95_spill] sm:$0xff] }
 0x98c   : > { %v2222_v51 = vsel %vm430_vm0, %v6066_v17, %v6067_v59 }
 0x98d   : > { %v2189_v20 = vadd.f32 %v2184_v13, %v2170_v39  ;;  %v2152_v35 = vadd.f32 %v4869_v7, %v2130_v38  ;;  %v2226_v21 = vadd.f32 %v6066_v17, %v2207_v61 }
 0x98f   : > { %v5237_v33 = vpop.permute.xlu1 %2371  ;;  %v5239_v4 = vpop.permute.xlu0 %2861  ;;  %v2208_v54 = vadd.f32 %v2203_v3, %v2189_v20  ;;  %v2171_v19 = vadd.f32 %v4881_v53, %v2152_v35  ;;  %v2245_v11 = vadd.f32 %v6068_v22, %v2226_v21  ;;  %v6069_v20 = vld [vmem:[#allocation97_spill] sm:$0xff]  ;;  %v6070_v53 = vld [vmem:[#allocation99_spill] sm:$0xff]  ;;  %v6071_v35 = vld [vmem:[#allocation98_spill] sm:$0xff] }
 0x990   : > { %v2241_v7 = vsel %vm430_vm0, %v6068_v22, %v6069_v20  ;;  %v2260_v44 = vsel %vm430_vm0, %v6071_v35, %v6070_v53  ;;  %v6073_v21 = vld [vmem:[#allocation37_spill] sm:$0xff] }
 0x991   : > { %v2227_v63 = vadd.f32 %v2222_v51, %v2208_v54  ;;  %v2190_v10 = vadd.f32 %v4891_v32, %v2171_v19  ;;  %v2264_v32 = vadd.f32 %v6071_v35, %v2245_v11  ;;  %v6072_v54 = vld [vmem:[#allocation25_spill] sm:$0xff] }
 0x992   : > { %v2279_v19 = vsel %vm430_vm0, %v6073_v21, %v6072_v54 }
 0x993   : > { %v5247_v6 = vpop.permute.xlu1 %2375  ;;  %v5249_v57 = vpop.permute.xlu0 %2865  ;;  %v2209_v3 = vadd.f32 %v6065_v24, %v2190_v10  ;;  %v2246_v17 = vadd.f32 %v2241_v7, %v2227_v63  ;;  %v2283_v10 = vadd.f32 %v6073_v21, %v2264_v32  ;;  %v2305_v63 = vsel %vm561_vm1, %v6075_v52, %v6074_v40 }
 0x995   : > { %v2228_v51 = vadd.f32 %v6067_v59, %v2209_v3  ;;  %v2265_v22 = vadd.f32 %v2260_v44, %v2246_v17  ;;  %v2310_v7 = vadd.f32 %v6075_v52, %v2283_v10  ;;  %v2329_v44 = vsel %vm561_vm1, %v5176_v58, %v5170_v8  ;;  %v6076_v3 = vld [vmem:[#allocation16_spill] sm:$0xff] }
 0x996   : > { %v2306_v35 = vsel %vm561_vm1, %v6074_v40, %v6076_v3  ;;  %v2353_v52 = vsel %vm561_vm1, %v5207_v42, %v5196_v34  ;;  %v2330_v40 = vsel %vm561_vm1, %v5170_v8, %v5186_v41  ;;  %v2354_v8 = vsel %vm561_vm1, %v5196_v34, %v5215_v12 }
 0x997   : > { %v5259_v46 = vpop.permute.xlu1 %2863  ;;  %v5261_v26 = vpop.permute.xlu0 %2397  ;;  %v2247_v24 = vadd.f32 %v6069_v20, %v2228_v51  ;;  %v2284_v59 = vadd.f32 %v2279_v19, %v2265_v22  ;;  %v2334_v21 = vadd.f32 %v5176_v58, %v2310_v7  ;;  %v2824_v19 = vadd.f32 %v5178_v16, %v5167_v31 }
 0x998   : > { %v2377_v58 = vsel %vm561_vm1, %v5237_v33, %v5229_v55 }
 0x999   : > { %v2266_v11 = vadd.f32 %v6070_v53, %v2247_v24  ;;  %v2311_v20 = vadd.f32 %v2305_v63, %v2284_v59  ;;  %v2820_v24 = vsel %vm561_vm1, %v5194_v1, %v5188_v47  ;;  %v2848_v63 = vadd.f32 %v5209_v48, %v2824_v19 }
 0x99a   : > { %v2826_v1 = vadd.f32 %v2820_v24, %v5174_v0 }
 0x99b   : > { %v5266_v60 = vpop.permute.xlu1 %2395  ;;  %v5268_v15 = vpop.permute.xlu0 %2885  ;;  %v2285_v32 = vadd.f32 %v6072_v54, %v2266_v11  ;;  %v2335_v53 = vadd.f32 %v2329_v44, %v2311_v20  ;;  %v2358_v54 = vadd.f32 %v5207_v42, %v2334_v21  ;;  %v2843_v42 = vsel %vm561_vm1, %v5209_v48, %v5227_v2 }
 0x99c   : > { %v2401_v47 = vsel %vm561_vm1, %v5266_v60, %v5261_v26  ;;  %v2872_v7 = vadd.f32 %v5239_v4, %v2848_v63  ;;  %v2844_v44 = vsel %vm561_vm1, %v5227_v2, %v5217_v5  ;;  %v2867_v48 = vsel %vm561_vm1, %v5239_v4, %v5259_v46 }
 0x99d   : > { %v2312_v22 = vadd.f32 %v2306_v35, %v2285_v32  ;;  %v2359_v10 = vadd.f32 %v2353_v52, %v2335_v53  ;;  %v2382_v41 = vadd.f32 %v5237_v33, %v2358_v54  ;;  %v2378_v33 = vsel %vm561_vm1, %v5229_v55, %v5247_v6 }
 0x99e   : > { %v2896_v35 = vadd.f32 %v5268_v15, %v2872_v7  ;;  %v2849_v2 = vadd.f32 %v2843_v42, %v5203_v27  ;;  %v2850_v32 = vadd.f32 %v2844_v44, %v2826_v1  ;;  %v2868_v53 = vsel %vm561_vm1, %v5259_v46, %v5249_v57  ;;  %v6077_v42 = vld [vmem:[#allocation65_spill] sm:$0xff] }
 0x99f   : > { %v5276_v62 = vpop.permute.xlu1 %2399  ;;  %v5278_v43 = vpop.permute.xlu0 %2889  ;;  %v2336_v16 = vadd.f32 %v2330_v40, %v2312_v22  ;;  %v2383_v11 = vadd.f32 %v2377_v58, %v2359_v10  ;;  %v2406_v34 = vadd.f32 %v5266_v60, %v2382_v41 }
 0x9a0   : > { %v2402_v6 = vsel %vm561_vm1, %v5261_v26, %v5276_v62  ;;  %v2873_v19 = vadd.f32 %v2867_v48, %v2849_v2  ;;  %v6081_v2 = vld [vmem:[#allocation67_spill] sm:$0xff] }
 0x9a1   : > { %v2360_v12 = vadd.f32 %v2354_v8, %v2336_v16  ;;  %v2407_v3 = vadd.f32 %v2401_v47, %v2383_v11 }
 0x9a3   : > { %v5286_v49 = vpop.permute.xlu1 %2887  ;;  %v5288_v29 = vpop.permute.xlu0 %2421  ;;  %v2384_v21 = vadd.f32 %v2378_v33, %v2360_v12  ;;  %v6078_v12 = vld [vmem:[#allocation31_spill] sm:$0xff] }
 0x9a4   : > { %v2892_v57 = vsel %vm561_vm1, %v5286_v49, %v5278_v43 }
 0x9a5   : > { %v2408_v62 = vadd.f32 %v2402_v6, %v2384_v21  ;;  %v1395_v6 = vmul.f32 %v4547_v28, %v6081_v2 }
 0x9a7   : > { %v5295_v39 = vpop.permute.xlu1 %2419  ;;  %v5297_v13 = vpop.permute.xlu0 %2909 }
 0x9a8   : > { %v2425_v0 = vsel %vm561_vm1, %v5295_v39, %v5288_v29  ;;  %v2430_v55 = vadd.f32 %v5295_v39, %v2406_v34  ;;  %v2920_v4 = vadd.f32 %v5297_v13, %v2896_v35  ;;  %v2891_v39 = vsel %vm561_vm1, %v5268_v15, %v5286_v49 }
 0x9a9   : > { %v2431_v52 = vadd.f32 %v2425_v0, %v2407_v3  ;;  %v2897_v43 = vadd.f32 %v2891_v39, %v2873_v19  ;;  %v6079_v3 = vld [vmem:[#allocation66_spill] sm:$0xff]  ;;  %v6083_v19 = vld [vmem:[#allocation71_spill] sm:$0xff] }
 0x9ab   : > { %v5308_v61 = vpop.permute.xlu1 %2423  ;;  %v5310_v38 = vpop.permute.xlu0 %2913 }
 0x9ac   : > { %v2426_v27 = vsel %vm561_vm1, %v5288_v29, %v5308_v61 }
 0x9ad   : > { %v2432_v58 = vadd.f32 %v2426_v27, %v2408_v62  ;;  %v1461_v27 = vmul.f32 %v4616_v37, %v6083_v19  ;;  %v1459_v62 = vmul.f32 %v4341_v45, %v6083_v19  ;;  %v6087_v37 = vld [vmem:[#allocation27_spill] sm:$0xff]  ;;  %v6089_v45 = vld [vmem:[#allocation32_spill] sm:$0xff] }
 0x9af   : > { %v5321_v50 = vpop.permute.xlu1 %2911  ;;  %v5323_v23 = vpop.permute.xlu0 %2445 }
 0x9b0   : > { %v2915_v15 = vsel %vm561_vm1, %v5297_v13, %v5321_v50  ;;  %v2916_v16 = vsel %vm561_vm1, %v5321_v50, %v5310_v38 }
 0x9b1   : > { %v2921_v13 = vadd.f32 %v2915_v15, %v2897_v43 }
 0x9b3   : > { %v2444_v17 = vpop.permute.xlu1 %2443  ;;  %v5338_v51 = vpop.permute.xlu0 %2933 }
 0x9b4   : > { %v2449_v60 = vsel %vm561_vm1, %v2444_v17, %v5323_v23  ;;  %v2454_v26 = vadd.f32 %v2444_v17, %v2430_v55  ;;  %v2944_v22 = vadd.f32 %v5338_v51, %v2920_v4  ;;  %v2874_v17 = vadd.f32 %v2868_v53, %v2850_v32  ;;  %v6082_v32 = vld [vmem:[#allocation69_spill] sm:$0xff] }
 0x9b5   : > { %v2455_v40 = vadd.f32 %v2449_v60, %v2431_v52  ;;  %v1439_v21 = vmul.f32 %v4604_v9, %v6082_v32  ;;  %v1393_v52 = vmul.f32 %v4080_v25, %v6081_v2 }
 0x9b6   : > { %v2898_v49 = vadd.f32 %v2892_v57, %v2874_v17  ;;  %v1394_v57 = vmul.f32 %v6087_v37, %v6081_v2  ;;  %v6103_v2 = vld [vmem:[#allocation50_spill] sm:$0xff] }
 0x9b7   : > { %v2448_v59 = vpop.permute.xlu1 %2447  ;;  %v2938_v31 = vpop.permute.xlu0 %2937 }
 0x9b8   : > { %v2450_v46 = vsel %vm561_vm1, %v5323_v23, %v2448_v59  ;;  %v2922_v1 = vadd.f32 %v2916_v16, %v2898_v49  ;;  %v6092_v16 = vld [vmem:[#allocation56_spill] sm:$0xff] }
 0x9b9   : > { %v2456_v23 = vadd.f32 %v2450_v46, %v2432_v58  ;;  %v6091_v58 = vld [vmem:[#allocation48_spill] sm:$0xff] }
 0x9ba   : > { %v6093_v49 = vld [vmem:[#allocation40_spill] sm:$0xff] }
 0x9bb   : > { %v2936_v20 = vpop.permute.xlu1 %2935  ;;  %v2470_v5 = vpop.permute.xlu0 %2469 }
 0x9bc   : > { %v2939_v8 = vsel %vm561_vm1, %v5338_v51, %v2936_v20  ;;  %v2940_v41 = vsel %vm561_vm1, %v2936_v20, %v2938_v31  ;;  %v6080_v20 = vld [vmem:[#allocation73_spill] sm:$0xff] }
 0x9bd   : > { %v2945_v38 = vadd.f32 %v2939_v8, %v2921_v13  ;;  %v2946_v7 = vadd.f32 %v2940_v41, %v2922_v1  ;;  %v1415_v60 = vmul.f32 %v4185_v14, %v6080_v20  ;;  %v6084_v14 = vld [vmem:[#allocation36_spill] sm:$0xff]  ;;  %v6095_v8 = vld [vmem:[#allocation57_spill] sm:$0xff] }
 0x9be   : > { %v1483_v39 = vmul.f32 %v4625_v18, %v6084_v14  ;;  %v1481_v9 = vmul.f32 %v4349_v30, %v6084_v14  ;;  %v6090_v18 = vld [vmem:[#allocation74_spill] sm:$0xff] }
 0x9bf   : > { %v2468_v24 = vpop.permute.xlu1 %2467  ;;  %v2958_v54 = vpop.permute.xlu0 %2957  ;;  %v1418_v53 = vadd.f32 %v1415_v60, %v1393_v52  ;;  %v1525_v43 = vmul.f32 %v6092_v16, %v6090_v18  ;;  %v6105_v60 = vld [vmem:[#allocation53_spill] sm:$0xff]  ;;  %v6119_v16 = vld [vmem:[#allocation59_spill] sm:$0xff] }
 0x9c0   : > { %v2473_v29 = vsel %vm561_vm1, %v2468_v24, %v2470_v5  ;;  %v2478_v61 = vadd.f32 %v2468_v24, %v2454_v26  ;;  %v2968_v63 = vadd.f32 %v2958_v54, %v2944_v22  ;;  %v6085_v22 = vld [vmem:[#allocation72_spill] sm:$0xff]  ;;  %v6086_v24 = vld [vmem:[#allocation29_spill] sm:$0xff] }
 0x9c1   : > { %v2479_v10 = vadd.f32 %v2473_v29, %v2455_v40  ;;  %v1503_v17 = vmul.f32 %v6089_v45, %v6085_v22 }
 0x9c2   : > { %2484 = vrot.lane.b32.xlu0 %v2478_v61, %s3343_s18  ;;  %v2971_v11 = vmul.f32 %v2968_v63, %v6077_v42 }
 0x9c3   : > { %v2472_v59 = vpop.permute.xlu1 %2471  ;;  %2486 = vrot.lane.b32.xlu1 %v2479_v10, %s3343_s18  ;;  %v2962_v44 = vpop.permute.xlu0 %2961  ;;  %v1527_v10 = vmul.f32 %v6091_v58, %v6090_v18 }
 0x9c4   : > { %v2474_v47 = vsel %vm561_vm1, %v2470_v5, %v2472_v59  ;;  %v1417_v5 = vmul.f32 %v4592_v36, %v6080_v20  ;;  %v1437_v36 = vmul.f32 %v4331_v56, %v6082_v32  ;;  %v6088_v56 = vld [vmem:[#allocation39_spill] sm:$0xff]  ;;  %v6094_v59 = vld [vmem:[#allocation26_spill] sm:$0xff] }
 0x9c5   : > { %v2480_v50 = vadd.f32 %v2474_v47, %v2456_v23  ;;  %v1416_v46 = vmul.f32 %v6088_v56, %v6080_v20  ;;  %v1438_v23 = vmul.f32 %v6093_v49, %v6082_v32  ;;  %v1547_v41 = vmul.f32 %v6095_v8, %v6094_v59  ;;  %v6096_v47 = vld [vmem:[#allocation30_spill] sm:$0xff]  ;;  %v6120_v49 = vld [vmem:[#allocation63_spill] sm:$0xff] }
 0x9c6   : > { %v1420_v55 = vadd.f32 %v1417_v5, %v1395_v6  ;;  %v1440_v28 = vadd.f32 %v1437_v36, %v1418_v53  ;;  %v1549_v13 = vmul.f32 %v6096_v47, %v6094_v59  ;;  %v6107_v53 = vld [vmem:[#allocation75_spill] sm:$0xff]  ;;  %v6108_v36 = vld [vmem:[#allocation77_spill] sm:$0xff] }
 0x9c7   : > { %v2960_v33 = vpop.permute.xlu1 %2959  ;;  %2488 = vrot.lane.b32.xlu0 %v2480_v50, %s3343_s18  ;;  %2977 = vrot.lane.b32.xlu1 %v2971_v11, %s3344_s19  ;;  %v1419_v30 = vadd.f32 %v1416_v46, %v1394_v57  ;;  %v6097_v50 = vld [vmem:[#allocation43_spill] sm:$0xff]  ;;  %v6114_v57 = vld [vmem:[#allocation81_spill] sm:$0xff]  ;;  %s3096_s18 = sshll.u32 %s242_s15, 4 }
 0x9c8   : > { %v2963_v34 = vsel %vm561_vm1, %v2958_v54, %v2960_v33  ;;  %v2964_v51 = vsel %vm561_vm1, %v2960_v33, %v2962_v44  ;;  %v1442_v4 = vadd.f32 %v1439_v21, %v1420_v55  ;;  %v1462_v40 = vadd.f32 %v1459_v62, %v1440_v28  ;;  %v6099_v44 = vld [vmem:[#allocation41_spill] sm:$0xff]  ;;  %v6106_v21 = vld [vmem:[#allocation44_spill] sm:$0xff]  ;;  %v6109_v28 = vld [vmem:[#allocation19_spill] sm:$0xff]  ;;  %s244_s10 = scalar_lea.vmem [#allocation4], %s3096_s18 }
 0x9c9   : > { %v2969_v31 = vadd.f32 %v2963_v34, %v2945_v38  ;;  %v2970_v0 = vadd.f32 %v2964_v51, %v2946_v7  ;;  %v1505_v54 = vmul.f32 %v6086_v24, %v6085_v22  ;;  %v1441_v1 = vadd.f32 %v1438_v23, %v1419_v30  ;;  %v6098_v38 = vld [vmem:[#allocation54_spill] sm:$0xff]  ;;  %v6104_v55 = vld [vmem:[#allocation17_spill] sm:$0xff]  ;;  %s3033_s11 = sshll.u32 %s244_s10, 4  ;;  %s5607_s11 = int_to_ptr.vmem [resolvable:$true] %s3033_s11 }
 0x9ca   : > { %v1464_v26 = vadd.f32 %v1461_v27, %v1442_v4  ;;  %v1484_v29 = vadd.f32 %v1481_v9, %v1462_v40  ;;  %v1572_v7 = vsel %vm430_vm0, %v6098_v38, %v6097_v50  ;;  %v1460_v33 = vmul.f32 %v6099_v44, %v6083_v19  ;;  %v6100_v34 = vld [vmem:[#allocation42_spill] sm:$0xff]  ;;  %v6110_v62 = vld [vmem:[#allocation33_spill] sm:$0xff]  ;;  %v6125_v44 = vld [vmem:[#allocation51_spill] sm:$0xff]  ;;  %s3268_s20 = scalar_lea.vmem %s5607_s11, 256 }
 0x9cb   : > { %v2972_v48 = vmul.f32 %v2969_v31, %v6078_v12  ;;  %v2973_v35 = vmul.f32 %v2970_v0, %v6079_v3  ;;  %v1482_v51 = vmul.f32 %v6100_v34, %v6084_v14  ;;  %v6101_v31 = vld [vmem:[#allocation68_spill] sm:$0xff]  ;;  %v1596_v32 = vsel %vm430_vm0, %v6105_v60, %v6104_v55  ;;  %v6115_v46 = vld [vmem:[#allocation9_spill] sm:$0xff]  ;;  %p3269_p11 = scmp.ne.s32.totalorder %s5607_s11, %s3268_s20 }
 0x9cc   : > { %v1486_v25 = vadd.f32 %v1483_v39, %v1464_v26  ;;  %v1506_v63 = vadd.f32 %v1503_v17, %v1484_v29  ;;  %v1504_v52 = vmul.f32 %v6106_v21, %v6085_v22  ;;  %v1620_v14 = vsel %vm430_vm0, %v6110_v62, %v6109_v28  ;;  %v6111_v39 = vld [vmem:[#allocation46_spill] sm:$0xff]  ;;  %v6121_v23 = vld [vmem:[#allocation45_spill] sm:$0xff] }
 0x9cd   : > { %2979 = vrot.lane.b32.xlu0 %v2972_v48, %s3344_s19  ;;  %2981 = vrot.lane.b32.xlu1 %v2973_v35, %s3344_s19  ;;  %v1463_v48 = vadd.f32 %v1460_v33, %v1441_v1  ;;  %v6102_v35 = vld [vmem:[#allocation47_spill] sm:$0xff]  ;;  %v1548_v9 = vmul.f32 %v6111_v39, %v6094_v59  ;;  %v6116_v29 = vld [vmem:[#allocation58_spill] sm:$0xff]  ;;  %v1573_v45 = vsel %vm430_vm0, %v6097_v50, %v6101_v31  ;;  %v6123_v50 = vld [vmem:[#allocation49_spill] sm:$0xff]  ;;  %s3122_s19 = sshll.u32 %s3405_s25, 8  ;;  %p3270_p12 = pnand %p3269_p11, %p3422_p5 }
 0x9ce   : > { %v1508_v61 = vadd.f32 %v1505_v54, %v1486_v25  ;;  %v1528_v11 = vadd.f32 %v1525_v43, %v1506_v63  ;;  %v6112_v25 = vld [vmem:[#allocation28_spill] sm:$0xff]  ;;  %v6113_v54 = vld [vmem:[#allocation79_spill] sm:$0xff]  ;;  %v1783_v59 = vsel %vm561_vm1, %v6121_v23, %v6120_v49  ;;  %v1621_v8 = vsel %vm430_vm0, %v6109_v28, %v6103_v2  ;;  %v6134_v62 = vld [vmem:[#allocation85_spill] sm:$0xff]  ;;  %s5605_s17 = scalar_lea.hbm %s5654_s6, %s3122_s19  ;;  %s3348_s25 = smov [#allocation4]  }
 0x9cf   : > { %v1485_v5 = vadd.f32 %v1482_v51, %v1463_v48  ;;  %v1526_v40 = vmul.f32 %v6112_v25, %v6090_v18  ;;  %v1597_v18 = vsel %vm430_vm0, %v6104_v55, %v6102_v35  ;;  %v1645_v1 = vsel %vm430_vm0, %v6115_v46, %v6107_v53  ;;  %v6142_v49 = vld [vmem:[#allocation89_spill] sm:$0xff]  ;;  %p3271_p13 = pneg %p3270_p12  ;;  %s3272_s26 = sshll.u32 %s3348_s25, 4  ;;  %s3273_s26 = int_to_ptr.vmem [resolvable:$false] %s3272_s26 }
 0x9d0   : > { %v1530_v15 = vadd.f32 %v1527_v10, %v1508_v61  ;;  %v1550_v12 = vadd.f32 %v1547_v41, %v1528_v11  ;;  %v1644_v61 = vsel %vm430_vm0, %v6116_v29, %v6115_v46  ;;  %v6117_v10 = vld [vmem:[#allocation83_spill] sm:$0xff]  ;;  %v6122_v11 = vld [vmem:[#allocation14_spill] sm:$0xff]  ;;  %s3274_s28 = scalar_lea.vmem %s3273_s26, 512  ;;  %p3275_p0 = scmp.lt.s32.totalorder %s5607_s11, %s3273_s26 }
 0x9d1   : > { %v1507_v27 = vadd.f32 %v1504_v52, %v1485_v5  ;;  %v1692_v38 = vsel %vm430_vm0, %v6123_v50, %v6122_v11  ;;  %v6128_v5 = vld [vmem:[#allocation7_spill] sm:$0xff]  ;;  %v6145_v50 = vld [vmem:[#allocation82_spill] sm:$0xff]  ;;  %p3276_p1 = scmp.lt.s32.totalorder %s3274_s28, %s3268_s20 }
 0x9d2   : > { %v1552_v42 = vadd.f32 %v1549_v13, %v1530_v15  ;;  %v1577_v3 = vadd.f32 %v1572_v7, %v1550_v12  ;;  %v6118_v15 = vld [vmem:[#allocation11_spill] sm:$0xff]  ;;  %v6124_v7 = vld [vmem:[#allocation62_spill] sm:$0xff]  ;;  %v1693_v12 = vsel %vm430_vm0, %v6122_v11, %v6113_v54 }
 0x9d3   : > { %v1529_v22 = vadd.f32 %v1526_v40, %v1507_v27  ;;  %v1668_v43 = vsel %vm430_vm0, %v6119_v16, %v6118_v15  ;;  %v1819_v33 = vsel %vm561_vm1, %v6125_v44, %v6124_v7  ;;  %v1669_v34 = vsel %vm430_vm0, %v6118_v15, %v6108_v36  ;;  %v6130_v52 = vld [vmem:[#allocation15_spill] sm:$0xff]  ;;  %v6135_v40 = vld [vmem:[#allocation86_spill] sm:$0xff]  ;;  %v6140_v15 = vld [vmem:[#allocation12_spill] sm:$0xff]  ;;  %p3277_p2 = por %p3276_p1, %p3275_p0 }
 0x9d4   : > { %v1579_v0 = vadd.f32 %v6101_v31, %v1552_v42  ;;  %v1601_v4 = vadd.f32 %v1596_v32, %v1577_v3  ;;  %v6126_v3 = vld [vmem:[#allocation18_spill] sm:$0xff]  ;;  %v6138_v46 = vld [vmem:[#allocation87_spill] sm:$0xff]  ;;  %v6141_v16 = vld [vmem:[#allocation80_spill] sm:$0xff] }
 0x9d5   : > { %v1551_v17 = vadd.f32 %v1548_v9, %v1529_v22  ;;  %v1717_v55 = vsel %vm430_vm0, %v6126_v3, %v6114_v57  ;;  %v6136_v22 = vld [vmem:[#allocation10_spill] sm:$0xff]  ;;  %v6146_v7 = vld [vmem:[#allocation91_spill] sm:$0xff]  ;;  %p3278_p3 = pnand %p3277_p2, %p3271_p13 }
 0x9d6   : > { %v1603_v20 = vadd.f32 %v6102_v35, %v1579_v0  ;;  %v1625_v24 = vadd.f32 %v1620_v14, %v1601_v4  ;;  %v6127_v35 = vld [vmem:[#allocation60_spill] sm:$0xff]  ;;  %v1741_v4 = vsel %vm430_vm0, %v6130_v52, %v6117_v10  ;;  %v1782_v14 = vsel %vm561_vm1, %v6134_v62, %v6121_v23  ;;  %v6144_v11 = vld [vmem:[#allocation34_spill] sm:$0xff] }
 0x9d7   : > { %v1578_v63 = vadd.f32 %v1573_v45, %v1551_v17 }
 0x9d8   : > { %v1627_v6 = vadd.f32 %v6103_v2, %v1603_v20  ;;  %v1649_v58 = vadd.f32 %v1644_v61, %v1625_v24  ;;  %v1716_v20 = vsel %vm430_vm0, %v6127_v35, %v6126_v3  ;;  %v6129_v2 = vld [vmem:[#allocation8_spill] sm:$0xff]  ;;  %v1818_v24 = vsel %vm561_vm1, %v6135_v40, %v6125_v44 }
 0x9d9   : > { %v1602_v41 = vadd.f32 %v1597_v18, %v1578_v63  ;;  %v1854_v29 = vsel %vm561_vm1, %v6138_v46, %v6129_v2  ;;  %v2995_v63 = vpop.permute.xlu1 %2994  ;;  %v1998_v44 = vsel %vm561_vm1, %v6146_v7, %v6145_v50 }
 0x9da   : > { %v1651_v19 = vadd.f32 %v6107_v53, %v1627_v6  ;;  %v1673_v13 = vadd.f32 %v1668_v43, %v1649_v58  ;;  %v1855_v6 = vsel %vm561_vm1, %v6129_v2, %v6128_v5  ;;  %v6139_v58 = vld [vmem:[#allocation88_spill] sm:$0xff]  ;;  %v1963_v43 = vsel %vm561_vm1, %v6141_v16, %v6140_v15  ;;  %v6149_v5 = vld [vmem:[#allocation35_spill] sm:$0xff] }
 0x9db   : > { %v1626_v42 = vadd.f32 %v1621_v8, %v1602_v41 }
 0x9dc   : > { %v1675_v26 = vadd.f32 %v6108_v36, %v1651_v19  ;;  %v1697_v0 = vadd.f32 %v1692_v38, %v1673_v13  ;;  %v6131_v19 = vld [vmem:[#allocation61_spill] sm:$0xff]  ;;  %v6132_v36 = vld [vmem:[#allocation70_spill] sm:$0xff]  ;;  %v1999_v38 = vsel %vm561_vm1, %v6145_v50, %v6144_v11 }
 0x9dd   : > { %v1650_v51 = vadd.f32 %v1645_v1, %v1626_v42  ;;  %v1740_v27 = vsel %vm430_vm0, %v6131_v19, %v6130_v52 }
 0x9de   : > { %v1699_v37 = vadd.f32 %v6113_v54, %v1675_v26  ;;  %v1721_v21 = vadd.f32 %v1716_v20, %v1697_v0  ;;  %v6133_v26 = vld [vmem:[#allocation76_spill] sm:$0xff] }
 0x9df   : > { %v1674_v48 = vadd.f32 %v1669_v34, %v1650_v51  ;;  %v1891_v28 = vsel %vm561_vm1, %v6133_v26, %v6132_v36 }
 0x9e0   : > { %v1723_v56 = vadd.f32 %v6114_v57, %v1699_v37  ;;  %v1745_v25 = vadd.f32 %v1740_v27, %v1721_v21  ;;  %v6137_v57 = vld [vmem:[#allocation78_spill] sm:$0xff]  ;;  %v6151_v27 = vld [vmem:[#allocation21_spill] sm:$0xff] }
 0x9e1   : > { %v1698_v60 = vadd.f32 %v1693_v12, %v1674_v48  ;;  %v1926_v23 = vsel %vm561_vm1, %v6142_v49, %v6137_v57  ;;  %v6147_v12 = vld [vmem:[#allocation84_spill] sm:$0xff]  ;;  %v6148_v48 = vld [vmem:[#allocation93_spill] sm:$0xff] }
 0x9e2   : > { %v1747_v30 = vadd.f32 %v6117_v10, %v1723_v56  ;;  %v1787_v54 = vadd.f32 %v6134_v62, %v1745_v25  ;;  %v1927_v56 = vsel %vm561_vm1, %v6137_v57, %v6136_v22  ;;  %v1890_v10 = vsel %vm561_vm1, %v6139_v58, %v6133_v26  ;;  %v6152_v26 = vld [vmem:[#allocation55_spill] sm:$0xff] }
 0x9e3   : > { %v1722_v53 = vadd.f32 %v1717_v55, %v1698_v60  ;;  %v2034_v3 = vsel %vm561_vm1, %v6148_v48, %v6147_v12  ;;  %v2035_v2 = vsel %vm561_vm1, %v6147_v12, %v6149_v5 }
 0x9e4   : > { %v1789_v47 = vadd.f32 %v1783_v59, %v1747_v30  ;;  %v1823_v45 = vadd.f32 %v6135_v40, %v1787_v54 }
 0x9e5   : > { %v1746_v39 = vadd.f32 %v1741_v4, %v1722_v53  ;;  %v6150_v53 = vld [vmem:[#allocation20_spill] sm:$0xff] }
 0x9e6   : > { %v1825_v31 = vadd.f32 %v1819_v33, %v1789_v47  ;;  %v1859_v30 = vadd.f32 %v6138_v46, %v1823_v45  ;;  %v6143_v47 = vld [vmem:[#allocation90_spill] sm:$0xff] }
 0x9e7   : > { %v1788_v37 = vadd.f32 %v1782_v14, %v1746_v39  ;;  %v1962_v13 = vsel %vm561_vm1, %v6143_v47, %v6141_v16 }
 0x9e8   : > { %v1861_v32 = vadd.f32 %v1855_v6, %v1825_v31  ;;  %v1895_v8 = vadd.f32 %v6139_v58, %v1859_v30 }
 0x9e9   : > { %v1824_v17 = vadd.f32 %v1818_v24, %v1788_v37 }
 0x9ea   : > { %v1897_v9 = vadd.f32 %v1891_v28, %v1861_v32  ;;  %v1931_v1 = vadd.f32 %v6142_v49, %v1895_v8 }
 0x9eb   : > { %v1860_v18 = vadd.f32 %v1854_v29, %v1824_v17 }
 0x9ec   : > { %v1933_v61 = vadd.f32 %v1927_v56, %v1897_v9  ;;  %v1967_v51 = vadd.f32 %v6143_v47, %v1931_v1 }
 0x9ed   : > { %v1896_v41 = vadd.f32 %v1890_v10, %v1860_v18 }
 0x9ee   : > { %v1969_v59 = vadd.f32 %v1963_v43, %v1933_v61  ;;  %v2003_v35 = vadd.f32 %v6146_v7, %v1967_v51 }
 0x9ef   : > { %v1932_v42 = vadd.f32 %v1926_v23, %v1896_v41 }
 0x9f0   : > { %v2005_v34 = vadd.f32 %v1999_v38, %v1969_v59  ;;  %v2039_v55 = vadd.f32 %v6148_v48, %v2003_v35 }
 0x9f1   : > { %v1968_v31 = vadd.f32 %v1962_v13, %v1932_v42 }
 0x9f2   : > { %v2041_v6 = vadd.f32 %v2035_v2, %v2005_v34  ;;  %v2042_v19 = vmul.f32 %v2039_v55, %v6150_v53 }
 0x9f3   : > { %v2004_v20 = vadd.f32 %v1998_v44, %v1968_v31 }
 0x9f4   : > { %v2044_v36 = vmul.f32 %v2041_v6, %v6151_v27 }
 0x9f5   : > { %v2040_v60 = vadd.f32 %v2034_v3, %v2004_v20 }
 0x9f7   : > { %v2043_v28 = vmul.f32 %v2040_v60, %v6152_v26 }
 0xa34   : > { %v2485_v33 = vpop.permute.xlu0 %2484 }
 0xa35   : > { %v2487_v0 = vpop.permute.xlu1 %2486 }
 0xa36   : > { %v2490_v52 = vsel %vm1051_vm3, %v2485_v33, %v2487_v0 }
 0xa37   : > { %v2495_v62 = vadd.f32 %v2490_v52, %v2042_v19 }
 0xa39   : > { %v2489_v32 = vpop.permute.xlu0 %2488  ;;  %v2978_v21 = vpop.permute.xlu1 %2977 }
 0xa3a   : > { %v2491_v4 = vsel %vm1051_vm3, %v2487_v0, %v2489_v32  ;;  %v2497_v39 = vadd.f32 %v2489_v32, %v2044_v36 }
 0xa3b   : > { %v2496_v14 = vadd.f32 %v2491_v4, %v2043_v28 }
 0xa3f   : > { %v2982_v9 = vpop.permute.xlu1 %2981  ;;  %v2980_v25 = vpop.permute.xlu0 %2979 }
 0xa40   : > { %v2983_v40 = vsel %vm1331_vm4, %v2978_v21, %v2980_v25  ;;  %v2984_v24 = vsel %vm1331_vm4, %v2980_v25, %v2982_v9  ;;  %v2990_v54 = vadd.f32 %v2982_v9, %v2497_v39 }
 0xa41   : > { %v2988_v37 = vadd.f32 %v2983_v40, %v2495_v62  ;;  %v2989_v22 = vadd.f32 %v2984_v24, %v2496_v14 }
 0xa42   : > { %v2999_v46 = vadd.f32 %v2995_v63, %v2990_v54 }
 0xa43   : > { %v2997_v57 = vadd.f32 %v2995_v63, %v2988_v37  ;;  %v2998_v56 = vadd.f32 %v2995_v63, %v2989_v22 }
 0xa44   : > { %v3002_v45 = vmax.f32 %v2999_v46, 0.0 }
 0xa45   : > { %v3000_v29 = vmax.f32 %v2997_v57, 0.0  ;;  %v3001_v61 = vmax.f32 %v2998_v56, 0.0 }
 0xa47   : > { %3006 = vrot.lane.b32.xlu0 %v3000_v29, %s3347_s13  ;;  %3008 = vrot.lane.b32.xlu1 %v3001_v61, %s3347_s13 }
 0xa4b   : > { %3010 = vrot.lane.b32.xlu0 %v3002_v45, %s3347_s13  ;;  %s3019_s13 = scalar_lea.sflag [#allocation5], %s242_s15 }
 0xab9   : > { %v3007_v17 = vpop.permute.xlu0 %3006  ;;  %v3009_v58 = vpop.permute.xlu1 %3008 }
 0xaba   : > { %v3012_v10 = vsel %vm1365_vm6, %v3007_v17, %v3009_v58 }
 0xabb   : > { %3016 = vst [vmem:[%s244_s10] sm:$0xff] %v3012_v10 }
 0xabd   : > { %v3011_v30 = vpop.permute.xlu0 %3010 }
 0xabe   : > { %v3013_v18 = vsel %vm1365_vm6, %v3009_v58, %v3011_v30 }
 0xabf   : > { %3017 = vst [vmem:[%s244_s10 + $0x8] sm:$0xff] %v3013_v18 }
 0xac0   : > { %3281 = shalt.err (!%p3278_p3)
}
 0xac1   : > { %s3282_s29 = scalar_lea.hbm %s5605_s17, 256  ;;  %s3286_s15 = scalar_lea.hbm %s5654_s6, 512 }
 0xac2   : > { %p3283_p4 = scmp.ne.s32.totalorder %s5605_s17, %s3282_s29  ;;  %p3287_p9 = scmp.lt.u32.totalorder %s5605_s17, %s5654_s6 }
 0xac3   : > { %p3288_p10 = scmp.lt.u32.totalorder %s3286_s15, %s3282_s29  ;;  %p3290_p12 = scmp.lt.u32.totalorder %s3282_s29, %s5605_s17 }
 0xac4   : > { %p3284_p7 = pnand %p3283_p4, %p3422_p5 }
 0xac5   : > { %p3289_p11 = por %p3288_p10, %p3287_p9 }
 0xac6   : > { %p3285_p8 = pneg %p3284_p7 }
 0xac7   : > { %p3291_p13 = por %p3290_p12, %p3289_p11 }
 0xac9   : > { %p3292_p0 = pnand %p3291_p13, %p3285_p8 }
 0xacb   : > { %3295 = shalt.err (!%p3292_p0)
}
 0xacc   : > { %3123 = dma.vmem_to_hbm [thread:$0]  (%p3422_p5), %s5607_s11, 256, %s5605_s17, %s3019_s13  }
 0xacd PF: > { %p3129_p1 = scmp.ge.s32.totalorder %s3330_s24, 2  ;;  %s3045_s10 = sand.u32 1, %s3318_s21  }
 0xace   : > { %s3046_s12 = scalar_lea.sflag [#allocation5], %s3045_s10 }
 0xacf   : > { %p3126_p2 = pnand %p3129_p1, %p3426_p6 }
 0xad1   : > { %3313 = dma.done.wait (!%p3126_p2), %s3046_s12, 256  }
 0xad2   : > { %3315 = vsyncadd (!%p3126_p2), %s3046_s12, 4294967040  ;;  %p16_p3 = scmp.ge.s32.totalorder %s3409_s27, 4   ;;  %s6153_s21 = smov %s3322_s22 }
 0xad3   : > { %s6154_s22 = smov %s3326_s23  ;;  %s6155_s23 = smov %s3420_s30 }
 0xad4   : > { %s6156_s24 = smov %s3409_s27  ;;  %18 = sbr.rel (!%p16_p3) target bundleno = 3 (0x3), region = 96 }
 0xadb   :  { %3051 = vsyncpa [#allocation5], 1 }
 0xadc   :  { %3053 = vsyncpa [#allocation5 + $0x1], 1 }

</bundles_post_ra>
